<compile_context>
chip_gen: v7x
topology: tpu7x:2x2x1
jax: 0.10.0
libtpu: 0.0.40
codegen_flags: <defaults>
</compile_context>

<pallas_src>
import math

import jax
import jax.numpy as jnp
from jax.experimental import pallas as pl
from jax.experimental.pallas import tpu as pltpu

# ----- small, module-consistent hyperparameters -----------------------------
D_MODEL = 32
NUM_HEADS = 4          # d_k = 8
D_FF = 64
NUM_LAYERS = 2
SRC_VOCAB = 100
TGT_VOCAB = 100
V_PAD = 128            # classifier output padded to a lane-dense 128
MAX_SEQ = 16
EPS = 1e-5             # nn.LayerNorm default eps

WEIGHT_KEYS = [
    "enc_wqkv", "enc_bqkv", "enc_wo", "enc_bo",
    "enc_w1", "enc_b1", "enc_w2", "enc_b2", "enc_ln",
    "dec_wqkv", "dec_bqkv", "dec_wo", "dec_bo",
    "dec_cqw", "dec_cqb", "dec_ckvw", "dec_ckvb", "dec_cwo", "dec_cbo",
    "dec_w1", "dec_b1", "dec_w2", "dec_b2", "dec_ln",
    "fc_w", "fc_b",
]


# =========================== fused whole-model kernel ========================
def _transformer_kernel(
    src_ref, tgt_ref, srcm_ref, tgtm_ref,
    e_wqkv, e_bqkv, e_wo, e_bo, e_w1, e_b1, e_w2, e_b2, e_ln,
    d_wqkv, d_bqkv, d_wo, d_bo,
    d_cqw, d_cqb, d_ckvw, d_ckvb, d_cwo, d_cbo,
    d_w1, d_b1, d_w2, d_b2, d_ln,
    fc_w, fc_b,
    out_ref,
):
    Bb, Ss, D = src_ref.shape          # Bb = 1 (one batch element per grid step)
    _, St, _ = tgt_ref.shape
    H = NUM_HEADS
    dk = D // H
    scale = 1.0 / math.sqrt(dk)

    src_keep = srcm_ref[...] > 0.5     # (Bb, 1, Ss) bool, True = valid key
    tgt_keep = tgtm_ref[...] > 0.5     # (Bb, 1, St) bool

    # ---- helpers (all values stay resident in vregs/VMEM) ----
    def linear(x2, w, b):
        return jnp.dot(x2, w, preferred_element_type=jnp.float32) + b

    def layernorm(x2, g, b):
        mean = jnp.mean(x2, axis=-1, keepdims=True)
        cen = x2 - mean
        var = jnp.mean(cen * cen, axis=-1, keepdims=True)
        return cen * jax.lax.rsqrt(var + EPS) * g + b

    def softmax_last(s):
        m = jnp.max(s, axis=-1, keepdims=True)
        e = jnp.exp(s - m)
        denom = jnp.sum(e, axis=-1, keepdims=True)
        return e * pl.reciprocal(denom, approx=True)

    def attend(q3, k3, v3, keep_keys, causal):
        # q3: (Bb, Sq, D), k3/v3: (Bb, Sk, D), keep_keys: (Bb, 1, Sk) bool
        Sq, Sk = q3.shape[1], k3.shape[1]
        if causal:
            r = jax.lax.broadcasted_iota(jnp.int32, (Sq, Sk), 0)
            c = jax.lax.broadcasted_iota(jnp.int32, (Sq, Sk), 1)
            cmask = (c <= r)[None, :, :]            # (1, Sq, Sk)
        outs = []
        for h in range(H):
            lo, hi = h * dk, (h + 1) * dk
            qh = q3[:, :, lo:hi]
            kh = k3[:, :, lo:hi]
            vh = v3[:, :, lo:hi]
            # scores: contract last axes, batch over Bb (no explicit K transpose)
            s = jax.lax.dot_general(
                qh, kh, (((2,), (2,)), ((0,), (0,))),
                preferred_element_type=jnp.float32) * scale     # (Bb, Sq, Sk)
            keep = keep_keys
            if causal:
                keep = jnp.logical_and(keep, cmask)
            s = jnp.where(keep, s, -1e9)
            p = softmax_last(s)
            oh = jax.lax.dot_general(
                p, vh, (((2,), (1,)), ((0,), (0,))),
                preferred_element_type=jnp.float32)             # (Bb, Sq, dk)
            outs.append(oh)
        return jnp.concatenate(outs, axis=-1)                   # (Bb, Sq, D)

    # ---- encoder layer ----
    def enc_layer(x3, l):
        M = Bb * Ss
        x2 = x3.reshape(M, D)
        ln = e_ln[l]                                            # (4, D)
        qkv = linear(x2, e_wqkv[l], e_bqkv[l])                  # (M, 3D) fused QKV
        q3 = qkv[:, :D].reshape(Bb, Ss, D)
        k3 = qkv[:, D:2 * D].reshape(Bb, Ss, D)
        v3 = qkv[:, 2 * D:].reshape(Bb, Ss, D)
        a = attend(q3, k3, v3, src_keep, causal=False)
        a2 = linear(a.reshape(M, D), e_wo[l], e_bo[l])
        x2 = layernorm(x2 + a2, ln[0:1, :], ln[1:2, :])
        hid = jnp.maximum(linear(x2, e_w1[l], e_b1[l]), 0.0)
        f2 = linear(hid, e_w2[l], e_b2[l])
        x2 = layernorm(x2 + f2, ln[2:3, :], ln[3:4, :])
        return x2.reshape(Bb, Ss, D)

    # ---- decoder layer ----
    def dec_layer(x3, enc3, l):
        M = Bb * St
        Me = Bb * Ss
        x2 = x3.reshape(M, D)
        ln = d_ln[l]                                            # (6, D)
        # masked self-attention (fused QKV)
        qkv = linear(x2, d_wqkv[l], d_bqkv[l])
        q3 = qkv[:, :D].reshape(Bb, St, D)
        k3 = qkv[:, D:2 * D].reshape(Bb, St, D)
        v3 = qkv[:, 2 * D:].reshape(Bb, St, D)
        a = attend(q3, k3, v3, tgt_keep, causal=True)
        a2 = linear(a.reshape(M, D), d_wo[l], d_bo[l])
        x2 = layernorm(x2 + a2, ln[0:1, :], ln[1:2, :])
        # cross-attention (fused KV on encoder output)
        q2 = linear(x2, d_cqw[l], d_cqb[l])
        kv = linear(enc3.reshape(Me, D), d_ckvw[l], d_ckvb[l])  # (Me, 2D)
        q3 = q2.reshape(Bb, St, D)
        k3 = kv[:, :D].reshape(Bb, Ss, D)
        v3 = kv[:, D:].reshape(Bb, Ss, D)
        a = attend(q3, k3, v3, src_keep, causal=False)
        a2 = linear(a.reshape(M, D), d_cwo[l], d_cbo[l])
        x2 = layernorm(x2 + a2, ln[2:3, :], ln[3:4, :])
        # position-wise feed forward
        hid = jnp.maximum(linear(x2, d_w1[l], d_b1[l]), 0.0)
        f2 = linear(hid, d_w2[l], d_b2[l])
        x2 = layernorm(x2 + f2, ln[4:5, :], ln[5:6, :])
        return x2.reshape(Bb, St, D)

    # ---- full stack ----
    enc = src_ref[...]
    for l in range(NUM_LAYERS):
        enc = enc_layer(enc, l)
    dec = tgt_ref[...]
    for l in range(NUM_LAYERS):
        dec = dec_layer(dec, enc, l)

    logits = linear(dec.reshape(Bb * St, D), fc_w[...], fc_b[...])   # (M, 128)
    out_ref[...] = logits.reshape(Bb, St, V_PAD)


def _full_block_spec(arr):
    """Whole-array VMEM block, resident across all grid steps."""
    ndim = arr.ndim
    return pl.BlockSpec(arr.shape, lambda *_args, _n=ndim: (0,) * _n)


def transformer_forward(params, src, tgt):
    B, Ss = src.shape
    _, St = tgt.shape
    D = D_MODEL

    pe = params["pe"]
    # embedding lookup + positional encoding (dropout = identity in eval mode)
    src_emb = (jnp.take(params["enc_emb"], src, axis=0) + pe[None, :Ss]).astype(jnp.float32)
    tgt_emb = (jnp.take(params["dec_emb"], tgt, axis=0) + pe[None, :St]).astype(jnp.float32)
    # compact pad masks; causal mask is built in-kernel from iota
    src_keep = (src != 0).astype(jnp.float32)[:, None, :]   # (B, 1, Ss)
    tgt_keep = (tgt != 0).astype(jnp.float32)[:, None, :]   # (B, 1, St)

    weights = [params[k] for k in WEIGHT_KEYS]

    in_specs = [
        pl.BlockSpec((1, Ss, D), lambda b: (b, 0, 0)),
        pl.BlockSpec((1, St, D), lambda b: (b, 0, 0)),
        pl.BlockSpec((1, 1, Ss), lambda b: (b, 0, 0)),
        pl.BlockSpec((1, 1, St), lambda b: (b, 0, 0)),
    ] + [_full_block_spec(w) for w in weights]

    out = pl.pallas_call(
        _transformer_kernel,
        out_shape=jax.ShapeDtypeStruct((B, St, V_PAD), jnp.float32),
        grid=(B,),
        in_specs=in_specs,
        out_specs=pl.BlockSpec((1, St, V_PAD), lambda b: (b, 0, 0)),
        compiler_params=pltpu.CompilerParams(
            dimension_semantics=("parallel",)),
    )(src_emb, tgt_emb, src_keep, tgt_keep, *weights)

    return out[:, :, :TGT_VOCAB]


# ============================ deterministic init =============================
def make_positional_encoding(max_len, d_model):
    pos = jnp.arange(max_len, dtype=jnp.float32)[:, None]
    div = jnp.exp(
        jnp.arange(0, d_model, 2, dtype=jnp.float32) * (-math.log(10000.0) / d_model)
    )
    pe = jnp.zeros((max_len, d_model), dtype=jnp.float32)
    pe = pe.at[:, 0::2].set(jnp.sin(pos * div))
    pe = pe.at[:, 1::2].set(jnp.cos(pos * div))
    return pe


def init_params(key):
    keys = iter(jax.random.split(key, 40))

    def nk():
        return next(keys)

    def unif(shape, fan_in):
        bound = 1.0 / math.sqrt(fan_in)
        return jax.random.uniform(nk(), shape, jnp.float32, -bound, bound)

    L, D, F = NUM_LAYERS, D_MODEL, D_FF
    p = {}
    p["enc_emb"] = jax.random.normal(nk(), (SRC_VOCAB, D), jnp.float32)
    p["dec_emb"] = jax.random.normal(nk(), (TGT_VOCAB, D), jnp.float32)
    p["pe"] = make_positional_encoding(MAX_SEQ, D)

    # encoder (stacked over layers)
    p["enc_wqkv"] = unif((L, D, 3 * D), D)
    p["enc_bqkv"] = unif((L, 1, 3 * D), D)
    p["enc_wo"] = unif((L, D, D), D)
    p["enc_bo"] = unif((L, 1, D), D)
    p["enc_w1"] = unif((L, D, F), D)
    p["enc_b1"] = unif((L, 1, F), D)
    p["enc_w2"] = unif((L, F, D), F)
    p["enc_b2"] = unif((L, 1, D), F)
    p["enc_ln"] = jnp.tile(
        jnp.array([1.0, 0.0, 1.0, 0.0], jnp.float32)[None, :, None], (L, 1, D))

    # decoder (stacked over layers)
    p["dec_wqkv"] = unif((L, D, 3 * D), D)
    p["dec_bqkv"] = unif((L, 1, 3 * D), D)
    p["dec_wo"] = unif((L, D, D), D)
    p["dec_bo"] = unif((L, 1, D), D)
    p["dec_cqw"] = unif((L, D, D), D)
    p["dec_cqb"] = unif((L, 1, D), D)
    p["dec_ckvw"] = unif((L, D, 2 * D), D)
    p["dec_ckvb"] = unif((L, 1, 2 * D), D)
    p["dec_cwo"] = unif((L, D, D), D)
    p["dec_cbo"] = unif((L, 1, D), D)
    p["dec_w1"] = unif((L, D, F), D)
    p["dec_b1"] = unif((L, 1, F), D)
    p["dec_w2"] = unif((L, F, D), F)
    p["dec_b2"] = unif((L, 1, D), F)
    p["dec_ln"] = jnp.tile(
        jnp.array([1.0, 0.0, 1.0, 0.0, 1.0, 0.0], jnp.float32)[None, :, None], (L, 1, D))

    # final classifier, zero-padded to a lane-dense 128-wide output
    fc_w = unif((D, TGT_VOCAB), D)
    fc_b = unif((1, TGT_VOCAB), D)
    p["fc_w"] = jnp.zeros((D, V_PAD), jnp.float32).at[:, :TGT_VOCAB].set(fc_w)
    p["fc_b"] = jnp.zeros((1, V_PAD), jnp.float32).at[:, :TGT_VOCAB].set(fc_b)
    return p


# =========================== pure-JAX reference ==============================
def reference_forward(params, src, tgt):
    D, H = D_MODEL, NUM_HEADS
    dk = D // H
    scale = 1.0 / math.sqrt(dk)
    B, Ss = src.shape
    _, St = tgt.shape
    pe = params["pe"]
    enc = jnp.take(params["enc_emb"], src, axis=0) + pe[None, :Ss]
    dec = jnp.take(params["dec_emb"], tgt, axis=0) + pe[None, :St]
    src_keep = (src != 0)[:, None, None, :]                       # (B,1,1,Ss)
    causal = jnp.tril(jnp.ones((St, St), bool))
    tgt_keep = (tgt != 0)[:, None, None, :] & causal[None, None]  # (B,1,St,St)

    def split(x):
        Bx, S, _ = x.shape
        return x.reshape(Bx, S, H, dk).transpose(0, 2, 1, 3)

    def attn(q, k, v, keep):
        qh, kh, vh = split(q), split(k), split(v)
        s = jnp.einsum("bhqd,bhkd->bhqk", qh, kh) * scale
        s = jnp.where(keep, s, -1e9)
        p = jax.nn.softmax(s, axis=-1)
        o = jnp.einsum("bhqk,bhkd->bhqd", p, vh)
        return o.transpose(0, 2, 1, 3).reshape(q.shape[0], q.shape[1], D)

    def ln(x, g, b):
        m = x.mean(-1, keepdims=True)
        v = ((x - m) ** 2).mean(-1, keepdims=True)
        return (x - m) / jnp.sqrt(v + EPS) * g + b

    w = params
    for l in range(NUM_LAYERS):
        qkv = enc @ w["enc_wqkv"][l] + w["enc_bqkv"][l]
        q, k, v = qkv[..., :D], qkv[..., D:2 * D], qkv[..., 2 * D:]
        a = attn(q, k, v, src_keep) @ w["enc_wo"][l] + w["enc_bo"][l]
        enc = ln(enc + a, w["enc_ln"][l][0], w["enc_ln"][l][1])
        f = jnp.maximum(enc @ w["enc_w1"][l] + w["enc_b1"][l], 0.0) @ w["enc_w2"][l] + w["enc_b2"][l]
        enc = ln(enc + f, w["enc_ln"][l][2], w["enc_ln"][l][3])
    for l in range(NUM_LAYERS):
        qkv = dec @ w["dec_wqkv"][l] + w["dec_bqkv"][l]
        q, k, v = qkv[..., :D], qkv[..., D:2 * D], qkv[..., 2 * D:]
        a = attn(q, k, v, tgt_keep) @ w["dec_wo"][l] + w["dec_bo"][l]
        dec = ln(dec + a, w["dec_ln"][l][0], w["dec_ln"][l][1])
        q = dec @ w["dec_cqw"][l] + w["dec_cqb"][l]
        kv = enc @ w["dec_ckvw"][l] + w["dec_ckvb"][l]
        k, v = kv[..., :D], kv[..., D:]
        a = attn(q, k, v, src_keep) @ w["dec_cwo"][l] + w["dec_cbo"][l]
        dec = ln(dec + a, w["dec_ln"][l][2], w["dec_ln"][l][3])
        f = jnp.maximum(dec @ w["dec_w1"][l] + w["dec_b1"][l], 0.0) @ w["dec_w2"][l] + w["dec_b2"][l]
        dec = ln(dec + f, w["dec_ln"][l][4], w["dec_ln"][l][5])
    return dec @ w["fc_w"][:, :TGT_VOCAB] + w["fc_b"][0, :TGT_VOCAB]


# ==================================== main ===================================
if __name__ == "__main__":
    key = jax.random.PRNGKey(0)
    kp, ks_, kt_ = jax.random.split(key, 3)

    params = init_params(kp)

    B, S = 2, 8
    src = jax.random.randint(ks_, (B, S), 1, SRC_VOCAB)
    tgt = jax.random.randint(kt_, (B, S), 1, TGT_VOCAB)
    # add some padding (token id 0) so the masks actually do something
    src = src.at[:, -2:].set(0)
    tgt = tgt.at[:, -1:].set(0)

    fwd = jax.jit(transformer_forward)
    out = jax.block_until_ready(fwd(params, src, tgt))

    assert out.shape == (B, S, TGT_VOCAB), out.shape
    assert bool(jnp.all(jnp.isfinite(out)))

    ref = jax.block_until_ready(jax.jit(reference_forward)(params, src, tgt))
    max_err = float(jnp.max(jnp.abs(out - ref)))
    assert max_err < 1e-1, f"mismatch vs pure-JAX reference: {max_err}"

    print("KERNEL_OK")
</pallas_src>

<mosaic_0001>
module attributes {stable_mosaic.version = 11 : i64} {
  func.func @_transformer_kernel(%arg0: i32, %arg1: memref<1x8x32xf32, #tpu.memory_space<vmem>>, %arg2: memref<1x8x32xf32, #tpu.memory_space<vmem>>, %arg3: memref<1x1x8xf32, #tpu.memory_space<vmem>>, %arg4: memref<1x1x8xf32, #tpu.memory_space<vmem>>, %arg5: memref<2x32x96xf32, #tpu.memory_space<vmem>>, %arg6: memref<2x1x96xf32, #tpu.memory_space<vmem>>, %arg7: memref<2x32x32xf32, #tpu.memory_space<vmem>>, %arg8: memref<2x1x32xf32, #tpu.memory_space<vmem>>, %arg9: memref<2x32x64xf32, #tpu.memory_space<vmem>>, %arg10: memref<2x1x64xf32, #tpu.memory_space<vmem>>, %arg11: memref<2x64x32xf32, #tpu.memory_space<vmem>>, %arg12: memref<2x1x32xf32, #tpu.memory_space<vmem>>, %arg13: memref<2x4x32xf32, #tpu.memory_space<vmem>>, %arg14: memref<2x32x96xf32, #tpu.memory_space<vmem>>, %arg15: memref<2x1x96xf32, #tpu.memory_space<vmem>>, %arg16: memref<2x32x32xf32, #tpu.memory_space<vmem>>, %arg17: memref<2x1x32xf32, #tpu.memory_space<vmem>>, %arg18: memref<2x32x32xf32, #tpu.memory_space<vmem>>, %arg19: memref<2x1x32xf32, #tpu.memory_space<vmem>>, %arg20: memref<2x32x64xf32, #tpu.memory_space<vmem>>, %arg21: memref<2x1x64xf32, #tpu.memory_space<vmem>>, %arg22: memref<2x32x32xf32, #tpu.memory_space<vmem>>, %arg23: memref<2x1x32xf32, #tpu.memory_space<vmem>>, %arg24: memref<2x32x64xf32, #tpu.memory_space<vmem>>, %arg25: memref<2x1x64xf32, #tpu.memory_space<vmem>>, %arg26: memref<2x64x32xf32, #tpu.memory_space<vmem>>, %arg27: memref<2x1x32xf32, #tpu.memory_space<vmem>>, %arg28: memref<2x6x32xf32, #tpu.memory_space<vmem>>, %arg29: memref<32x128xf32, #tpu.memory_space<vmem>>, %arg30: memref<1x128xf32, #tpu.memory_space<vmem>>, %arg31: memref<1x8x128xf32, #tpu.memory_space<vmem>>) attributes {dimension_semantics = [#tpu.dimension_semantics<parallel>], iteration_bounds = array<i64: 2>, scalar_prefetch = 0 : i64, scratch_operands = 0 : i64, tpu.core_type = #tpu.core_type<tc>, window_params = [{transform_indices = @transform_0, window_bounds = array<i64: 1, 8, 32>}, {transform_indices = @transform_1, window_bounds = array<i64: 1, 8, 32>}, {transform_indices = @transform_2, window_bounds = array<i64: 1, 1, 8>}, {transform_indices = @transform_3, window_bounds = array<i64: 1, 1, 8>}, {pipeline_mode = #tpu.pipeline_mode<synchronous>, transform_indices = @transform_4, window_bounds = array<i64: 2, 32, 96>}, {pipeline_mode = #tpu.pipeline_mode<synchronous>, transform_indices = @transform_5, window_bounds = array<i64: 2, 1, 96>}, {pipeline_mode = #tpu.pipeline_mode<synchronous>, transform_indices = @transform_6, window_bounds = array<i64: 2, 32, 32>}, {pipeline_mode = #tpu.pipeline_mode<synchronous>, transform_indices = @transform_7, window_bounds = array<i64: 2, 1, 32>}, {pipeline_mode = #tpu.pipeline_mode<synchronous>, transform_indices = @transform_8, window_bounds = array<i64: 2, 32, 64>}, {pipeline_mode = #tpu.pipeline_mode<synchronous>, transform_indices = @transform_9, window_bounds = array<i64: 2, 1, 64>}, {pipeline_mode = #tpu.pipeline_mode<synchronous>, transform_indices = @transform_10, window_bounds = array<i64: 2, 64, 32>}, {pipeline_mode = #tpu.pipeline_mode<synchronous>, transform_indices = @transform_11, window_bounds = array<i64: 2, 1, 32>}, {pipeline_mode = #tpu.pipeline_mode<synchronous>, transform_indices = @transform_12, window_bounds = array<i64: 2, 4, 32>}, {pipeline_mode = #tpu.pipeline_mode<synchronous>, transform_indices = @transform_13, window_bounds = array<i64: 2, 32, 96>}, {pipeline_mode = #tpu.pipeline_mode<synchronous>, transform_indices = @transform_14, window_bounds = array<i64: 2, 1, 96>}, {pipeline_mode = #tpu.pipeline_mode<synchronous>, transform_indices = @transform_15, window_bounds = array<i64: 2, 32, 32>}, {pipeline_mode = #tpu.pipeline_mode<synchronous>, transform_indices = @transform_16, window_bounds = array<i64: 2, 1, 32>}, {pipeline_mode = #tpu.pipeline_mode<synchronous>, transform_indices = @transform_17, window_bounds = array<i64: 2, 32, 32>}, {pipeline_mode = #tpu.pipeline_mode<synchronous>, transform_indices = @transform_18, window_bounds = array<i64: 2, 1, 32>}, {pipeline_mode = #tpu.pipeline_mode<synchronous>, transform_indices = @transform_19, window_bounds = array<i64: 2, 32, 64>}, {pipeline_mode = #tpu.pipeline_mode<synchronous>, transform_indices = @transform_20, window_bounds = array<i64: 2, 1, 64>}, {pipeline_mode = #tpu.pipeline_mode<synchronous>, transform_indices = @transform_21, window_bounds = array<i64: 2, 32, 32>}, {pipeline_mode = #tpu.pipeline_mode<synchronous>, transform_indices = @transform_22, window_bounds = array<i64: 2, 1, 32>}, {pipeline_mode = #tpu.pipeline_mode<synchronous>, transform_indices = @transform_23, window_bounds = array<i64: 2, 32, 64>}, {pipeline_mode = #tpu.pipeline_mode<synchronous>, transform_indices = @transform_24, window_bounds = array<i64: 2, 1, 64>}, {pipeline_mode = #tpu.pipeline_mode<synchronous>, transform_indices = @transform_25, window_bounds = array<i64: 2, 64, 32>}, {pipeline_mode = #tpu.pipeline_mode<synchronous>, transform_indices = @transform_26, window_bounds = array<i64: 2, 1, 32>}, {pipeline_mode = #tpu.pipeline_mode<synchronous>, transform_indices = @transform_27, window_bounds = array<i64: 2, 6, 32>}, {pipeline_mode = #tpu.pipeline_mode<synchronous>, transform_indices = @transform_28, window_bounds = array<i64: 32, 128>}, {pipeline_mode = #tpu.pipeline_mode<synchronous>, transform_indices = @transform_29, window_bounds = array<i64: 1, 128>}, {transform_indices = @transform_30, window_bounds = array<i64: 1, 8, 128>}]} {
    %c0 = arith.constant 0 : index
    %c0_0 = arith.constant 0 : index
    %c0_1 = arith.constant 0 : index
    %0 = vector.load %arg3[%c0, %c0_0, %c0_1] : memref<1x1x8xf32, #tpu.memory_space<vmem>>, vector<1x1x8xf32>
    %cst = arith.constant 5.000000e-01 : f32
    %1 = vector.broadcast %cst : f32 to vector<1x1x8xf32>
    %2 = arith.cmpf ogt, %0, %1 : vector<1x1x8xf32>
    %c0_2 = arith.constant 0 : index
    %c0_3 = arith.constant 0 : index
    %c0_4 = arith.constant 0 : index
    %3 = vector.load %arg4[%c0_2, %c0_3, %c0_4] : memref<1x1x8xf32, #tpu.memory_space<vmem>>, vector<1x1x8xf32>
    %cst_5 = arith.constant 5.000000e-01 : f32
    %4 = vector.broadcast %cst_5 : f32 to vector<1x1x8xf32>
    %5 = arith.cmpf ogt, %3, %4 : vector<1x1x8xf32>
    %c0_6 = arith.constant 0 : index
    %c0_7 = arith.constant 0 : index
    %c0_8 = arith.constant 0 : index
    %6 = vector.load %arg1[%c0_6, %c0_7, %c0_8] : memref<1x8x32xf32, #tpu.memory_space<vmem>>, vector<1x8x32xf32>
    %7 = vector.shape_cast %6 : vector<1x8x32xf32> to vector<8x32xf32>
    %c0_9 = arith.constant 0 : index
    %c0_10 = arith.constant 0 : index
    %c0_11 = arith.constant 0 : index
    %8 = vector.load %arg13[%c0_9, %c0_10, %c0_11] : memref<2x4x32xf32, #tpu.memory_space<vmem>>, vector<1x4x32xf32>
    %9 = vector.shape_cast %8 : vector<1x4x32xf32> to vector<4x32xf32>
    %c0_12 = arith.constant 0 : index
    %c0_13 = arith.constant 0 : index
    %c0_14 = arith.constant 0 : index
    %10 = vector.load %arg5[%c0_12, %c0_13, %c0_14] : memref<2x32x96xf32, #tpu.memory_space<vmem>>, vector<1x32x96xf32>
    %11 = vector.shape_cast %10 : vector<1x32x96xf32> to vector<32x96xf32>
    %c0_15 = arith.constant 0 : index
    %c0_16 = arith.constant 0 : index
    %c0_17 = arith.constant 0 : index
    %12 = vector.load %arg6[%c0_15, %c0_16, %c0_17] : memref<2x1x96xf32, #tpu.memory_space<vmem>>, vector<1x1x96xf32>
    %13 = vector.shape_cast %12 : vector<1x1x96xf32> to vector<1x96xf32>
    %cst_18 = arith.constant dense<0.000000e+00> : vector<8x96xf32>
    %14 = tpu.matmul %7, %11, %cst_18 {dimension_numbers = #tpu.dot_dimension_numbers<[1], [0], [0], [1], [0, 0, 1, 1], [], []>} : vector<8x32xf32>, vector<32x96xf32>, vector<8x96xf32> -> vector<8x96xf32>
    %15 = vector.broadcast %13 : vector<1x96xf32> to vector<8x96xf32>
    %16 = arith.addf %14, %15 : vector<8x96xf32>
    %17 = vector.extract_strided_slice %16 {offsets = [0, 0], sizes = [8, 32], strides = [1, 1]} : vector<8x96xf32> to vector<8x32xf32>
    %18 = vector.shape_cast %17 : vector<8x32xf32> to vector<1x8x32xf32>
    %19 = vector.extract_strided_slice %16 {offsets = [0, 32], sizes = [8, 32], strides = [1, 1]} : vector<8x96xf32> to vector<8x32xf32>
    %20 = vector.shape_cast %19 : vector<8x32xf32> to vector<1x8x32xf32>
    %21 = vector.extract_strided_slice %16 {offsets = [0, 64], sizes = [8, 32], strides = [1, 1]} : vector<8x96xf32> to vector<8x32xf32>
    %22 = vector.shape_cast %21 : vector<8x32xf32> to vector<1x8x32xf32>
    %23 = vector.extract_strided_slice %18 {offsets = [0, 0, 0], sizes = [1, 8, 8], strides = [1, 1, 1]} : vector<1x8x32xf32> to vector<1x8x8xf32>
    %24 = vector.extract_strided_slice %20 {offsets = [0, 0, 0], sizes = [1, 8, 8], strides = [1, 1, 1]} : vector<1x8x32xf32> to vector<1x8x8xf32>
    %25 = vector.extract_strided_slice %22 {offsets = [0, 0, 0], sizes = [1, 8, 8], strides = [1, 1, 1]} : vector<1x8x32xf32> to vector<1x8x8xf32>
    %cst_19 = arith.constant dense<0.000000e+00> : vector<1x8x8xf32>
    %26 = tpu.matmul %23, %24, %cst_19 {dimension_numbers = #tpu.dot_dimension_numbers<[2], [2], [1], [1], [0, 0, 0, 1, 1, 1], [0], [0]>} : vector<1x8x8xf32>, vector<1x8x8xf32>, vector<1x8x8xf32> -> vector<1x8x8xf32>
    %cst_20 = arith.constant 0.353553385 : f32
    %27 = vector.broadcast %cst_20 : f32 to vector<1x8x8xf32>
    %28 = arith.mulf %26, %27 : vector<1x8x8xf32>
    %cst_21 = arith.constant -1.000000e+09 : f32
    %29 = vector.shape_cast %2 : vector<1x1x8xi1> to vector<1x1x8xi1>
    %30 = vector.broadcast %29 : vector<1x1x8xi1> to vector<1x8x8xi1>
    %31 = vector.broadcast %cst_21 : f32 to vector<1x8x8xf32>
    %32 = arith.select %30, %28, %31 : vector<1x8x8xi1>, vector<1x8x8xf32>
    %cst_22 = arith.constant dense<0xFF800000> : vector<1x8xf32>
    %33 = vector.multi_reduction <maximumf>, %32, %cst_22 [2] : vector<1x8x8xf32> to vector<1x8xf32>
    %34 = vector.shape_cast %33 : vector<1x8xf32> to vector<1x8x1xf32>
    %35 = vector.broadcast %34 : vector<1x8x1xf32> to vector<1x8x8xf32>
    %36 = arith.subf %32, %35 : vector<1x8x8xf32>
    %37 = math.exp %36 : vector<1x8x8xf32>
    %cst_23 = arith.constant dense<0.000000e+00> : vector<1x8xf32>
    %38 = vector.multi_reduction <add>, %37, %cst_23 [2] : vector<1x8x8xf32> to vector<1x8xf32>
    %39 = vector.shape_cast %38 : vector<1x8xf32> to vector<1x8x1xf32>
    %40 = tpu.reciprocal %39 {approx = true} : vector<1x8x1xf32> -> vector<1x8x1xf32>
    %41 = vector.broadcast %40 : vector<1x8x1xf32> to vector<1x8x8xf32>
    %42 = arith.mulf %37, %41 : vector<1x8x8xf32>
    %cst_24 = arith.constant dense<0.000000e+00> : vector<1x8x8xf32>
    %43 = tpu.matmul %42, %25, %cst_24 {dimension_numbers = #tpu.dot_dimension_numbers<[2], [1], [1], [2], [0, 0, 0, 1, 1, 2], [0], [0]>} : vector<1x8x8xf32>, vector<1x8x8xf32>, vector<1x8x8xf32> -> vector<1x8x8xf32>
    %44 = vector.extract_strided_slice %18 {offsets = [0, 0, 8], sizes = [1, 8, 8], strides = [1, 1, 1]} : vector<1x8x32xf32> to vector<1x8x8xf32>
    %45 = vector.extract_strided_slice %20 {offsets = [0, 0, 8], sizes = [1, 8, 8], strides = [1, 1, 1]} : vector<1x8x32xf32> to vector<1x8x8xf32>
    %46 = vector.extract_strided_slice %22 {offsets = [0, 0, 8], sizes = [1, 8, 8], strides = [1, 1, 1]} : vector<1x8x32xf32> to vector<1x8x8xf32>
    %cst_25 = arith.constant dense<0.000000e+00> : vector<1x8x8xf32>
    %47 = tpu.matmul %44, %45, %cst_25 {dimension_numbers = #tpu.dot_dimension_numbers<[2], [2], [1], [1], [0, 0, 0, 1, 1, 1], [0], [0]>} : vector<1x8x8xf32>, vector<1x8x8xf32>, vector<1x8x8xf32> -> vector<1x8x8xf32>
    %cst_26 = arith.constant 0.353553385 : f32
    %48 = vector.broadcast %cst_26 : f32 to vector<1x8x8xf32>
    %49 = arith.mulf %47, %48 : vector<1x8x8xf32>
    %cst_27 = arith.constant -1.000000e+09 : f32
    %50 = vector.shape_cast %2 : vector<1x1x8xi1> to vector<1x1x8xi1>
    %51 = vector.broadcast %50 : vector<1x1x8xi1> to vector<1x8x8xi1>
    %52 = vector.broadcast %cst_27 : f32 to vector<1x8x8xf32>
    %53 = arith.select %51, %49, %52 : vector<1x8x8xi1>, vector<1x8x8xf32>
    %cst_28 = arith.constant dense<0xFF800000> : vector<1x8xf32>
    %54 = vector.multi_reduction <maximumf>, %53, %cst_28 [2] : vector<1x8x8xf32> to vector<1x8xf32>
    %55 = vector.shape_cast %54 : vector<1x8xf32> to vector<1x8x1xf32>
    %56 = vector.broadcast %55 : vector<1x8x1xf32> to vector<1x8x8xf32>
    %57 = arith.subf %53, %56 : vector<1x8x8xf32>
    %58 = math.exp %57 : vector<1x8x8xf32>
    %cst_29 = arith.constant dense<0.000000e+00> : vector<1x8xf32>
    %59 = vector.multi_reduction <add>, %58, %cst_29 [2] : vector<1x8x8xf32> to vector<1x8xf32>
    %60 = vector.shape_cast %59 : vector<1x8xf32> to vector<1x8x1xf32>
    %61 = tpu.reciprocal %60 {approx = true} : vector<1x8x1xf32> -> vector<1x8x1xf32>
    %62 = vector.broadcast %61 : vector<1x8x1xf32> to vector<1x8x8xf32>
    %63 = arith.mulf %58, %62 : vector<1x8x8xf32>
    %cst_30 = arith.constant dense<0.000000e+00> : vector<1x8x8xf32>
    %64 = tpu.matmul %63, %46, %cst_30 {dimension_numbers = #tpu.dot_dimension_numbers<[2], [1], [1], [2], [0, 0, 0, 1, 1, 2], [0], [0]>} : vector<1x8x8xf32>, vector<1x8x8xf32>, vector<1x8x8xf32> -> vector<1x8x8xf32>
    %65 = vector.extract_strided_slice %18 {offsets = [0, 0, 16], sizes = [1, 8, 8], strides = [1, 1, 1]} : vector<1x8x32xf32> to vector<1x8x8xf32>
    %66 = vector.extract_strided_slice %20 {offsets = [0, 0, 16], sizes = [1, 8, 8], strides = [1, 1, 1]} : vector<1x8x32xf32> to vector<1x8x8xf32>
    %67 = vector.extract_strided_slice %22 {offsets = [0, 0, 16], sizes = [1, 8, 8], strides = [1, 1, 1]} : vector<1x8x32xf32> to vector<1x8x8xf32>
    %cst_31 = arith.constant dense<0.000000e+00> : vector<1x8x8xf32>
    %68 = tpu.matmul %65, %66, %cst_31 {dimension_numbers = #tpu.dot_dimension_numbers<[2], [2], [1], [1], [0, 0, 0, 1, 1, 1], [0], [0]>} : vector<1x8x8xf32>, vector<1x8x8xf32>, vector<1x8x8xf32> -> vector<1x8x8xf32>
    %cst_32 = arith.constant 0.353553385 : f32
    %69 = vector.broadcast %cst_32 : f32 to vector<1x8x8xf32>
    %70 = arith.mulf %68, %69 : vector<1x8x8xf32>
    %cst_33 = arith.constant -1.000000e+09 : f32
    %71 = vector.shape_cast %2 : vector<1x1x8xi1> to vector<1x1x8xi1>
    %72 = vector.broadcast %71 : vector<1x1x8xi1> to vector<1x8x8xi1>
    %73 = vector.broadcast %cst_33 : f32 to vector<1x8x8xf32>
    %74 = arith.select %72, %70, %73 : vector<1x8x8xi1>, vector<1x8x8xf32>
    %cst_34 = arith.constant dense<0xFF800000> : vector<1x8xf32>
    %75 = vector.multi_reduction <maximumf>, %74, %cst_34 [2] : vector<1x8x8xf32> to vector<1x8xf32>
    %76 = vector.shape_cast %75 : vector<1x8xf32> to vector<1x8x1xf32>
    %77 = vector.broadcast %76 : vector<1x8x1xf32> to vector<1x8x8xf32>
    %78 = arith.subf %74, %77 : vector<1x8x8xf32>
    %79 = math.exp %78 : vector<1x8x8xf32>
    %cst_35 = arith.constant dense<0.000000e+00> : vector<1x8xf32>
    %80 = vector.multi_reduction <add>, %79, %cst_35 [2] : vector<1x8x8xf32> to vector<1x8xf32>
    %81 = vector.shape_cast %80 : vector<1x8xf32> to vector<1x8x1xf32>
    %82 = tpu.reciprocal %81 {approx = true} : vector<1x8x1xf32> -> vector<1x8x1xf32>
    %83 = vector.broadcast %82 : vector<1x8x1xf32> to vector<1x8x8xf32>
    %84 = arith.mulf %79, %83 : vector<1x8x8xf32>
    %cst_36 = arith.constant dense<0.000000e+00> : vector<1x8x8xf32>
    %85 = tpu.matmul %84, %67, %cst_36 {dimension_numbers = #tpu.dot_dimension_numbers<[2], [1], [1], [2], [0, 0, 0, 1, 1, 2], [0], [0]>} : vector<1x8x8xf32>, vector<1x8x8xf32>, vector<1x8x8xf32> -> vector<1x8x8xf32>
    %86 = vector.extract_strided_slice %18 {offsets = [0, 0, 24], sizes = [1, 8, 8], strides = [1, 1, 1]} : vector<1x8x32xf32> to vector<1x8x8xf32>
    %87 = vector.extract_strided_slice %20 {offsets = [0, 0, 24], sizes = [1, 8, 8], strides = [1, 1, 1]} : vector<1x8x32xf32> to vector<1x8x8xf32>
    %88 = vector.extract_strided_slice %22 {offsets = [0, 0, 24], sizes = [1, 8, 8], strides = [1, 1, 1]} : vector<1x8x32xf32> to vector<1x8x8xf32>
    %cst_37 = arith.constant dense<0.000000e+00> : vector<1x8x8xf32>
    %89 = tpu.matmul %86, %87, %cst_37 {dimension_numbers = #tpu.dot_dimension_numbers<[2], [2], [1], [1], [0, 0, 0, 1, 1, 1], [0], [0]>} : vector<1x8x8xf32>, vector<1x8x8xf32>, vector<1x8x8xf32> -> vector<1x8x8xf32>
    %cst_38 = arith.constant 0.353553385 : f32
    %90 = vector.broadcast %cst_38 : f32 to vector<1x8x8xf32>
    %91 = arith.mulf %89, %90 : vector<1x8x8xf32>
    %cst_39 = arith.constant -1.000000e+09 : f32
    %92 = vector.shape_cast %2 : vector<1x1x8xi1> to vector<1x1x8xi1>
    %93 = vector.broadcast %92 : vector<1x1x8xi1> to vector<1x8x8xi1>
    %94 = vector.broadcast %cst_39 : f32 to vector<1x8x8xf32>
    %95 = arith.select %93, %91, %94 : vector<1x8x8xi1>, vector<1x8x8xf32>
    %cst_40 = arith.constant dense<0xFF800000> : vector<1x8xf32>
    %96 = vector.multi_reduction <maximumf>, %95, %cst_40 [2] : vector<1x8x8xf32> to vector<1x8xf32>
    %97 = vector.shape_cast %96 : vector<1x8xf32> to vector<1x8x1xf32>
    %98 = vector.broadcast %97 : vector<1x8x1xf32> to vector<1x8x8xf32>
    %99 = arith.subf %95, %98 : vector<1x8x8xf32>
    %100 = math.exp %99 : vector<1x8x8xf32>
    %cst_41 = arith.constant dense<0.000000e+00> : vector<1x8xf32>
    %101 = vector.multi_reduction <add>, %100, %cst_41 [2] : vector<1x8x8xf32> to vector<1x8xf32>
    %102 = vector.shape_cast %101 : vector<1x8xf32> to vector<1x8x1xf32>
    %103 = tpu.reciprocal %102 {approx = true} : vector<1x8x1xf32> -> vector<1x8x1xf32>
    %104 = vector.broadcast %103 : vector<1x8x1xf32> to vector<1x8x8xf32>
    %105 = arith.mulf %100, %104 : vector<1x8x8xf32>
    %cst_42 = arith.constant dense<0.000000e+00> : vector<1x8x8xf32>
    %106 = tpu.matmul %105, %88, %cst_42 {dimension_numbers = #tpu.dot_dimension_numbers<[2], [1], [1], [2], [0, 0, 0, 1, 1, 2], [0], [0]>} : vector<1x8x8xf32>, vector<1x8x8xf32>, vector<1x8x8xf32> -> vector<1x8x8xf32>
    %107 = tpu.concatenate %43, %64, %85, %106 in 2 : vector<1x8x8xf32>, vector<1x8x8xf32>, vector<1x8x8xf32>, vector<1x8x8xf32> -> vector<1x8x32xf32>
    %108 = vector.shape_cast %107 : vector<1x8x32xf32> to vector<8x32xf32>
    %c0_43 = arith.constant 0 : index
    %c0_44 = arith.constant 0 : index
    %c0_45 = arith.constant 0 : index
    %109 = vector.load %arg7[%c0_43, %c0_44, %c0_45] : memref<2x32x32xf32, #tpu.memory_space<vmem>>, vector<1x32x32xf32>
    %110 = vector.shape_cast %109 : vector<1x32x32xf32> to vector<32x32xf32>
    %c0_46 = arith.constant 0 : index
    %c0_47 = arith.constant 0 : index
    %c0_48 = arith.constant 0 : index
    %111 = vector.load %arg8[%c0_46, %c0_47, %c0_48] : memref<2x1x32xf32, #tpu.memory_space<vmem>>, vector<1x1x32xf32>
    %112 = vector.shape_cast %111 : vector<1x1x32xf32> to vector<1x32xf32>
    %cst_49 = arith.constant dense<0.000000e+00> : vector<8x32xf32>
    %113 = tpu.matmul %108, %110, %cst_49 {dimension_numbers = #tpu.dot_dimension_numbers<[1], [0], [0], [1], [0, 0, 1, 1], [], []>} : vector<8x32xf32>, vector<32x32xf32>, vector<8x32xf32> -> vector<8x32xf32>
    %114 = vector.broadcast %112 : vector<1x32xf32> to vector<8x32xf32>
    %115 = arith.addf %113, %114 : vector<8x32xf32>
    %116 = arith.addf %7, %115 : vector<8x32xf32>
    %117 = vector.extract_strided_slice %9 {offsets = [0, 0], sizes = [1, 32], strides = [1, 1]} : vector<4x32xf32> to vector<1x32xf32>
    %118 = vector.extract_strided_slice %9 {offsets = [1, 0], sizes = [1, 32], strides = [1, 1]} : vector<4x32xf32> to vector<1x32xf32>
    %cst_50 = arith.constant dense<0.000000e+00> : vector<8xf32>
    %119 = vector.multi_reduction <add>, %116, %cst_50 [1] : vector<8x32xf32> to vector<8xf32>
    %120 = vector.shape_cast %119 : vector<8xf32> to vector<8x1xf32>
    %cst_51 = arith.constant 3.200000e+01 : f32
    %121 = vector.broadcast %cst_51 : f32 to vector<8x1xf32>
    %122 = arith.divf %120, %121 : vector<8x1xf32>
    %123 = vector.broadcast %122 : vector<8x1xf32> to vector<8x32xf32>
    %124 = arith.subf %116, %123 : vector<8x32xf32>
    %125 = arith.mulf %124, %124 : vector<8x32xf32>
    %cst_52 = arith.constant dense<0.000000e+00> : vector<8xf32>
    %126 = vector.multi_reduction <add>, %125, %cst_52 [1] : vector<8x32xf32> to vector<8xf32>
    %127 = vector.shape_cast %126 : vector<8xf32> to vector<8x1xf32>
    %cst_53 = arith.constant 3.200000e+01 : f32
    %128 = vector.broadcast %cst_53 : f32 to vector<8x1xf32>
    %129 = arith.divf %127, %128 : vector<8x1xf32>
    %cst_54 = arith.constant 9.99999974E-6 : f32
    %130 = vector.broadcast %cst_54 : f32 to vector<8x1xf32>
    %131 = arith.addf %129, %130 : vector<8x1xf32>
    %132 = math.rsqrt %131 : vector<8x1xf32>
    %133 = vector.broadcast %132 : vector<8x1xf32> to vector<8x32xf32>
    %134 = arith.mulf %124, %133 : vector<8x32xf32>
    %135 = vector.broadcast %117 : vector<1x32xf32> to vector<8x32xf32>
    %136 = arith.mulf %134, %135 : vector<8x32xf32>
    %137 = vector.broadcast %118 : vector<1x32xf32> to vector<8x32xf32>
    %138 = arith.addf %136, %137 : vector<8x32xf32>
    %c0_55 = arith.constant 0 : index
    %c0_56 = arith.constant 0 : index
    %c0_57 = arith.constant 0 : index
    %139 = vector.load %arg9[%c0_55, %c0_56, %c0_57] : memref<2x32x64xf32, #tpu.memory_space<vmem>>, vector<1x32x64xf32>
    %140 = vector.shape_cast %139 : vector<1x32x64xf32> to vector<32x64xf32>
    %c0_58 = arith.constant 0 : index
    %c0_59 = arith.constant 0 : index
    %c0_60 = arith.constant 0 : index
    %141 = vector.load %arg10[%c0_58, %c0_59, %c0_60] : memref<2x1x64xf32, #tpu.memory_space<vmem>>, vector<1x1x64xf32>
    %142 = vector.shape_cast %141 : vector<1x1x64xf32> to vector<1x64xf32>
    %cst_61 = arith.constant dense<0.000000e+00> : vector<8x64xf32>
    %143 = tpu.matmul %138, %140, %cst_61 {dimension_numbers = #tpu.dot_dimension_numbers<[1], [0], [0], [1], [0, 0, 1, 1], [], []>} : vector<8x32xf32>, vector<32x64xf32>, vector<8x64xf32> -> vector<8x64xf32>
    %144 = vector.broadcast %142 : vector<1x64xf32> to vector<8x64xf32>
    %145 = arith.addf %143, %144 : vector<8x64xf32>
    %cst_62 = arith.constant 0.000000e+00 : f32
    %146 = vector.broadcast %cst_62 : f32 to vector<8x64xf32>
    %147 = arith.maximumf %145, %146 : vector<8x64xf32>
    %c0_63 = arith.constant 0 : index
    %c0_64 = arith.constant 0 : index
    %c0_65 = arith.constant 0 : index
    %148 = vector.load %arg11[%c0_63, %c0_64, %c0_65] : memref<2x64x32xf32, #tpu.memory_space<vmem>>, vector<1x64x32xf32>
    %149 = vector.shape_cast %148 : vector<1x64x32xf32> to vector<64x32xf32>
    %c0_66 = arith.constant 0 : index
    %c0_67 = arith.constant 0 : index
    %c0_68 = arith.constant 0 : index
    %150 = vector.load %arg12[%c0_66, %c0_67, %c0_68] : memref<2x1x32xf32, #tpu.memory_space<vmem>>, vector<1x1x32xf32>
    %151 = vector.shape_cast %150 : vector<1x1x32xf32> to vector<1x32xf32>
    %cst_69 = arith.constant dense<0.000000e+00> : vector<8x32xf32>
    %152 = tpu.matmul %147, %149, %cst_69 {dimension_numbers = #tpu.dot_dimension_numbers<[1], [0], [0], [1], [0, 0, 1, 1], [], []>} : vector<8x64xf32>, vector<64x32xf32>, vector<8x32xf32> -> vector<8x32xf32>
    %153 = vector.broadcast %151 : vector<1x32xf32> to vector<8x32xf32>
    %154 = arith.addf %152, %153 : vector<8x32xf32>
    %155 = arith.addf %138, %154 : vector<8x32xf32>
    %156 = vector.extract_strided_slice %9 {offsets = [2, 0], sizes = [1, 32], strides = [1, 1]} : vector<4x32xf32> to vector<1x32xf32>
    %157 = vector.extract_strided_slice %9 {offsets = [3, 0], sizes = [1, 32], strides = [1, 1]} : vector<4x32xf32> to vector<1x32xf32>
    %cst_70 = arith.constant dense<0.000000e+00> : vector<8xf32>
    %158 = vector.multi_reduction <add>, %155, %cst_70 [1] : vector<8x32xf32> to vector<8xf32>
    %159 = vector.shape_cast %158 : vector<8xf32> to vector<8x1xf32>
    %cst_71 = arith.constant 3.200000e+01 : f32
    %160 = vector.broadcast %cst_71 : f32 to vector<8x1xf32>
    %161 = arith.divf %159, %160 : vector<8x1xf32>
    %162 = vector.broadcast %161 : vector<8x1xf32> to vector<8x32xf32>
    %163 = arith.subf %155, %162 : vector<8x32xf32>
    %164 = arith.mulf %163, %163 : vector<8x32xf32>
    %cst_72 = arith.constant dense<0.000000e+00> : vector<8xf32>
    %165 = vector.multi_reduction <add>, %164, %cst_72 [1] : vector<8x32xf32> to vector<8xf32>
    %166 = vector.shape_cast %165 : vector<8xf32> to vector<8x1xf32>
    %cst_73 = arith.constant 3.200000e+01 : f32
    %167 = vector.broadcast %cst_73 : f32 to vector<8x1xf32>
    %168 = arith.divf %166, %167 : vector<8x1xf32>
    %cst_74 = arith.constant 9.99999974E-6 : f32
    %169 = vector.broadcast %cst_74 : f32 to vector<8x1xf32>
    %170 = arith.addf %168, %169 : vector<8x1xf32>
    %171 = math.rsqrt %170 : vector<8x1xf32>
    %172 = vector.broadcast %171 : vector<8x1xf32> to vector<8x32xf32>
    %173 = arith.mulf %163, %172 : vector<8x32xf32>
    %174 = vector.broadcast %156 : vector<1x32xf32> to vector<8x32xf32>
    %175 = arith.mulf %173, %174 : vector<8x32xf32>
    %176 = vector.broadcast %157 : vector<1x32xf32> to vector<8x32xf32>
    %177 = arith.addf %175, %176 : vector<8x32xf32>
    %178 = vector.shape_cast %177 : vector<8x32xf32> to vector<1x8x32xf32>
    %179 = vector.shape_cast %178 : vector<1x8x32xf32> to vector<8x32xf32>
    %c1 = arith.constant 1 : index
    %c0_75 = arith.constant 0 : index
    %c0_76 = arith.constant 0 : index
    %180 = vector.load %arg13[%c1, %c0_75, %c0_76] : memref<2x4x32xf32, #tpu.memory_space<vmem>>, vector<1x4x32xf32>
    %181 = vector.shape_cast %180 : vector<1x4x32xf32> to vector<4x32xf32>
    %c1_77 = arith.constant 1 : index
    %c0_78 = arith.constant 0 : index
    %c0_79 = arith.constant 0 : index
    %182 = vector.load %arg5[%c1_77, %c0_78, %c0_79] : memref<2x32x96xf32, #tpu.memory_space<vmem>>, vector<1x32x96xf32>
    %183 = vector.shape_cast %182 : vector<1x32x96xf32> to vector<32x96xf32>
    %c1_80 = arith.constant 1 : index
    %c0_81 = arith.constant 0 : index
    %c0_82 = arith.constant 0 : index
    %184 = vector.load %arg6[%c1_80, %c0_81, %c0_82] : memref<2x1x96xf32, #tpu.memory_space<vmem>>, vector<1x1x96xf32>
    %185 = vector.shape_cast %184 : vector<1x1x96xf32> to vector<1x96xf32>
    %cst_83 = arith.constant dense<0.000000e+00> : vector<8x96xf32>
    %186 = tpu.matmul %179, %183, %cst_83 {dimension_numbers = #tpu.dot_dimension_numbers<[1], [0], [0], [1], [0, 0, 1, 1], [], []>} : vector<8x32xf32>, vector<32x96xf32>, vector<8x96xf32> -> vector<8x96xf32>
    %187 = vector.broadcast %185 : vector<1x96xf32> to vector<8x96xf32>
    %188 = arith.addf %186, %187 : vector<8x96xf32>
    %189 = vector.extract_strided_slice %188 {offsets = [0, 0], sizes = [8, 32], strides = [1, 1]} : vector<8x96xf32> to vector<8x32xf32>
    %190 = vector.shape_cast %189 : vector<8x32xf32> to vector<1x8x32xf32>
    %191 = vector.extract_strided_slice %188 {offsets = [0, 32], sizes = [8, 32], strides = [1, 1]} : vector<8x96xf32> to vector<8x32xf32>
    %192 = vector.shape_cast %191 : vector<8x32xf32> to vector<1x8x32xf32>
    %193 = vector.extract_strided_slice %188 {offsets = [0, 64], sizes = [8, 32], strides = [1, 1]} : vector<8x96xf32> to vector<8x32xf32>
    %194 = vector.shape_cast %193 : vector<8x32xf32> to vector<1x8x32xf32>
    %195 = vector.extract_strided_slice %190 {offsets = [0, 0, 0], sizes = [1, 8, 8], strides = [1, 1, 1]} : vector<1x8x32xf32> to vector<1x8x8xf32>
    %196 = vector.extract_strided_slice %192 {offsets = [0, 0, 0], sizes = [1, 8, 8], strides = [1, 1, 1]} : vector<1x8x32xf32> to vector<1x8x8xf32>
    %197 = vector.extract_strided_slice %194 {offsets = [0, 0, 0], sizes = [1, 8, 8], strides = [1, 1, 1]} : vector<1x8x32xf32> to vector<1x8x8xf32>
    %cst_84 = arith.constant dense<0.000000e+00> : vector<1x8x8xf32>
    %198 = tpu.matmul %195, %196, %cst_84 {dimension_numbers = #tpu.dot_dimension_numbers<[2], [2], [1], [1], [0, 0, 0, 1, 1, 1], [0], [0]>} : vector<1x8x8xf32>, vector<1x8x8xf32>, vector<1x8x8xf32> -> vector<1x8x8xf32>
    %cst_85 = arith.constant 0.353553385 : f32
    %199 = vector.broadcast %cst_85 : f32 to vector<1x8x8xf32>
    %200 = arith.mulf %198, %199 : vector<1x8x8xf32>
    %cst_86 = arith.constant -1.000000e+09 : f32
    %201 = vector.shape_cast %2 : vector<1x1x8xi1> to vector<1x1x8xi1>
    %202 = vector.broadcast %201 : vector<1x1x8xi1> to vector<1x8x8xi1>
    %203 = vector.broadcast %cst_86 : f32 to vector<1x8x8xf32>
    %204 = arith.select %202, %200, %203 : vector<1x8x8xi1>, vector<1x8x8xf32>
    %cst_87 = arith.constant dense<0xFF800000> : vector<1x8xf32>
    %205 = vector.multi_reduction <maximumf>, %204, %cst_87 [2] : vector<1x8x8xf32> to vector<1x8xf32>
    %206 = vector.shape_cast %205 : vector<1x8xf32> to vector<1x8x1xf32>
    %207 = vector.broadcast %206 : vector<1x8x1xf32> to vector<1x8x8xf32>
    %208 = arith.subf %204, %207 : vector<1x8x8xf32>
    %209 = math.exp %208 : vector<1x8x8xf32>
    %cst_88 = arith.constant dense<0.000000e+00> : vector<1x8xf32>
    %210 = vector.multi_reduction <add>, %209, %cst_88 [2] : vector<1x8x8xf32> to vector<1x8xf32>
    %211 = vector.shape_cast %210 : vector<1x8xf32> to vector<1x8x1xf32>
    %212 = tpu.reciprocal %211 {approx = true} : vector<1x8x1xf32> -> vector<1x8x1xf32>
    %213 = vector.broadcast %212 : vector<1x8x1xf32> to vector<1x8x8xf32>
    %214 = arith.mulf %209, %213 : vector<1x8x8xf32>
    %cst_89 = arith.constant dense<0.000000e+00> : vector<1x8x8xf32>
    %215 = tpu.matmul %214, %197, %cst_89 {dimension_numbers = #tpu.dot_dimension_numbers<[2], [1], [1], [2], [0, 0, 0, 1, 1, 2], [0], [0]>} : vector<1x8x8xf32>, vector<1x8x8xf32>, vector<1x8x8xf32> -> vector<1x8x8xf32>
    %216 = vector.extract_strided_slice %190 {offsets = [0, 0, 8], sizes = [1, 8, 8], strides = [1, 1, 1]} : vector<1x8x32xf32> to vector<1x8x8xf32>
    %217 = vector.extract_strided_slice %192 {offsets = [0, 0, 8], sizes = [1, 8, 8], strides = [1, 1, 1]} : vector<1x8x32xf32> to vector<1x8x8xf32>
    %218 = vector.extract_strided_slice %194 {offsets = [0, 0, 8], sizes = [1, 8, 8], strides = [1, 1, 1]} : vector<1x8x32xf32> to vector<1x8x8xf32>
    %cst_90 = arith.constant dense<0.000000e+00> : vector<1x8x8xf32>
    %219 = tpu.matmul %216, %217, %cst_90 {dimension_numbers = #tpu.dot_dimension_numbers<[2], [2], [1], [1], [0, 0, 0, 1, 1, 1], [0], [0]>} : vector<1x8x8xf32>, vector<1x8x8xf32>, vector<1x8x8xf32> -> vector<1x8x8xf32>
    %cst_91 = arith.constant 0.353553385 : f32
    %220 = vector.broadcast %cst_91 : f32 to vector<1x8x8xf32>
    %221 = arith.mulf %219, %220 : vector<1x8x8xf32>
    %cst_92 = arith.constant -1.000000e+09 : f32
    %222 = vector.shape_cast %2 : vector<1x1x8xi1> to vector<1x1x8xi1>
    %223 = vector.broadcast %222 : vector<1x1x8xi1> to vector<1x8x8xi1>
    %224 = vector.broadcast %cst_92 : f32 to vector<1x8x8xf32>
    %225 = arith.select %223, %221, %224 : vector<1x8x8xi1>, vector<1x8x8xf32>
    %cst_93 = arith.constant dense<0xFF800000> : vector<1x8xf32>
    %226 = vector.multi_reduction <maximumf>, %225, %cst_93 [2] : vector<1x8x8xf32> to vector<1x8xf32>
    %227 = vector.shape_cast %226 : vector<1x8xf32> to vector<1x8x1xf32>
    %228 = vector.broadcast %227 : vector<1x8x1xf32> to vector<1x8x8xf32>
    %229 = arith.subf %225, %228 : vector<1x8x8xf32>
    %230 = math.exp %229 : vector<1x8x8xf32>
    %cst_94 = arith.constant dense<0.000000e+00> : vector<1x8xf32>
    %231 = vector.multi_reduction <add>, %230, %cst_94 [2] : vector<1x8x8xf32> to vector<1x8xf32>
    %232 = vector.shape_cast %231 : vector<1x8xf32> to vector<1x8x1xf32>
    %233 = tpu.reciprocal %232 {approx = true} : vector<1x8x1xf32> -> vector<1x8x1xf32>
    %234 = vector.broadcast %233 : vector<1x8x1xf32> to vector<1x8x8xf32>
    %235 = arith.mulf %230, %234 : vector<1x8x8xf32>
    %cst_95 = arith.constant dense<0.000000e+00> : vector<1x8x8xf32>
    %236 = tpu.matmul %235, %218, %cst_95 {dimension_numbers = #tpu.dot_dimension_numbers<[2], [1], [1], [2], [0, 0, 0, 1, 1, 2], [0], [0]>} : vector<1x8x8xf32>, vector<1x8x8xf32>, vector<1x8x8xf32> -> vector<1x8x8xf32>
    %237 = vector.extract_strided_slice %190 {offsets = [0, 0, 16], sizes = [1, 8, 8], strides = [1, 1, 1]} : vector<1x8x32xf32> to vector<1x8x8xf32>
    %238 = vector.extract_strided_slice %192 {offsets = [0, 0, 16], sizes = [1, 8, 8], strides = [1, 1, 1]} : vector<1x8x32xf32> to vector<1x8x8xf32>
    %239 = vector.extract_strided_slice %194 {offsets = [0, 0, 16], sizes = [1, 8, 8], strides = [1, 1, 1]} : vector<1x8x32xf32> to vector<1x8x8xf32>
    %cst_96 = arith.constant dense<0.000000e+00> : vector<1x8x8xf32>
    %240 = tpu.matmul %237, %238, %cst_96 {dimension_numbers = #tpu.dot_dimension_numbers<[2], [2], [1], [1], [0, 0, 0, 1, 1, 1], [0], [0]>} : vector<1x8x8xf32>, vector<1x8x8xf32>, vector<1x8x8xf32> -> vector<1x8x8xf32>
    %cst_97 = arith.constant 0.353553385 : f32
    %241 = vector.broadcast %cst_97 : f32 to vector<1x8x8xf32>
    %242 = arith.mulf %240, %241 : vector<1x8x8xf32>
    %cst_98 = arith.constant -1.000000e+09 : f32
    %243 = vector.shape_cast %2 : vector<1x1x8xi1> to vector<1x1x8xi1>
    %244 = vector.broadcast %243 : vector<1x1x8xi1> to vector<1x8x8xi1>
    %245 = vector.broadcast %cst_98 : f32 to vector<1x8x8xf32>
    %246 = arith.select %244, %242, %245 : vector<1x8x8xi1>, vector<1x8x8xf32>
    %cst_99 = arith.constant dense<0xFF800000> : vector<1x8xf32>
    %247 = vector.multi_reduction <maximumf>, %246, %cst_99 [2] : vector<1x8x8xf32> to vector<1x8xf32>
    %248 = vector.shape_cast %247 : vector<1x8xf32> to vector<1x8x1xf32>
    %249 = vector.broadcast %248 : vector<1x8x1xf32> to vector<1x8x8xf32>
    %250 = arith.subf %246, %249 : vector<1x8x8xf32>
    %251 = math.exp %250 : vector<1x8x8xf32>
    %cst_100 = arith.constant dense<0.000000e+00> : vector<1x8xf32>
    %252 = vector.multi_reduction <add>, %251, %cst_100 [2] : vector<1x8x8xf32> to vector<1x8xf32>
    %253 = vector.shape_cast %252 : vector<1x8xf32> to vector<1x8x1xf32>
    %254 = tpu.reciprocal %253 {approx = true} : vector<1x8x1xf32> -> vector<1x8x1xf32>
    %255 = vector.broadcast %254 : vector<1x8x1xf32> to vector<1x8x8xf32>
    %256 = arith.mulf %251, %255 : vector<1x8x8xf32>
    %cst_101 = arith.constant dense<0.000000e+00> : vector<1x8x8xf32>
    %257 = tpu.matmul %256, %239, %cst_101 {dimension_numbers = #tpu.dot_dimension_numbers<[2], [1], [1], [2], [0, 0, 0, 1, 1, 2], [0], [0]>} : vector<1x8x8xf32>, vector<1x8x8xf32>, vector<1x8x8xf32> -> vector<1x8x8xf32>
    %258 = vector.extract_strided_slice %190 {offsets = [0, 0, 24], sizes = [1, 8, 8], strides = [1, 1, 1]} : vector<1x8x32xf32> to vector<1x8x8xf32>
    %259 = vector.extract_strided_slice %192 {offsets = [0, 0, 24], sizes = [1, 8, 8], strides = [1, 1, 1]} : vector<1x8x32xf32> to vector<1x8x8xf32>
    %260 = vector.extract_strided_slice %194 {offsets = [0, 0, 24], sizes = [1, 8, 8], strides = [1, 1, 1]} : vector<1x8x32xf32> to vector<1x8x8xf32>
    %cst_102 = arith.constant dense<0.000000e+00> : vector<1x8x8xf32>
    %261 = tpu.matmul %258, %259, %cst_102 {dimension_numbers = #tpu.dot_dimension_numbers<[2], [2], [1], [1], [0, 0, 0, 1, 1, 1], [0], [0]>} : vector<1x8x8xf32>, vector<1x8x8xf32>, vector<1x8x8xf32> -> vector<1x8x8xf32>
    %cst_103 = arith.constant 0.353553385 : f32
    %262 = vector.broadcast %cst_103 : f32 to vector<1x8x8xf32>
    %263 = arith.mulf %261, %262 : vector<1x8x8xf32>
    %cst_104 = arith.constant -1.000000e+09 : f32
    %264 = vector.shape_cast %2 : vector<1x1x8xi1> to vector<1x1x8xi1>
    %265 = vector.broadcast %264 : vector<1x1x8xi1> to vector<1x8x8xi1>
    %266 = vector.broadcast %cst_104 : f32 to vector<1x8x8xf32>
    %267 = arith.select %265, %263, %266 : vector<1x8x8xi1>, vector<1x8x8xf32>
    %cst_105 = arith.constant dense<0xFF800000> : vector<1x8xf32>
    %268 = vector.multi_reduction <maximumf>, %267, %cst_105 [2] : vector<1x8x8xf32> to vector<1x8xf32>
    %269 = vector.shape_cast %268 : vector<1x8xf32> to vector<1x8x1xf32>
    %270 = vector.broadcast %269 : vector<1x8x1xf32> to vector<1x8x8xf32>
    %271 = arith.subf %267, %270 : vector<1x8x8xf32>
    %272 = math.exp %271 : vector<1x8x8xf32>
    %cst_106 = arith.constant dense<0.000000e+00> : vector<1x8xf32>
    %273 = vector.multi_reduction <add>, %272, %cst_106 [2] : vector<1x8x8xf32> to vector<1x8xf32>
    %274 = vector.shape_cast %273 : vector<1x8xf32> to vector<1x8x1xf32>
    %275 = tpu.reciprocal %274 {approx = true} : vector<1x8x1xf32> -> vector<1x8x1xf32>
    %276 = vector.broadcast %275 : vector<1x8x1xf32> to vector<1x8x8xf32>
    %277 = arith.mulf %272, %276 : vector<1x8x8xf32>
    %cst_107 = arith.constant dense<0.000000e+00> : vector<1x8x8xf32>
    %278 = tpu.matmul %277, %260, %cst_107 {dimension_numbers = #tpu.dot_dimension_numbers<[2], [1], [1], [2], [0, 0, 0, 1, 1, 2], [0], [0]>} : vector<1x8x8xf32>, vector<1x8x8xf32>, vector<1x8x8xf32> -> vector<1x8x8xf32>
    %279 = tpu.concatenate %215, %236, %257, %278 in 2 : vector<1x8x8xf32>, vector<1x8x8xf32>, vector<1x8x8xf32>, vector<1x8x8xf32> -> vector<1x8x32xf32>
    %280 = vector.shape_cast %279 : vector<1x8x32xf32> to vector<8x32xf32>
    %c1_108 = arith.constant 1 : index
    %c0_109 = arith.constant 0 : index
    %c0_110 = arith.constant 0 : index
    %281 = vector.load %arg7[%c1_108, %c0_109, %c0_110] : memref<2x32x32xf32, #tpu.memory_space<vmem>>, vector<1x32x32xf32>
    %282 = vector.shape_cast %281 : vector<1x32x32xf32> to vector<32x32xf32>
    %c1_111 = arith.constant 1 : index
    %c0_112 = arith.constant 0 : index
    %c0_113 = arith.constant 0 : index
    %283 = vector.load %arg8[%c1_111, %c0_112, %c0_113] : memref<2x1x32xf32, #tpu.memory_space<vmem>>, vector<1x1x32xf32>
    %284 = vector.shape_cast %283 : vector<1x1x32xf32> to vector<1x32xf32>
    %cst_114 = arith.constant dense<0.000000e+00> : vector<8x32xf32>
    %285 = tpu.matmul %280, %282, %cst_114 {dimension_numbers = #tpu.dot_dimension_numbers<[1], [0], [0], [1], [0, 0, 1, 1], [], []>} : vector<8x32xf32>, vector<32x32xf32>, vector<8x32xf32> -> vector<8x32xf32>
    %286 = vector.broadcast %284 : vector<1x32xf32> to vector<8x32xf32>
    %287 = arith.addf %285, %286 : vector<8x32xf32>
    %288 = arith.addf %179, %287 : vector<8x32xf32>
    %289 = vector.extract_strided_slice %181 {offsets = [0, 0], sizes = [1, 32], strides = [1, 1]} : vector<4x32xf32> to vector<1x32xf32>
    %290 = vector.extract_strided_slice %181 {offsets = [1, 0], sizes = [1, 32], strides = [1, 1]} : vector<4x32xf32> to vector<1x32xf32>
    %cst_115 = arith.constant dense<0.000000e+00> : vector<8xf32>
    %291 = vector.multi_reduction <add>, %288, %cst_115 [1] : vector<8x32xf32> to vector<8xf32>
    %292 = vector.shape_cast %291 : vector<8xf32> to vector<8x1xf32>
    %cst_116 = arith.constant 3.200000e+01 : f32
    %293 = vector.broadcast %cst_116 : f32 to vector<8x1xf32>
    %294 = arith.divf %292, %293 : vector<8x1xf32>
    %295 = vector.broadcast %294 : vector<8x1xf32> to vector<8x32xf32>
    %296 = arith.subf %288, %295 : vector<8x32xf32>
    %297 = arith.mulf %296, %296 : vector<8x32xf32>
    %cst_117 = arith.constant dense<0.000000e+00> : vector<8xf32>
    %298 = vector.multi_reduction <add>, %297, %cst_117 [1] : vector<8x32xf32> to vector<8xf32>
    %299 = vector.shape_cast %298 : vector<8xf32> to vector<8x1xf32>
    %cst_118 = arith.constant 3.200000e+01 : f32
    %300 = vector.broadcast %cst_118 : f32 to vector<8x1xf32>
    %301 = arith.divf %299, %300 : vector<8x1xf32>
    %cst_119 = arith.constant 9.99999974E-6 : f32
    %302 = vector.broadcast %cst_119 : f32 to vector<8x1xf32>
    %303 = arith.addf %301, %302 : vector<8x1xf32>
    %304 = math.rsqrt %303 : vector<8x1xf32>
    %305 = vector.broadcast %304 : vector<8x1xf32> to vector<8x32xf32>
    %306 = arith.mulf %296, %305 : vector<8x32xf32>
    %307 = vector.broadcast %289 : vector<1x32xf32> to vector<8x32xf32>
    %308 = arith.mulf %306, %307 : vector<8x32xf32>
    %309 = vector.broadcast %290 : vector<1x32xf32> to vector<8x32xf32>
    %310 = arith.addf %308, %309 : vector<8x32xf32>
    %c1_120 = arith.constant 1 : index
    %c0_121 = arith.constant 0 : index
    %c0_122 = arith.constant 0 : index
    %311 = vector.load %arg9[%c1_120, %c0_121, %c0_122] : memref<2x32x64xf32, #tpu.memory_space<vmem>>, vector<1x32x64xf32>
    %312 = vector.shape_cast %311 : vector<1x32x64xf32> to vector<32x64xf32>
    %c1_123 = arith.constant 1 : index
    %c0_124 = arith.constant 0 : index
    %c0_125 = arith.constant 0 : index
    %313 = vector.load %arg10[%c1_123, %c0_124, %c0_125] : memref<2x1x64xf32, #tpu.memory_space<vmem>>, vector<1x1x64xf32>
    %314 = vector.shape_cast %313 : vector<1x1x64xf32> to vector<1x64xf32>
    %cst_126 = arith.constant dense<0.000000e+00> : vector<8x64xf32>
    %315 = tpu.matmul %310, %312, %cst_126 {dimension_numbers = #tpu.dot_dimension_numbers<[1], [0], [0], [1], [0, 0, 1, 1], [], []>} : vector<8x32xf32>, vector<32x64xf32>, vector<8x64xf32> -> vector<8x64xf32>
    %316 = vector.broadcast %314 : vector<1x64xf32> to vector<8x64xf32>
    %317 = arith.addf %315, %316 : vector<8x64xf32>
    %cst_127 = arith.constant 0.000000e+00 : f32
    %318 = vector.broadcast %cst_127 : f32 to vector<8x64xf32>
    %319 = arith.maximumf %317, %318 : vector<8x64xf32>
    %c1_128 = arith.constant 1 : index
    %c0_129 = arith.constant 0 : index
    %c0_130 = arith.constant 0 : index
    %320 = vector.load %arg11[%c1_128, %c0_129, %c0_130] : memref<2x64x32xf32, #tpu.memory_space<vmem>>, vector<1x64x32xf32>
    %321 = vector.shape_cast %320 : vector<1x64x32xf32> to vector<64x32xf32>
    %c1_131 = arith.constant 1 : index
    %c0_132 = arith.constant 0 : index
    %c0_133 = arith.constant 0 : index
    %322 = vector.load %arg12[%c1_131, %c0_132, %c0_133] : memref<2x1x32xf32, #tpu.memory_space<vmem>>, vector<1x1x32xf32>
    %323 = vector.shape_cast %322 : vector<1x1x32xf32> to vector<1x32xf32>
    %cst_134 = arith.constant dense<0.000000e+00> : vector<8x32xf32>
    %324 = tpu.matmul %319, %321, %cst_134 {dimension_numbers = #tpu.dot_dimension_numbers<[1], [0], [0], [1], [0, 0, 1, 1], [], []>} : vector<8x64xf32>, vector<64x32xf32>, vector<8x32xf32> -> vector<8x32xf32>
    %325 = vector.broadcast %323 : vector<1x32xf32> to vector<8x32xf32>
    %326 = arith.addf %324, %325 : vector<8x32xf32>
    %327 = arith.addf %310, %326 : vector<8x32xf32>
    %328 = vector.extract_strided_slice %181 {offsets = [2, 0], sizes = [1, 32], strides = [1, 1]} : vector<4x32xf32> to vector<1x32xf32>
    %329 = vector.extract_strided_slice %181 {offsets = [3, 0], sizes = [1, 32], strides = [1, 1]} : vector<4x32xf32> to vector<1x32xf32>
    %cst_135 = arith.constant dense<0.000000e+00> : vector<8xf32>
    %330 = vector.multi_reduction <add>, %327, %cst_135 [1] : vector<8x32xf32> to vector<8xf32>
    %331 = vector.shape_cast %330 : vector<8xf32> to vector<8x1xf32>
    %cst_136 = arith.constant 3.200000e+01 : f32
    %332 = vector.broadcast %cst_136 : f32 to vector<8x1xf32>
    %333 = arith.divf %331, %332 : vector<8x1xf32>
    %334 = vector.broadcast %333 : vector<8x1xf32> to vector<8x32xf32>
    %335 = arith.subf %327, %334 : vector<8x32xf32>
    %336 = arith.mulf %335, %335 : vector<8x32xf32>
    %cst_137 = arith.constant dense<0.000000e+00> : vector<8xf32>
    %337 = vector.multi_reduction <add>, %336, %cst_137 [1] : vector<8x32xf32> to vector<8xf32>
    %338 = vector.shape_cast %337 : vector<8xf32> to vector<8x1xf32>
    %cst_138 = arith.constant 3.200000e+01 : f32
    %339 = vector.broadcast %cst_138 : f32 to vector<8x1xf32>
    %340 = arith.divf %338, %339 : vector<8x1xf32>
    %cst_139 = arith.constant 9.99999974E-6 : f32
    %341 = vector.broadcast %cst_139 : f32 to vector<8x1xf32>
    %342 = arith.addf %340, %341 : vector<8x1xf32>
    %343 = math.rsqrt %342 : vector<8x1xf32>
    %344 = vector.broadcast %343 : vector<8x1xf32> to vector<8x32xf32>
    %345 = arith.mulf %335, %344 : vector<8x32xf32>
    %346 = vector.broadcast %328 : vector<1x32xf32> to vector<8x32xf32>
    %347 = arith.mulf %345, %346 : vector<8x32xf32>
    %348 = vector.broadcast %329 : vector<1x32xf32> to vector<8x32xf32>
    %349 = arith.addf %347, %348 : vector<8x32xf32>
    %350 = vector.shape_cast %349 : vector<8x32xf32> to vector<1x8x32xf32>
    %c0_140 = arith.constant 0 : index
    %c0_141 = arith.constant 0 : index
    %c0_142 = arith.constant 0 : index
    %351 = vector.load %arg2[%c0_140, %c0_141, %c0_142] : memref<1x8x32xf32, #tpu.memory_space<vmem>>, vector<1x8x32xf32>
    %352 = vector.shape_cast %351 : vector<1x8x32xf32> to vector<8x32xf32>
    %c0_143 = arith.constant 0 : index
    %c0_144 = arith.constant 0 : index
    %c0_145 = arith.constant 0 : index
    %353 = vector.load %arg28[%c0_143, %c0_144, %c0_145] : memref<2x6x32xf32, #tpu.memory_space<vmem>>, vector<1x6x32xf32>
    %354 = vector.shape_cast %353 : vector<1x6x32xf32> to vector<6x32xf32>
    %c0_146 = arith.constant 0 : index
    %c0_147 = arith.constant 0 : index
    %c0_148 = arith.constant 0 : index
    %355 = vector.load %arg14[%c0_146, %c0_147, %c0_148] : memref<2x32x96xf32, #tpu.memory_space<vmem>>, vector<1x32x96xf32>
    %356 = vector.shape_cast %355 : vector<1x32x96xf32> to vector<32x96xf32>
    %c0_149 = arith.constant 0 : index
    %c0_150 = arith.constant 0 : index
    %c0_151 = arith.constant 0 : index
    %357 = vector.load %arg15[%c0_149, %c0_150, %c0_151] : memref<2x1x96xf32, #tpu.memory_space<vmem>>, vector<1x1x96xf32>
    %358 = vector.shape_cast %357 : vector<1x1x96xf32> to vector<1x96xf32>
    %cst_152 = arith.constant dense<0.000000e+00> : vector<8x96xf32>
    %359 = tpu.matmul %352, %356, %cst_152 {dimension_numbers = #tpu.dot_dimension_numbers<[1], [0], [0], [1], [0, 0, 1, 1], [], []>} : vector<8x32xf32>, vector<32x96xf32>, vector<8x96xf32> -> vector<8x96xf32>
    %360 = vector.broadcast %358 : vector<1x96xf32> to vector<8x96xf32>
    %361 = arith.addf %359, %360 : vector<8x96xf32>
    %362 = vector.extract_strided_slice %361 {offsets = [0, 0], sizes = [8, 32], strides = [1, 1]} : vector<8x96xf32> to vector<8x32xf32>
    %363 = vector.shape_cast %362 : vector<8x32xf32> to vector<1x8x32xf32>
    %364 = vector.extract_strided_slice %361 {offsets = [0, 32], sizes = [8, 32], strides = [1, 1]} : vector<8x96xf32> to vector<8x32xf32>
    %365 = vector.shape_cast %364 : vector<8x32xf32> to vector<1x8x32xf32>
    %366 = vector.extract_strided_slice %361 {offsets = [0, 64], sizes = [8, 32], strides = [1, 1]} : vector<8x96xf32> to vector<8x32xf32>
    %367 = vector.shape_cast %366 : vector<8x32xf32> to vector<1x8x32xf32>
    %368 = tpu.iota {dimensions = array<i32: 0>} : vector<8x8xi32>
    %369 = tpu.iota {dimensions = array<i32: 1>} : vector<8x8xi32>
    %370 = arith.cmpi sle, %369, %368 : vector<8x8xi32>
    %371 = vector.shape_cast %370 : vector<8x8xi1> to vector<1x8x8xi1>
    %372 = vector.extract_strided_slice %363 {offsets = [0, 0, 0], sizes = [1, 8, 8], strides = [1, 1, 1]} : vector<1x8x32xf32> to vector<1x8x8xf32>
    %373 = vector.extract_strided_slice %365 {offsets = [0, 0, 0], sizes = [1, 8, 8], strides = [1, 1, 1]} : vector<1x8x32xf32> to vector<1x8x8xf32>
    %374 = vector.extract_strided_slice %367 {offsets = [0, 0, 0], sizes = [1, 8, 8], strides = [1, 1, 1]} : vector<1x8x32xf32> to vector<1x8x8xf32>
    %cst_153 = arith.constant dense<0.000000e+00> : vector<1x8x8xf32>
    %375 = tpu.matmul %372, %373, %cst_153 {dimension_numbers = #tpu.dot_dimension_numbers<[2], [2], [1], [1], [0, 0, 0, 1, 1, 1], [0], [0]>} : vector<1x8x8xf32>, vector<1x8x8xf32>, vector<1x8x8xf32> -> vector<1x8x8xf32>
    %cst_154 = arith.constant 0.353553385 : f32
    %376 = vector.broadcast %cst_154 : f32 to vector<1x8x8xf32>
    %377 = arith.mulf %375, %376 : vector<1x8x8xf32>
    %378 = vector.broadcast %5 : vector<1x1x8xi1> to vector<1x8x8xi1>
    %379 = arith.andi %378, %371 : vector<1x8x8xi1>
    %cst_155 = arith.constant -1.000000e+09 : f32
    %380 = vector.broadcast %cst_155 : f32 to vector<1x8x8xf32>
    %381 = arith.select %379, %377, %380 : vector<1x8x8xi1>, vector<1x8x8xf32>
    %cst_156 = arith.constant dense<0xFF800000> : vector<1x8xf32>
    %382 = vector.multi_reduction <maximumf>, %381, %cst_156 [2] : vector<1x8x8xf32> to vector<1x8xf32>
    %383 = vector.shape_cast %382 : vector<1x8xf32> to vector<1x8x1xf32>
    %384 = vector.broadcast %383 : vector<1x8x1xf32> to vector<1x8x8xf32>
    %385 = arith.subf %381, %384 : vector<1x8x8xf32>
    %386 = math.exp %385 : vector<1x8x8xf32>
    %cst_157 = arith.constant dense<0.000000e+00> : vector<1x8xf32>
    %387 = vector.multi_reduction <add>, %386, %cst_157 [2] : vector<1x8x8xf32> to vector<1x8xf32>
    %388 = vector.shape_cast %387 : vector<1x8xf32> to vector<1x8x1xf32>
    %389 = tpu.reciprocal %388 {approx = true} : vector<1x8x1xf32> -> vector<1x8x1xf32>
    %390 = vector.broadcast %389 : vector<1x8x1xf32> to vector<1x8x8xf32>
    %391 = arith.mulf %386, %390 : vector<1x8x8xf32>
    %cst_158 = arith.constant dense<0.000000e+00> : vector<1x8x8xf32>
    %392 = tpu.matmul %391, %374, %cst_158 {dimension_numbers = #tpu.dot_dimension_numbers<[2], [1], [1], [2], [0, 0, 0, 1, 1, 2], [0], [0]>} : vector<1x8x8xf32>, vector<1x8x8xf32>, vector<1x8x8xf32> -> vector<1x8x8xf32>
    %393 = vector.extract_strided_slice %363 {offsets = [0, 0, 8], sizes = [1, 8, 8], strides = [1, 1, 1]} : vector<1x8x32xf32> to vector<1x8x8xf32>
    %394 = vector.extract_strided_slice %365 {offsets = [0, 0, 8], sizes = [1, 8, 8], strides = [1, 1, 1]} : vector<1x8x32xf32> to vector<1x8x8xf32>
    %395 = vector.extract_strided_slice %367 {offsets = [0, 0, 8], sizes = [1, 8, 8], strides = [1, 1, 1]} : vector<1x8x32xf32> to vector<1x8x8xf32>
    %cst_159 = arith.constant dense<0.000000e+00> : vector<1x8x8xf32>
    %396 = tpu.matmul %393, %394, %cst_159 {dimension_numbers = #tpu.dot_dimension_numbers<[2], [2], [1], [1], [0, 0, 0, 1, 1, 1], [0], [0]>} : vector<1x8x8xf32>, vector<1x8x8xf32>, vector<1x8x8xf32> -> vector<1x8x8xf32>
    %cst_160 = arith.constant 0.353553385 : f32
    %397 = vector.broadcast %cst_160 : f32 to vector<1x8x8xf32>
    %398 = arith.mulf %396, %397 : vector<1x8x8xf32>
    %399 = vector.broadcast %5 : vector<1x1x8xi1> to vector<1x8x8xi1>
    %400 = arith.andi %399, %371 : vector<1x8x8xi1>
    %cst_161 = arith.constant -1.000000e+09 : f32
    %401 = vector.broadcast %cst_161 : f32 to vector<1x8x8xf32>
    %402 = arith.select %400, %398, %401 : vector<1x8x8xi1>, vector<1x8x8xf32>
    %cst_162 = arith.constant dense<0xFF800000> : vector<1x8xf32>
    %403 = vector.multi_reduction <maximumf>, %402, %cst_162 [2] : vector<1x8x8xf32> to vector<1x8xf32>
    %404 = vector.shape_cast %403 : vector<1x8xf32> to vector<1x8x1xf32>
    %405 = vector.broadcast %404 : vector<1x8x1xf32> to vector<1x8x8xf32>
    %406 = arith.subf %402, %405 : vector<1x8x8xf32>
    %407 = math.exp %406 : vector<1x8x8xf32>
    %cst_163 = arith.constant dense<0.000000e+00> : vector<1x8xf32>
    %408 = vector.multi_reduction <add>, %407, %cst_163 [2] : vector<1x8x8xf32> to vector<1x8xf32>
    %409 = vector.shape_cast %408 : vector<1x8xf32> to vector<1x8x1xf32>
    %410 = tpu.reciprocal %409 {approx = true} : vector<1x8x1xf32> -> vector<1x8x1xf32>
    %411 = vector.broadcast %410 : vector<1x8x1xf32> to vector<1x8x8xf32>
    %412 = arith.mulf %407, %411 : vector<1x8x8xf32>
    %cst_164 = arith.constant dense<0.000000e+00> : vector<1x8x8xf32>
    %413 = tpu.matmul %412, %395, %cst_164 {dimension_numbers = #tpu.dot_dimension_numbers<[2], [1], [1], [2], [0, 0, 0, 1, 1, 2], [0], [0]>} : vector<1x8x8xf32>, vector<1x8x8xf32>, vector<1x8x8xf32> -> vector<1x8x8xf32>
    %414 = vector.extract_strided_slice %363 {offsets = [0, 0, 16], sizes = [1, 8, 8], strides = [1, 1, 1]} : vector<1x8x32xf32> to vector<1x8x8xf32>
    %415 = vector.extract_strided_slice %365 {offsets = [0, 0, 16], sizes = [1, 8, 8], strides = [1, 1, 1]} : vector<1x8x32xf32> to vector<1x8x8xf32>
    %416 = vector.extract_strided_slice %367 {offsets = [0, 0, 16], sizes = [1, 8, 8], strides = [1, 1, 1]} : vector<1x8x32xf32> to vector<1x8x8xf32>
    %cst_165 = arith.constant dense<0.000000e+00> : vector<1x8x8xf32>
    %417 = tpu.matmul %414, %415, %cst_165 {dimension_numbers = #tpu.dot_dimension_numbers<[2], [2], [1], [1], [0, 0, 0, 1, 1, 1], [0], [0]>} : vector<1x8x8xf32>, vector<1x8x8xf32>, vector<1x8x8xf32> -> vector<1x8x8xf32>
    %cst_166 = arith.constant 0.353553385 : f32
    %418 = vector.broadcast %cst_166 : f32 to vector<1x8x8xf32>
    %419 = arith.mulf %417, %418 : vector<1x8x8xf32>
    %420 = vector.broadcast %5 : vector<1x1x8xi1> to vector<1x8x8xi1>
    %421 = arith.andi %420, %371 : vector<1x8x8xi1>
    %cst_167 = arith.constant -1.000000e+09 : f32
    %422 = vector.broadcast %cst_167 : f32 to vector<1x8x8xf32>
    %423 = arith.select %421, %419, %422 : vector<1x8x8xi1>, vector<1x8x8xf32>
    %cst_168 = arith.constant dense<0xFF800000> : vector<1x8xf32>
    %424 = vector.multi_reduction <maximumf>, %423, %cst_168 [2] : vector<1x8x8xf32> to vector<1x8xf32>
    %425 = vector.shape_cast %424 : vector<1x8xf32> to vector<1x8x1xf32>
    %426 = vector.broadcast %425 : vector<1x8x1xf32> to vector<1x8x8xf32>
    %427 = arith.subf %423, %426 : vector<1x8x8xf32>
    %428 = math.exp %427 : vector<1x8x8xf32>
    %cst_169 = arith.constant dense<0.000000e+00> : vector<1x8xf32>
    %429 = vector.multi_reduction <add>, %428, %cst_169 [2] : vector<1x8x8xf32> to vector<1x8xf32>
    %430 = vector.shape_cast %429 : vector<1x8xf32> to vector<1x8x1xf32>
    %431 = tpu.reciprocal %430 {approx = true} : vector<1x8x1xf32> -> vector<1x8x1xf32>
    %432 = vector.broadcast %431 : vector<1x8x1xf32> to vector<1x8x8xf32>
    %433 = arith.mulf %428, %432 : vector<1x8x8xf32>
    %cst_170 = arith.constant dense<0.000000e+00> : vector<1x8x8xf32>
    %434 = tpu.matmul %433, %416, %cst_170 {dimension_numbers = #tpu.dot_dimension_numbers<[2], [1], [1], [2], [0, 0, 0, 1, 1, 2], [0], [0]>} : vector<1x8x8xf32>, vector<1x8x8xf32>, vector<1x8x8xf32> -> vector<1x8x8xf32>
    %435 = vector.extract_strided_slice %363 {offsets = [0, 0, 24], sizes = [1, 8, 8], strides = [1, 1, 1]} : vector<1x8x32xf32> to vector<1x8x8xf32>
    %436 = vector.extract_strided_slice %365 {offsets = [0, 0, 24], sizes = [1, 8, 8], strides = [1, 1, 1]} : vector<1x8x32xf32> to vector<1x8x8xf32>
    %437 = vector.extract_strided_slice %367 {offsets = [0, 0, 24], sizes = [1, 8, 8], strides = [1, 1, 1]} : vector<1x8x32xf32> to vector<1x8x8xf32>
    %cst_171 = arith.constant dense<0.000000e+00> : vector<1x8x8xf32>
    %438 = tpu.matmul %435, %436, %cst_171 {dimension_numbers = #tpu.dot_dimension_numbers<[2], [2], [1], [1], [0, 0, 0, 1, 1, 1], [0], [0]>} : vector<1x8x8xf32>, vector<1x8x8xf32>, vector<1x8x8xf32> -> vector<1x8x8xf32>
    %cst_172 = arith.constant 0.353553385 : f32
    %439 = vector.broadcast %cst_172 : f32 to vector<1x8x8xf32>
    %440 = arith.mulf %438, %439 : vector<1x8x8xf32>
    %441 = vector.broadcast %5 : vector<1x1x8xi1> to vector<1x8x8xi1>
    %442 = arith.andi %441, %371 : vector<1x8x8xi1>
    %cst_173 = arith.constant -1.000000e+09 : f32
    %443 = vector.broadcast %cst_173 : f32 to vector<1x8x8xf32>
    %444 = arith.select %442, %440, %443 : vector<1x8x8xi1>, vector<1x8x8xf32>
    %cst_174 = arith.constant dense<0xFF800000> : vector<1x8xf32>
    %445 = vector.multi_reduction <maximumf>, %444, %cst_174 [2] : vector<1x8x8xf32> to vector<1x8xf32>
    %446 = vector.shape_cast %445 : vector<1x8xf32> to vector<1x8x1xf32>
    %447 = vector.broadcast %446 : vector<1x8x1xf32> to vector<1x8x8xf32>
    %448 = arith.subf %444, %447 : vector<1x8x8xf32>
    %449 = math.exp %448 : vector<1x8x8xf32>
    %cst_175 = arith.constant dense<0.000000e+00> : vector<1x8xf32>
    %450 = vector.multi_reduction <add>, %449, %cst_175 [2] : vector<1x8x8xf32> to vector<1x8xf32>
    %451 = vector.shape_cast %450 : vector<1x8xf32> to vector<1x8x1xf32>
    %452 = tpu.reciprocal %451 {approx = true} : vector<1x8x1xf32> -> vector<1x8x1xf32>
    %453 = vector.broadcast %452 : vector<1x8x1xf32> to vector<1x8x8xf32>
    %454 = arith.mulf %449, %453 : vector<1x8x8xf32>
    %cst_176 = arith.constant dense<0.000000e+00> : vector<1x8x8xf32>
    %455 = tpu.matmul %454, %437, %cst_176 {dimension_numbers = #tpu.dot_dimension_numbers<[2], [1], [1], [2], [0, 0, 0, 1, 1, 2], [0], [0]>} : vector<1x8x8xf32>, vector<1x8x8xf32>, vector<1x8x8xf32> -> vector<1x8x8xf32>
    %456 = tpu.concatenate %392, %413, %434, %455 in 2 : vector<1x8x8xf32>, vector<1x8x8xf32>, vector<1x8x8xf32>, vector<1x8x8xf32> -> vector<1x8x32xf32>
    %457 = vector.shape_cast %456 : vector<1x8x32xf32> to vector<8x32xf32>
    %c0_177 = arith.constant 0 : index
    %c0_178 = arith.constant 0 : index
    %c0_179 = arith.constant 0 : index
    %458 = vector.load %arg16[%c0_177, %c0_178, %c0_179] : memref<2x32x32xf32, #tpu.memory_space<vmem>>, vector<1x32x32xf32>
    %459 = vector.shape_cast %458 : vector<1x32x32xf32> to vector<32x32xf32>
    %c0_180 = arith.constant 0 : index
    %c0_181 = arith.constant 0 : index
    %c0_182 = arith.constant 0 : index
    %460 = vector.load %arg17[%c0_180, %c0_181, %c0_182] : memref<2x1x32xf32, #tpu.memory_space<vmem>>, vector<1x1x32xf32>
    %461 = vector.shape_cast %460 : vector<1x1x32xf32> to vector<1x32xf32>
    %cst_183 = arith.constant dense<0.000000e+00> : vector<8x32xf32>
    %462 = tpu.matmul %457, %459, %cst_183 {dimension_numbers = #tpu.dot_dimension_numbers<[1], [0], [0], [1], [0, 0, 1, 1], [], []>} : vector<8x32xf32>, vector<32x32xf32>, vector<8x32xf32> -> vector<8x32xf32>
    %463 = vector.broadcast %461 : vector<1x32xf32> to vector<8x32xf32>
    %464 = arith.addf %462, %463 : vector<8x32xf32>
    %465 = arith.addf %352, %464 : vector<8x32xf32>
    %466 = vector.extract_strided_slice %354 {offsets = [0, 0], sizes = [1, 32], strides = [1, 1]} : vector<6x32xf32> to vector<1x32xf32>
    %467 = vector.extract_strided_slice %354 {offsets = [1, 0], sizes = [1, 32], strides = [1, 1]} : vector<6x32xf32> to vector<1x32xf32>
    %cst_184 = arith.constant dense<0.000000e+00> : vector<8xf32>
    %468 = vector.multi_reduction <add>, %465, %cst_184 [1] : vector<8x32xf32> to vector<8xf32>
    %469 = vector.shape_cast %468 : vector<8xf32> to vector<8x1xf32>
    %cst_185 = arith.constant 3.200000e+01 : f32
    %470 = vector.broadcast %cst_185 : f32 to vector<8x1xf32>
    %471 = arith.divf %469, %470 : vector<8x1xf32>
    %472 = vector.broadcast %471 : vector<8x1xf32> to vector<8x32xf32>
    %473 = arith.subf %465, %472 : vector<8x32xf32>
    %474 = arith.mulf %473, %473 : vector<8x32xf32>
    %cst_186 = arith.constant dense<0.000000e+00> : vector<8xf32>
    %475 = vector.multi_reduction <add>, %474, %cst_186 [1] : vector<8x32xf32> to vector<8xf32>
    %476 = vector.shape_cast %475 : vector<8xf32> to vector<8x1xf32>
    %cst_187 = arith.constant 3.200000e+01 : f32
    %477 = vector.broadcast %cst_187 : f32 to vector<8x1xf32>
    %478 = arith.divf %476, %477 : vector<8x1xf32>
    %cst_188 = arith.constant 9.99999974E-6 : f32
    %479 = vector.broadcast %cst_188 : f32 to vector<8x1xf32>
    %480 = arith.addf %478, %479 : vector<8x1xf32>
    %481 = math.rsqrt %480 : vector<8x1xf32>
    %482 = vector.broadcast %481 : vector<8x1xf32> to vector<8x32xf32>
    %483 = arith.mulf %473, %482 : vector<8x32xf32>
    %484 = vector.broadcast %466 : vector<1x32xf32> to vector<8x32xf32>
    %485 = arith.mulf %483, %484 : vector<8x32xf32>
    %486 = vector.broadcast %467 : vector<1x32xf32> to vector<8x32xf32>
    %487 = arith.addf %485, %486 : vector<8x32xf32>
    %c0_189 = arith.constant 0 : index
    %c0_190 = arith.constant 0 : index
    %c0_191 = arith.constant 0 : index
    %488 = vector.load %arg18[%c0_189, %c0_190, %c0_191] : memref<2x32x32xf32, #tpu.memory_space<vmem>>, vector<1x32x32xf32>
    %489 = vector.shape_cast %488 : vector<1x32x32xf32> to vector<32x32xf32>
    %c0_192 = arith.constant 0 : index
    %c0_193 = arith.constant 0 : index
    %c0_194 = arith.constant 0 : index
    %490 = vector.load %arg19[%c0_192, %c0_193, %c0_194] : memref<2x1x32xf32, #tpu.memory_space<vmem>>, vector<1x1x32xf32>
    %491 = vector.shape_cast %490 : vector<1x1x32xf32> to vector<1x32xf32>
    %cst_195 = arith.constant dense<0.000000e+00> : vector<8x32xf32>
    %492 = tpu.matmul %487, %489, %cst_195 {dimension_numbers = #tpu.dot_dimension_numbers<[1], [0], [0], [1], [0, 0, 1, 1], [], []>} : vector<8x32xf32>, vector<32x32xf32>, vector<8x32xf32> -> vector<8x32xf32>
    %493 = vector.broadcast %491 : vector<1x32xf32> to vector<8x32xf32>
    %494 = arith.addf %492, %493 : vector<8x32xf32>
    %495 = vector.shape_cast %350 : vector<1x8x32xf32> to vector<8x32xf32>
    %c0_196 = arith.constant 0 : index
    %c0_197 = arith.constant 0 : index
    %c0_198 = arith.constant 0 : index
    %496 = vector.load %arg20[%c0_196, %c0_197, %c0_198] : memref<2x32x64xf32, #tpu.memory_space<vmem>>, vector<1x32x64xf32>
    %497 = vector.shape_cast %496 : vector<1x32x64xf32> to vector<32x64xf32>
    %c0_199 = arith.constant 0 : index
    %c0_200 = arith.constant 0 : index
    %c0_201 = arith.constant 0 : index
    %498 = vector.load %arg21[%c0_199, %c0_200, %c0_201] : memref<2x1x64xf32, #tpu.memory_space<vmem>>, vector<1x1x64xf32>
    %499 = vector.shape_cast %498 : vector<1x1x64xf32> to vector<1x64xf32>
    %cst_202 = arith.constant dense<0.000000e+00> : vector<8x64xf32>
    %500 = tpu.matmul %495, %497, %cst_202 {dimension_numbers = #tpu.dot_dimension_numbers<[1], [0], [0], [1], [0, 0, 1, 1], [], []>} : vector<8x32xf32>, vector<32x64xf32>, vector<8x64xf32> -> vector<8x64xf32>
    %501 = vector.broadcast %499 : vector<1x64xf32> to vector<8x64xf32>
    %502 = arith.addf %500, %501 : vector<8x64xf32>
    %503 = vector.shape_cast %494 : vector<8x32xf32> to vector<1x8x32xf32>
    %504 = vector.extract_strided_slice %502 {offsets = [0, 0], sizes = [8, 32], strides = [1, 1]} : vector<8x64xf32> to vector<8x32xf32>
    %505 = vector.shape_cast %504 : vector<8x32xf32> to vector<1x8x32xf32>
    %506 = vector.extract_strided_slice %502 {offsets = [0, 32], sizes = [8, 32], strides = [1, 1]} : vector<8x64xf32> to vector<8x32xf32>
    %507 = vector.shape_cast %506 : vector<8x32xf32> to vector<1x8x32xf32>
    %508 = vector.extract_strided_slice %503 {offsets = [0, 0, 0], sizes = [1, 8, 8], strides = [1, 1, 1]} : vector<1x8x32xf32> to vector<1x8x8xf32>
    %509 = vector.extract_strided_slice %505 {offsets = [0, 0, 0], sizes = [1, 8, 8], strides = [1, 1, 1]} : vector<1x8x32xf32> to vector<1x8x8xf32>
    %510 = vector.extract_strided_slice %507 {offsets = [0, 0, 0], sizes = [1, 8, 8], strides = [1, 1, 1]} : vector<1x8x32xf32> to vector<1x8x8xf32>
    %cst_203 = arith.constant dense<0.000000e+00> : vector<1x8x8xf32>
    %511 = tpu.matmul %508, %509, %cst_203 {dimension_numbers = #tpu.dot_dimension_numbers<[2], [2], [1], [1], [0, 0, 0, 1, 1, 1], [0], [0]>} : vector<1x8x8xf32>, vector<1x8x8xf32>, vector<1x8x8xf32> -> vector<1x8x8xf32>
    %cst_204 = arith.constant 0.353553385 : f32
    %512 = vector.broadcast %cst_204 : f32 to vector<1x8x8xf32>
    %513 = arith.mulf %511, %512 : vector<1x8x8xf32>
    %cst_205 = arith.constant -1.000000e+09 : f32
    %514 = vector.shape_cast %2 : vector<1x1x8xi1> to vector<1x1x8xi1>
    %515 = vector.broadcast %514 : vector<1x1x8xi1> to vector<1x8x8xi1>
    %516 = vector.broadcast %cst_205 : f32 to vector<1x8x8xf32>
    %517 = arith.select %515, %513, %516 : vector<1x8x8xi1>, vector<1x8x8xf32>
    %cst_206 = arith.constant dense<0xFF800000> : vector<1x8xf32>
    %518 = vector.multi_reduction <maximumf>, %517, %cst_206 [2] : vector<1x8x8xf32> to vector<1x8xf32>
    %519 = vector.shape_cast %518 : vector<1x8xf32> to vector<1x8x1xf32>
    %520 = vector.broadcast %519 : vector<1x8x1xf32> to vector<1x8x8xf32>
    %521 = arith.subf %517, %520 : vector<1x8x8xf32>
    %522 = math.exp %521 : vector<1x8x8xf32>
    %cst_207 = arith.constant dense<0.000000e+00> : vector<1x8xf32>
    %523 = vector.multi_reduction <add>, %522, %cst_207 [2] : vector<1x8x8xf32> to vector<1x8xf32>
    %524 = vector.shape_cast %523 : vector<1x8xf32> to vector<1x8x1xf32>
    %525 = tpu.reciprocal %524 {approx = true} : vector<1x8x1xf32> -> vector<1x8x1xf32>
    %526 = vector.broadcast %525 : vector<1x8x1xf32> to vector<1x8x8xf32>
    %527 = arith.mulf %522, %526 : vector<1x8x8xf32>
    %cst_208 = arith.constant dense<0.000000e+00> : vector<1x8x8xf32>
    %528 = tpu.matmul %527, %510, %cst_208 {dimension_numbers = #tpu.dot_dimension_numbers<[2], [1], [1], [2], [0, 0, 0, 1, 1, 2], [0], [0]>} : vector<1x8x8xf32>, vector<1x8x8xf32>, vector<1x8x8xf32> -> vector<1x8x8xf32>
    %529 = vector.extract_strided_slice %503 {offsets = [0, 0, 8], sizes = [1, 8, 8], strides = [1, 1, 1]} : vector<1x8x32xf32> to vector<1x8x8xf32>
    %530 = vector.extract_strided_slice %505 {offsets = [0, 0, 8], sizes = [1, 8, 8], strides = [1, 1, 1]} : vector<1x8x32xf32> to vector<1x8x8xf32>
    %531 = vector.extract_strided_slice %507 {offsets = [0, 0, 8], sizes = [1, 8, 8], strides = [1, 1, 1]} : vector<1x8x32xf32> to vector<1x8x8xf32>
    %cst_209 = arith.constant dense<0.000000e+00> : vector<1x8x8xf32>
    %532 = tpu.matmul %529, %530, %cst_209 {dimension_numbers = #tpu.dot_dimension_numbers<[2], [2], [1], [1], [0, 0, 0, 1, 1, 1], [0], [0]>} : vector<1x8x8xf32>, vector<1x8x8xf32>, vector<1x8x8xf32> -> vector<1x8x8xf32>
    %cst_210 = arith.constant 0.353553385 : f32
    %533 = vector.broadcast %cst_210 : f32 to vector<1x8x8xf32>
    %534 = arith.mulf %532, %533 : vector<1x8x8xf32>
    %cst_211 = arith.constant -1.000000e+09 : f32
    %535 = vector.shape_cast %2 : vector<1x1x8xi1> to vector<1x1x8xi1>
    %536 = vector.broadcast %535 : vector<1x1x8xi1> to vector<1x8x8xi1>
    %537 = vector.broadcast %cst_211 : f32 to vector<1x8x8xf32>
    %538 = arith.select %536, %534, %537 : vector<1x8x8xi1>, vector<1x8x8xf32>
    %cst_212 = arith.constant dense<0xFF800000> : vector<1x8xf32>
    %539 = vector.multi_reduction <maximumf>, %538, %cst_212 [2] : vector<1x8x8xf32> to vector<1x8xf32>
    %540 = vector.shape_cast %539 : vector<1x8xf32> to vector<1x8x1xf32>
    %541 = vector.broadcast %540 : vector<1x8x1xf32> to vector<1x8x8xf32>
    %542 = arith.subf %538, %541 : vector<1x8x8xf32>
    %543 = math.exp %542 : vector<1x8x8xf32>
    %cst_213 = arith.constant dense<0.000000e+00> : vector<1x8xf32>
    %544 = vector.multi_reduction <add>, %543, %cst_213 [2] : vector<1x8x8xf32> to vector<1x8xf32>
    %545 = vector.shape_cast %544 : vector<1x8xf32> to vector<1x8x1xf32>
    %546 = tpu.reciprocal %545 {approx = true} : vector<1x8x1xf32> -> vector<1x8x1xf32>
    %547 = vector.broadcast %546 : vector<1x8x1xf32> to vector<1x8x8xf32>
    %548 = arith.mulf %543, %547 : vector<1x8x8xf32>
    %cst_214 = arith.constant dense<0.000000e+00> : vector<1x8x8xf32>
    %549 = tpu.matmul %548, %531, %cst_214 {dimension_numbers = #tpu.dot_dimension_numbers<[2], [1], [1], [2], [0, 0, 0, 1, 1, 2], [0], [0]>} : vector<1x8x8xf32>, vector<1x8x8xf32>, vector<1x8x8xf32> -> vector<1x8x8xf32>
    %550 = vector.extract_strided_slice %503 {offsets = [0, 0, 16], sizes = [1, 8, 8], strides = [1, 1, 1]} : vector<1x8x32xf32> to vector<1x8x8xf32>
    %551 = vector.extract_strided_slice %505 {offsets = [0, 0, 16], sizes = [1, 8, 8], strides = [1, 1, 1]} : vector<1x8x32xf32> to vector<1x8x8xf32>
    %552 = vector.extract_strided_slice %507 {offsets = [0, 0, 16], sizes = [1, 8, 8], strides = [1, 1, 1]} : vector<1x8x32xf32> to vector<1x8x8xf32>
    %cst_215 = arith.constant dense<0.000000e+00> : vector<1x8x8xf32>
    %553 = tpu.matmul %550, %551, %cst_215 {dimension_numbers = #tpu.dot_dimension_numbers<[2], [2], [1], [1], [0, 0, 0, 1, 1, 1], [0], [0]>} : vector<1x8x8xf32>, vector<1x8x8xf32>, vector<1x8x8xf32> -> vector<1x8x8xf32>
    %cst_216 = arith.constant 0.353553385 : f32
    %554 = vector.broadcast %cst_216 : f32 to vector<1x8x8xf32>
    %555 = arith.mulf %553, %554 : vector<1x8x8xf32>
    %cst_217 = arith.constant -1.000000e+09 : f32
    %556 = vector.shape_cast %2 : vector<1x1x8xi1> to vector<1x1x8xi1>
    %557 = vector.broadcast %556 : vector<1x1x8xi1> to vector<1x8x8xi1>
    %558 = vector.broadcast %cst_217 : f32 to vector<1x8x8xf32>
    %559 = arith.select %557, %555, %558 : vector<1x8x8xi1>, vector<1x8x8xf32>
    %cst_218 = arith.constant dense<0xFF800000> : vector<1x8xf32>
    %560 = vector.multi_reduction <maximumf>, %559, %cst_218 [2] : vector<1x8x8xf32> to vector<1x8xf32>
    %561 = vector.shape_cast %560 : vector<1x8xf32> to vector<1x8x1xf32>
    %562 = vector.broadcast %561 : vector<1x8x1xf32> to vector<1x8x8xf32>
    %563 = arith.subf %559, %562 : vector<1x8x8xf32>
    %564 = math.exp %563 : vector<1x8x8xf32>
    %cst_219 = arith.constant dense<0.000000e+00> : vector<1x8xf32>
    %565 = vector.multi_reduction <add>, %564, %cst_219 [2] : vector<1x8x8xf32> to vector<1x8xf32>
    %566 = vector.shape_cast %565 : vector<1x8xf32> to vector<1x8x1xf32>
    %567 = tpu.reciprocal %566 {approx = true} : vector<1x8x1xf32> -> vector<1x8x1xf32>
    %568 = vector.broadcast %567 : vector<1x8x1xf32> to vector<1x8x8xf32>
    %569 = arith.mulf %564, %568 : vector<1x8x8xf32>
    %cst_220 = arith.constant dense<0.000000e+00> : vector<1x8x8xf32>
    %570 = tpu.matmul %569, %552, %cst_220 {dimension_numbers = #tpu.dot_dimension_numbers<[2], [1], [1], [2], [0, 0, 0, 1, 1, 2], [0], [0]>} : vector<1x8x8xf32>, vector<1x8x8xf32>, vector<1x8x8xf32> -> vector<1x8x8xf32>
    %571 = vector.extract_strided_slice %503 {offsets = [0, 0, 24], sizes = [1, 8, 8], strides = [1, 1, 1]} : vector<1x8x32xf32> to vector<1x8x8xf32>
    %572 = vector.extract_strided_slice %505 {offsets = [0, 0, 24], sizes = [1, 8, 8], strides = [1, 1, 1]} : vector<1x8x32xf32> to vector<1x8x8xf32>
    %573 = vector.extract_strided_slice %507 {offsets = [0, 0, 24], sizes = [1, 8, 8], strides = [1, 1, 1]} : vector<1x8x32xf32> to vector<1x8x8xf32>
    %cst_221 = arith.constant dense<0.000000e+00> : vector<1x8x8xf32>
    %574 = tpu.matmul %571, %572, %cst_221 {dimension_numbers = #tpu.dot_dimension_numbers<[2], [2], [1], [1], [0, 0, 0, 1, 1, 1], [0], [0]>} : vector<1x8x8xf32>, vector<1x8x8xf32>, vector<1x8x8xf32> -> vector<1x8x8xf32>
    %cst_222 = arith.constant 0.353553385 : f32
    %575 = vector.broadcast %cst_222 : f32 to vector<1x8x8xf32>
    %576 = arith.mulf %574, %575 : vector<1x8x8xf32>
    %cst_223 = arith.constant -1.000000e+09 : f32
    %577 = vector.shape_cast %2 : vector<1x1x8xi1> to vector<1x1x8xi1>
    %578 = vector.broadcast %577 : vector<1x1x8xi1> to vector<1x8x8xi1>
    %579 = vector.broadcast %cst_223 : f32 to vector<1x8x8xf32>
    %580 = arith.select %578, %576, %579 : vector<1x8x8xi1>, vector<1x8x8xf32>
    %cst_224 = arith.constant dense<0xFF800000> : vector<1x8xf32>
    %581 = vector.multi_reduction <maximumf>, %580, %cst_224 [2] : vector<1x8x8xf32> to vector<1x8xf32>
    %582 = vector.shape_cast %581 : vector<1x8xf32> to vector<1x8x1xf32>
    %583 = vector.broadcast %582 : vector<1x8x1xf32> to vector<1x8x8xf32>
    %584 = arith.subf %580, %583 : vector<1x8x8xf32>
    %585 = math.exp %584 : vector<1x8x8xf32>
    %cst_225 = arith.constant dense<0.000000e+00> : vector<1x8xf32>
    %586 = vector.multi_reduction <add>, %585, %cst_225 [2] : vector<1x8x8xf32> to vector<1x8xf32>
    %587 = vector.shape_cast %586 : vector<1x8xf32> to vector<1x8x1xf32>
    %588 = tpu.reciprocal %587 {approx = true} : vector<1x8x1xf32> -> vector<1x8x1xf32>
    %589 = vector.broadcast %588 : vector<1x8x1xf32> to vector<1x8x8xf32>
    %590 = arith.mulf %585, %589 : vector<1x8x8xf32>
    %cst_226 = arith.constant dense<0.000000e+00> : vector<1x8x8xf32>
    %591 = tpu.matmul %590, %573, %cst_226 {dimension_numbers = #tpu.dot_dimension_numbers<[2], [1], [1], [2], [0, 0, 0, 1, 1, 2], [0], [0]>} : vector<1x8x8xf32>, vector<1x8x8xf32>, vector<1x8x8xf32> -> vector<1x8x8xf32>
    %592 = tpu.concatenate %528, %549, %570, %591 in 2 : vector<1x8x8xf32>, vector<1x8x8xf32>, vector<1x8x8xf32>, vector<1x8x8xf32> -> vector<1x8x32xf32>
    %593 = vector.shape_cast %592 : vector<1x8x32xf32> to vector<8x32xf32>
    %c0_227 = arith.constant 0 : index
    %c0_228 = arith.constant 0 : index
    %c0_229 = arith.constant 0 : index
    %594 = vector.load %arg22[%c0_227, %c0_228, %c0_229] : memref<2x32x32xf32, #tpu.memory_space<vmem>>, vector<1x32x32xf32>
    %595 = vector.shape_cast %594 : vector<1x32x32xf32> to vector<32x32xf32>
    %c0_230 = arith.constant 0 : index
    %c0_231 = arith.constant 0 : index
    %c0_232 = arith.constant 0 : index
    %596 = vector.load %arg23[%c0_230, %c0_231, %c0_232] : memref<2x1x32xf32, #tpu.memory_space<vmem>>, vector<1x1x32xf32>
    %597 = vector.shape_cast %596 : vector<1x1x32xf32> to vector<1x32xf32>
    %cst_233 = arith.constant dense<0.000000e+00> : vector<8x32xf32>
    %598 = tpu.matmul %593, %595, %cst_233 {dimension_numbers = #tpu.dot_dimension_numbers<[1], [0], [0], [1], [0, 0, 1, 1], [], []>} : vector<8x32xf32>, vector<32x32xf32>, vector<8x32xf32> -> vector<8x32xf32>
    %599 = vector.broadcast %597 : vector<1x32xf32> to vector<8x32xf32>
    %600 = arith.addf %598, %599 : vector<8x32xf32>
    %601 = arith.addf %487, %600 : vector<8x32xf32>
    %602 = vector.extract_strided_slice %354 {offsets = [2, 0], sizes = [1, 32], strides = [1, 1]} : vector<6x32xf32> to vector<1x32xf32>
    %603 = vector.extract_strided_slice %354 {offsets = [3, 0], sizes = [1, 32], strides = [1, 1]} : vector<6x32xf32> to vector<1x32xf32>
    %cst_234 = arith.constant dense<0.000000e+00> : vector<8xf32>
    %604 = vector.multi_reduction <add>, %601, %cst_234 [1] : vector<8x32xf32> to vector<8xf32>
    %605 = vector.shape_cast %604 : vector<8xf32> to vector<8x1xf32>
    %cst_235 = arith.constant 3.200000e+01 : f32
    %606 = vector.broadcast %cst_235 : f32 to vector<8x1xf32>
    %607 = arith.divf %605, %606 : vector<8x1xf32>
    %608 = vector.broadcast %607 : vector<8x1xf32> to vector<8x32xf32>
    %609 = arith.subf %601, %608 : vector<8x32xf32>
    %610 = arith.mulf %609, %609 : vector<8x32xf32>
    %cst_236 = arith.constant dense<0.000000e+00> : vector<8xf32>
    %611 = vector.multi_reduction <add>, %610, %cst_236 [1] : vector<8x32xf32> to vector<8xf32>
    %612 = vector.shape_cast %611 : vector<8xf32> to vector<8x1xf32>
    %cst_237 = arith.constant 3.200000e+01 : f32
    %613 = vector.broadcast %cst_237 : f32 to vector<8x1xf32>
    %614 = arith.divf %612, %613 : vector<8x1xf32>
    %cst_238 = arith.constant 9.99999974E-6 : f32
    %615 = vector.broadcast %cst_238 : f32 to vector<8x1xf32>
    %616 = arith.addf %614, %615 : vector<8x1xf32>
    %617 = math.rsqrt %616 : vector<8x1xf32>
    %618 = vector.broadcast %617 : vector<8x1xf32> to vector<8x32xf32>
    %619 = arith.mulf %609, %618 : vector<8x32xf32>
    %620 = vector.broadcast %602 : vector<1x32xf32> to vector<8x32xf32>
    %621 = arith.mulf %619, %620 : vector<8x32xf32>
    %622 = vector.broadcast %603 : vector<1x32xf32> to vector<8x32xf32>
    %623 = arith.addf %621, %622 : vector<8x32xf32>
    %c0_239 = arith.constant 0 : index
    %c0_240 = arith.constant 0 : index
    %c0_241 = arith.constant 0 : index
    %624 = vector.load %arg24[%c0_239, %c0_240, %c0_241] : memref<2x32x64xf32, #tpu.memory_space<vmem>>, vector<1x32x64xf32>
    %625 = vector.shape_cast %624 : vector<1x32x64xf32> to vector<32x64xf32>
    %c0_242 = arith.constant 0 : index
    %c0_243 = arith.constant 0 : index
    %c0_244 = arith.constant 0 : index
    %626 = vector.load %arg25[%c0_242, %c0_243, %c0_244] : memref<2x1x64xf32, #tpu.memory_space<vmem>>, vector<1x1x64xf32>
    %627 = vector.shape_cast %626 : vector<1x1x64xf32> to vector<1x64xf32>
    %cst_245 = arith.constant dense<0.000000e+00> : vector<8x64xf32>
    %628 = tpu.matmul %623, %625, %cst_245 {dimension_numbers = #tpu.dot_dimension_numbers<[1], [0], [0], [1], [0, 0, 1, 1], [], []>} : vector<8x32xf32>, vector<32x64xf32>, vector<8x64xf32> -> vector<8x64xf32>
    %629 = vector.broadcast %627 : vector<1x64xf32> to vector<8x64xf32>
    %630 = arith.addf %628, %629 : vector<8x64xf32>
    %cst_246 = arith.constant 0.000000e+00 : f32
    %631 = vector.broadcast %cst_246 : f32 to vector<8x64xf32>
    %632 = arith.maximumf %630, %631 : vector<8x64xf32>
    %c0_247 = arith.constant 0 : index
    %c0_248 = arith.constant 0 : index
    %c0_249 = arith.constant 0 : index
    %633 = vector.load %arg26[%c0_247, %c0_248, %c0_249] : memref<2x64x32xf32, #tpu.memory_space<vmem>>, vector<1x64x32xf32>
    %634 = vector.shape_cast %633 : vector<1x64x32xf32> to vector<64x32xf32>
    %c0_250 = arith.constant 0 : index
    %c0_251 = arith.constant 0 : index
    %c0_252 = arith.constant 0 : index
    %635 = vector.load %arg27[%c0_250, %c0_251, %c0_252] : memref<2x1x32xf32, #tpu.memory_space<vmem>>, vector<1x1x32xf32>
    %636 = vector.shape_cast %635 : vector<1x1x32xf32> to vector<1x32xf32>
    %cst_253 = arith.constant dense<0.000000e+00> : vector<8x32xf32>
    %637 = tpu.matmul %632, %634, %cst_253 {dimension_numbers = #tpu.dot_dimension_numbers<[1], [0], [0], [1], [0, 0, 1, 1], [], []>} : vector<8x64xf32>, vector<64x32xf32>, vector<8x32xf32> -> vector<8x32xf32>
    %638 = vector.broadcast %636 : vector<1x32xf32> to vector<8x32xf32>
    %639 = arith.addf %637, %638 : vector<8x32xf32>
    %640 = arith.addf %623, %639 : vector<8x32xf32>
    %641 = vector.extract_strided_slice %354 {offsets = [4, 0], sizes = [1, 32], strides = [1, 1]} : vector<6x32xf32> to vector<1x32xf32>
    %642 = vector.extract_strided_slice %354 {offsets = [5, 0], sizes = [1, 32], strides = [1, 1]} : vector<6x32xf32> to vector<1x32xf32>
    %cst_254 = arith.constant dense<0.000000e+00> : vector<8xf32>
    %643 = vector.multi_reduction <add>, %640, %cst_254 [1] : vector<8x32xf32> to vector<8xf32>
    %644 = vector.shape_cast %643 : vector<8xf32> to vector<8x1xf32>
    %cst_255 = arith.constant 3.200000e+01 : f32
    %645 = vector.broadcast %cst_255 : f32 to vector<8x1xf32>
    %646 = arith.divf %644, %645 : vector<8x1xf32>
    %647 = vector.broadcast %646 : vector<8x1xf32> to vector<8x32xf32>
    %648 = arith.subf %640, %647 : vector<8x32xf32>
    %649 = arith.mulf %648, %648 : vector<8x32xf32>
    %cst_256 = arith.constant dense<0.000000e+00> : vector<8xf32>
    %650 = vector.multi_reduction <add>, %649, %cst_256 [1] : vector<8x32xf32> to vector<8xf32>
    %651 = vector.shape_cast %650 : vector<8xf32> to vector<8x1xf32>
    %cst_257 = arith.constant 3.200000e+01 : f32
    %652 = vector.broadcast %cst_257 : f32 to vector<8x1xf32>
    %653 = arith.divf %651, %652 : vector<8x1xf32>
    %cst_258 = arith.constant 9.99999974E-6 : f32
    %654 = vector.broadcast %cst_258 : f32 to vector<8x1xf32>
    %655 = arith.addf %653, %654 : vector<8x1xf32>
    %656 = math.rsqrt %655 : vector<8x1xf32>
    %657 = vector.broadcast %656 : vector<8x1xf32> to vector<8x32xf32>
    %658 = arith.mulf %648, %657 : vector<8x32xf32>
    %659 = vector.broadcast %641 : vector<1x32xf32> to vector<8x32xf32>
    %660 = arith.mulf %658, %659 : vector<8x32xf32>
    %661 = vector.broadcast %642 : vector<1x32xf32> to vector<8x32xf32>
    %662 = arith.addf %660, %661 : vector<8x32xf32>
    %663 = vector.shape_cast %662 : vector<8x32xf32> to vector<1x8x32xf32>
    %664 = vector.shape_cast %663 : vector<1x8x32xf32> to vector<8x32xf32>
    %c1_259 = arith.constant 1 : index
    %c0_260 = arith.constant 0 : index
    %c0_261 = arith.constant 0 : index
    %665 = vector.load %arg28[%c1_259, %c0_260, %c0_261] : memref<2x6x32xf32, #tpu.memory_space<vmem>>, vector<1x6x32xf32>
    %666 = vector.shape_cast %665 : vector<1x6x32xf32> to vector<6x32xf32>
    %c1_262 = arith.constant 1 : index
    %c0_263 = arith.constant 0 : index
    %c0_264 = arith.constant 0 : index
    %667 = vector.load %arg14[%c1_262, %c0_263, %c0_264] : memref<2x32x96xf32, #tpu.memory_space<vmem>>, vector<1x32x96xf32>
    %668 = vector.shape_cast %667 : vector<1x32x96xf32> to vector<32x96xf32>
    %c1_265 = arith.constant 1 : index
    %c0_266 = arith.constant 0 : index
    %c0_267 = arith.constant 0 : index
    %669 = vector.load %arg15[%c1_265, %c0_266, %c0_267] : memref<2x1x96xf32, #tpu.memory_space<vmem>>, vector<1x1x96xf32>
    %670 = vector.shape_cast %669 : vector<1x1x96xf32> to vector<1x96xf32>
    %cst_268 = arith.constant dense<0.000000e+00> : vector<8x96xf32>
    %671 = tpu.matmul %664, %668, %cst_268 {dimension_numbers = #tpu.dot_dimension_numbers<[1], [0], [0], [1], [0, 0, 1, 1], [], []>} : vector<8x32xf32>, vector<32x96xf32>, vector<8x96xf32> -> vector<8x96xf32>
    %672 = vector.broadcast %670 : vector<1x96xf32> to vector<8x96xf32>
    %673 = arith.addf %671, %672 : vector<8x96xf32>
    %674 = vector.extract_strided_slice %673 {offsets = [0, 0], sizes = [8, 32], strides = [1, 1]} : vector<8x96xf32> to vector<8x32xf32>
    %675 = vector.shape_cast %674 : vector<8x32xf32> to vector<1x8x32xf32>
    %676 = vector.extract_strided_slice %673 {offsets = [0, 32], sizes = [8, 32], strides = [1, 1]} : vector<8x96xf32> to vector<8x32xf32>
    %677 = vector.shape_cast %676 : vector<8x32xf32> to vector<1x8x32xf32>
    %678 = vector.extract_strided_slice %673 {offsets = [0, 64], sizes = [8, 32], strides = [1, 1]} : vector<8x96xf32> to vector<8x32xf32>
    %679 = vector.shape_cast %678 : vector<8x32xf32> to vector<1x8x32xf32>
    %680 = tpu.iota {dimensions = array<i32: 0>} : vector<8x8xi32>
    %681 = tpu.iota {dimensions = array<i32: 1>} : vector<8x8xi32>
    %682 = arith.cmpi sle, %681, %680 : vector<8x8xi32>
    %683 = vector.shape_cast %682 : vector<8x8xi1> to vector<1x8x8xi1>
    %684 = vector.extract_strided_slice %675 {offsets = [0, 0, 0], sizes = [1, 8, 8], strides = [1, 1, 1]} : vector<1x8x32xf32> to vector<1x8x8xf32>
    %685 = vector.extract_strided_slice %677 {offsets = [0, 0, 0], sizes = [1, 8, 8], strides = [1, 1, 1]} : vector<1x8x32xf32> to vector<1x8x8xf32>
    %686 = vector.extract_strided_slice %679 {offsets = [0, 0, 0], sizes = [1, 8, 8], strides = [1, 1, 1]} : vector<1x8x32xf32> to vector<1x8x8xf32>
    %cst_269 = arith.constant dense<0.000000e+00> : vector<1x8x8xf32>
    %687 = tpu.matmul %684, %685, %cst_269 {dimension_numbers = #tpu.dot_dimension_numbers<[2], [2], [1], [1], [0, 0, 0, 1, 1, 1], [0], [0]>} : vector<1x8x8xf32>, vector<1x8x8xf32>, vector<1x8x8xf32> -> vector<1x8x8xf32>
    %cst_270 = arith.constant 0.353553385 : f32
    %688 = vector.broadcast %cst_270 : f32 to vector<1x8x8xf32>
    %689 = arith.mulf %687, %688 : vector<1x8x8xf32>
    %690 = vector.broadcast %5 : vector<1x1x8xi1> to vector<1x8x8xi1>
    %691 = arith.andi %690, %683 : vector<1x8x8xi1>
    %cst_271 = arith.constant -1.000000e+09 : f32
    %692 = vector.broadcast %cst_271 : f32 to vector<1x8x8xf32>
    %693 = arith.select %691, %689, %692 : vector<1x8x8xi1>, vector<1x8x8xf32>
    %cst_272 = arith.constant dense<0xFF800000> : vector<1x8xf32>
    %694 = vector.multi_reduction <maximumf>, %693, %cst_272 [2] : vector<1x8x8xf32> to vector<1x8xf32>
    %695 = vector.shape_cast %694 : vector<1x8xf32> to vector<1x8x1xf32>
    %696 = vector.broadcast %695 : vector<1x8x1xf32> to vector<1x8x8xf32>
    %697 = arith.subf %693, %696 : vector<1x8x8xf32>
    %698 = math.exp %697 : vector<1x8x8xf32>
    %cst_273 = arith.constant dense<0.000000e+00> : vector<1x8xf32>
    %699 = vector.multi_reduction <add>, %698, %cst_273 [2] : vector<1x8x8xf32> to vector<1x8xf32>
    %700 = vector.shape_cast %699 : vector<1x8xf32> to vector<1x8x1xf32>
    %701 = tpu.reciprocal %700 {approx = true} : vector<1x8x1xf32> -> vector<1x8x1xf32>
    %702 = vector.broadcast %701 : vector<1x8x1xf32> to vector<1x8x8xf32>
    %703 = arith.mulf %698, %702 : vector<1x8x8xf32>
    %cst_274 = arith.constant dense<0.000000e+00> : vector<1x8x8xf32>
    %704 = tpu.matmul %703, %686, %cst_274 {dimension_numbers = #tpu.dot_dimension_numbers<[2], [1], [1], [2], [0, 0, 0, 1, 1, 2], [0], [0]>} : vector<1x8x8xf32>, vector<1x8x8xf32>, vector<1x8x8xf32> -> vector<1x8x8xf32>
    %705 = vector.extract_strided_slice %675 {offsets = [0, 0, 8], sizes = [1, 8, 8], strides = [1, 1, 1]} : vector<1x8x32xf32> to vector<1x8x8xf32>
    %706 = vector.extract_strided_slice %677 {offsets = [0, 0, 8], sizes = [1, 8, 8], strides = [1, 1, 1]} : vector<1x8x32xf32> to vector<1x8x8xf32>
    %707 = vector.extract_strided_slice %679 {offsets = [0, 0, 8], sizes = [1, 8, 8], strides = [1, 1, 1]} : vector<1x8x32xf32> to vector<1x8x8xf32>
    %cst_275 = arith.constant dense<0.000000e+00> : vector<1x8x8xf32>
    %708 = tpu.matmul %705, %706, %cst_275 {dimension_numbers = #tpu.dot_dimension_numbers<[2], [2], [1], [1], [0, 0, 0, 1, 1, 1], [0], [0]>} : vector<1x8x8xf32>, vector<1x8x8xf32>, vector<1x8x8xf32> -> vector<1x8x8xf32>
    %cst_276 = arith.constant 0.353553385 : f32
    %709 = vector.broadcast %cst_276 : f32 to vector<1x8x8xf32>
    %710 = arith.mulf %708, %709 : vector<1x8x8xf32>
    %711 = vector.broadcast %5 : vector<1x1x8xi1> to vector<1x8x8xi1>
    %712 = arith.andi %711, %683 : vector<1x8x8xi1>
    %cst_277 = arith.constant -1.000000e+09 : f32
    %713 = vector.broadcast %cst_277 : f32 to vector<1x8x8xf32>
    %714 = arith.select %712, %710, %713 : vector<1x8x8xi1>, vector<1x8x8xf32>
    %cst_278 = arith.constant dense<0xFF800000> : vector<1x8xf32>
    %715 = vector.multi_reduction <maximumf>, %714, %cst_278 [2] : vector<1x8x8xf32> to vector<1x8xf32>
    %716 = vector.shape_cast %715 : vector<1x8xf32> to vector<1x8x1xf32>
    %717 = vector.broadcast %716 : vector<1x8x1xf32> to vector<1x8x8xf32>
    %718 = arith.subf %714, %717 : vector<1x8x8xf32>
    %719 = math.exp %718 : vector<1x8x8xf32>
    %cst_279 = arith.constant dense<0.000000e+00> : vector<1x8xf32>
    %720 = vector.multi_reduction <add>, %719, %cst_279 [2] : vector<1x8x8xf32> to vector<1x8xf32>
    %721 = vector.shape_cast %720 : vector<1x8xf32> to vector<1x8x1xf32>
    %722 = tpu.reciprocal %721 {approx = true} : vector<1x8x1xf32> -> vector<1x8x1xf32>
    %723 = vector.broadcast %722 : vector<1x8x1xf32> to vector<1x8x8xf32>
    %724 = arith.mulf %719, %723 : vector<1x8x8xf32>
    %cst_280 = arith.constant dense<0.000000e+00> : vector<1x8x8xf32>
    %725 = tpu.matmul %724, %707, %cst_280 {dimension_numbers = #tpu.dot_dimension_numbers<[2], [1], [1], [2], [0, 0, 0, 1, 1, 2], [0], [0]>} : vector<1x8x8xf32>, vector<1x8x8xf32>, vector<1x8x8xf32> -> vector<1x8x8xf32>
    %726 = vector.extract_strided_slice %675 {offsets = [0, 0, 16], sizes = [1, 8, 8], strides = [1, 1, 1]} : vector<1x8x32xf32> to vector<1x8x8xf32>
    %727 = vector.extract_strided_slice %677 {offsets = [0, 0, 16], sizes = [1, 8, 8], strides = [1, 1, 1]} : vector<1x8x32xf32> to vector<1x8x8xf32>
    %728 = vector.extract_strided_slice %679 {offsets = [0, 0, 16], sizes = [1, 8, 8], strides = [1, 1, 1]} : vector<1x8x32xf32> to vector<1x8x8xf32>
    %cst_281 = arith.constant dense<0.000000e+00> : vector<1x8x8xf32>
    %729 = tpu.matmul %726, %727, %cst_281 {dimension_numbers = #tpu.dot_dimension_numbers<[2], [2], [1], [1], [0, 0, 0, 1, 1, 1], [0], [0]>} : vector<1x8x8xf32>, vector<1x8x8xf32>, vector<1x8x8xf32> -> vector<1x8x8xf32>
    %cst_282 = arith.constant 0.353553385 : f32
    %730 = vector.broadcast %cst_282 : f32 to vector<1x8x8xf32>
    %731 = arith.mulf %729, %730 : vector<1x8x8xf32>
    %732 = vector.broadcast %5 : vector<1x1x8xi1> to vector<1x8x8xi1>
    %733 = arith.andi %732, %683 : vector<1x8x8xi1>
    %cst_283 = arith.constant -1.000000e+09 : f32
    %734 = vector.broadcast %cst_283 : f32 to vector<1x8x8xf32>
    %735 = arith.select %733, %731, %734 : vector<1x8x8xi1>, vector<1x8x8xf32>
    %cst_284 = arith.constant dense<0xFF800000> : vector<1x8xf32>
    %736 = vector.multi_reduction <maximumf>, %735, %cst_284 [2] : vector<1x8x8xf32> to vector<1x8xf32>
    %737 = vector.shape_cast %736 : vector<1x8xf32> to vector<1x8x1xf32>
    %738 = vector.broadcast %737 : vector<1x8x1xf32> to vector<1x8x8xf32>
    %739 = arith.subf %735, %738 : vector<1x8x8xf32>
    %740 = math.exp %739 : vector<1x8x8xf32>
    %cst_285 = arith.constant dense<0.000000e+00> : vector<1x8xf32>
    %741 = vector.multi_reduction <add>, %740, %cst_285 [2] : vector<1x8x8xf32> to vector<1x8xf32>
    %742 = vector.shape_cast %741 : vector<1x8xf32> to vector<1x8x1xf32>
    %743 = tpu.reciprocal %742 {approx = true} : vector<1x8x1xf32> -> vector<1x8x1xf32>
    %744 = vector.broadcast %743 : vector<1x8x1xf32> to vector<1x8x8xf32>
    %745 = arith.mulf %740, %744 : vector<1x8x8xf32>
    %cst_286 = arith.constant dense<0.000000e+00> : vector<1x8x8xf32>
    %746 = tpu.matmul %745, %728, %cst_286 {dimension_numbers = #tpu.dot_dimension_numbers<[2], [1], [1], [2], [0, 0, 0, 1, 1, 2], [0], [0]>} : vector<1x8x8xf32>, vector<1x8x8xf32>, vector<1x8x8xf32> -> vector<1x8x8xf32>
    %747 = vector.extract_strided_slice %675 {offsets = [0, 0, 24], sizes = [1, 8, 8], strides = [1, 1, 1]} : vector<1x8x32xf32> to vector<1x8x8xf32>
    %748 = vector.extract_strided_slice %677 {offsets = [0, 0, 24], sizes = [1, 8, 8], strides = [1, 1, 1]} : vector<1x8x32xf32> to vector<1x8x8xf32>
    %749 = vector.extract_strided_slice %679 {offsets = [0, 0, 24], sizes = [1, 8, 8], strides = [1, 1, 1]} : vector<1x8x32xf32> to vector<1x8x8xf32>
    %cst_287 = arith.constant dense<0.000000e+00> : vector<1x8x8xf32>
    %750 = tpu.matmul %747, %748, %cst_287 {dimension_numbers = #tpu.dot_dimension_numbers<[2], [2], [1], [1], [0, 0, 0, 1, 1, 1], [0], [0]>} : vector<1x8x8xf32>, vector<1x8x8xf32>, vector<1x8x8xf32> -> vector<1x8x8xf32>
    %cst_288 = arith.constant 0.353553385 : f32
    %751 = vector.broadcast %cst_288 : f32 to vector<1x8x8xf32>
    %752 = arith.mulf %750, %751 : vector<1x8x8xf32>
    %753 = vector.broadcast %5 : vector<1x1x8xi1> to vector<1x8x8xi1>
    %754 = arith.andi %753, %683 : vector<1x8x8xi1>
    %cst_289 = arith.constant -1.000000e+09 : f32
    %755 = vector.broadcast %cst_289 : f32 to vector<1x8x8xf32>
    %756 = arith.select %754, %752, %755 : vector<1x8x8xi1>, vector<1x8x8xf32>
    %cst_290 = arith.constant dense<0xFF800000> : vector<1x8xf32>
    %757 = vector.multi_reduction <maximumf>, %756, %cst_290 [2] : vector<1x8x8xf32> to vector<1x8xf32>
    %758 = vector.shape_cast %757 : vector<1x8xf32> to vector<1x8x1xf32>
    %759 = vector.broadcast %758 : vector<1x8x1xf32> to vector<1x8x8xf32>
    %760 = arith.subf %756, %759 : vector<1x8x8xf32>
    %761 = math.exp %760 : vector<1x8x8xf32>
    %cst_291 = arith.constant dense<0.000000e+00> : vector<1x8xf32>
    %762 = vector.multi_reduction <add>, %761, %cst_291 [2] : vector<1x8x8xf32> to vector<1x8xf32>
    %763 = vector.shape_cast %762 : vector<1x8xf32> to vector<1x8x1xf32>
    %764 = tpu.reciprocal %763 {approx = true} : vector<1x8x1xf32> -> vector<1x8x1xf32>
    %765 = vector.broadcast %764 : vector<1x8x1xf32> to vector<1x8x8xf32>
    %766 = arith.mulf %761, %765 : vector<1x8x8xf32>
    %cst_292 = arith.constant dense<0.000000e+00> : vector<1x8x8xf32>
    %767 = tpu.matmul %766, %749, %cst_292 {dimension_numbers = #tpu.dot_dimension_numbers<[2], [1], [1], [2], [0, 0, 0, 1, 1, 2], [0], [0]>} : vector<1x8x8xf32>, vector<1x8x8xf32>, vector<1x8x8xf32> -> vector<1x8x8xf32>
    %768 = tpu.concatenate %704, %725, %746, %767 in 2 : vector<1x8x8xf32>, vector<1x8x8xf32>, vector<1x8x8xf32>, vector<1x8x8xf32> -> vector<1x8x32xf32>
    %769 = vector.shape_cast %768 : vector<1x8x32xf32> to vector<8x32xf32>
    %c1_293 = arith.constant 1 : index
    %c0_294 = arith.constant 0 : index
    %c0_295 = arith.constant 0 : index
    %770 = vector.load %arg16[%c1_293, %c0_294, %c0_295] : memref<2x32x32xf32, #tpu.memory_space<vmem>>, vector<1x32x32xf32>
    %771 = vector.shape_cast %770 : vector<1x32x32xf32> to vector<32x32xf32>
    %c1_296 = arith.constant 1 : index
    %c0_297 = arith.constant 0 : index
    %c0_298 = arith.constant 0 : index
    %772 = vector.load %arg17[%c1_296, %c0_297, %c0_298] : memref<2x1x32xf32, #tpu.memory_space<vmem>>, vector<1x1x32xf32>
    %773 = vector.shape_cast %772 : vector<1x1x32xf32> to vector<1x32xf32>
    %cst_299 = arith.constant dense<0.000000e+00> : vector<8x32xf32>
    %774 = tpu.matmul %769, %771, %cst_299 {dimension_numbers = #tpu.dot_dimension_numbers<[1], [0], [0], [1], [0, 0, 1, 1], [], []>} : vector<8x32xf32>, vector<32x32xf32>, vector<8x32xf32> -> vector<8x32xf32>
    %775 = vector.broadcast %773 : vector<1x32xf32> to vector<8x32xf32>
    %776 = arith.addf %774, %775 : vector<8x32xf32>
    %777 = arith.addf %664, %776 : vector<8x32xf32>
    %778 = vector.extract_strided_slice %666 {offsets = [0, 0], sizes = [1, 32], strides = [1, 1]} : vector<6x32xf32> to vector<1x32xf32>
    %779 = vector.extract_strided_slice %666 {offsets = [1, 0], sizes = [1, 32], strides = [1, 1]} : vector<6x32xf32> to vector<1x32xf32>
    %cst_300 = arith.constant dense<0.000000e+00> : vector<8xf32>
    %780 = vector.multi_reduction <add>, %777, %cst_300 [1] : vector<8x32xf32> to vector<8xf32>
    %781 = vector.shape_cast %780 : vector<8xf32> to vector<8x1xf32>
    %cst_301 = arith.constant 3.200000e+01 : f32
    %782 = vector.broadcast %cst_301 : f32 to vector<8x1xf32>
    %783 = arith.divf %781, %782 : vector<8x1xf32>
    %784 = vector.broadcast %783 : vector<8x1xf32> to vector<8x32xf32>
    %785 = arith.subf %777, %784 : vector<8x32xf32>
    %786 = arith.mulf %785, %785 : vector<8x32xf32>
    %cst_302 = arith.constant dense<0.000000e+00> : vector<8xf32>
    %787 = vector.multi_reduction <add>, %786, %cst_302 [1] : vector<8x32xf32> to vector<8xf32>
    %788 = vector.shape_cast %787 : vector<8xf32> to vector<8x1xf32>
    %cst_303 = arith.constant 3.200000e+01 : f32
    %789 = vector.broadcast %cst_303 : f32 to vector<8x1xf32>
    %790 = arith.divf %788, %789 : vector<8x1xf32>
    %cst_304 = arith.constant 9.99999974E-6 : f32
    %791 = vector.broadcast %cst_304 : f32 to vector<8x1xf32>
    %792 = arith.addf %790, %791 : vector<8x1xf32>
    %793 = math.rsqrt %792 : vector<8x1xf32>
    %794 = vector.broadcast %793 : vector<8x1xf32> to vector<8x32xf32>
    %795 = arith.mulf %785, %794 : vector<8x32xf32>
    %796 = vector.broadcast %778 : vector<1x32xf32> to vector<8x32xf32>
    %797 = arith.mulf %795, %796 : vector<8x32xf32>
    %798 = vector.broadcast %779 : vector<1x32xf32> to vector<8x32xf32>
    %799 = arith.addf %797, %798 : vector<8x32xf32>
    %c1_305 = arith.constant 1 : index
    %c0_306 = arith.constant 0 : index
    %c0_307 = arith.constant 0 : index
    %800 = vector.load %arg18[%c1_305, %c0_306, %c0_307] : memref<2x32x32xf32, #tpu.memory_space<vmem>>, vector<1x32x32xf32>
    %801 = vector.shape_cast %800 : vector<1x32x32xf32> to vector<32x32xf32>
    %c1_308 = arith.constant 1 : index
    %c0_309 = arith.constant 0 : index
    %c0_310 = arith.constant 0 : index
    %802 = vector.load %arg19[%c1_308, %c0_309, %c0_310] : memref<2x1x32xf32, #tpu.memory_space<vmem>>, vector<1x1x32xf32>
    %803 = vector.shape_cast %802 : vector<1x1x32xf32> to vector<1x32xf32>
    %cst_311 = arith.constant dense<0.000000e+00> : vector<8x32xf32>
    %804 = tpu.matmul %799, %801, %cst_311 {dimension_numbers = #tpu.dot_dimension_numbers<[1], [0], [0], [1], [0, 0, 1, 1], [], []>} : vector<8x32xf32>, vector<32x32xf32>, vector<8x32xf32> -> vector<8x32xf32>
    %805 = vector.broadcast %803 : vector<1x32xf32> to vector<8x32xf32>
    %806 = arith.addf %804, %805 : vector<8x32xf32>
    %807 = vector.shape_cast %350 : vector<1x8x32xf32> to vector<8x32xf32>
    %c1_312 = arith.constant 1 : index
    %c0_313 = arith.constant 0 : index
    %c0_314 = arith.constant 0 : index
    %808 = vector.load %arg20[%c1_312, %c0_313, %c0_314] : memref<2x32x64xf32, #tpu.memory_space<vmem>>, vector<1x32x64xf32>
    %809 = vector.shape_cast %808 : vector<1x32x64xf32> to vector<32x64xf32>
    %c1_315 = arith.constant 1 : index
    %c0_316 = arith.constant 0 : index
    %c0_317 = arith.constant 0 : index
    %810 = vector.load %arg21[%c1_315, %c0_316, %c0_317] : memref<2x1x64xf32, #tpu.memory_space<vmem>>, vector<1x1x64xf32>
    %811 = vector.shape_cast %810 : vector<1x1x64xf32> to vector<1x64xf32>
    %cst_318 = arith.constant dense<0.000000e+00> : vector<8x64xf32>
    %812 = tpu.matmul %807, %809, %cst_318 {dimension_numbers = #tpu.dot_dimension_numbers<[1], [0], [0], [1], [0, 0, 1, 1], [], []>} : vector<8x32xf32>, vector<32x64xf32>, vector<8x64xf32> -> vector<8x64xf32>
    %813 = vector.broadcast %811 : vector<1x64xf32> to vector<8x64xf32>
    %814 = arith.addf %812, %813 : vector<8x64xf32>
    %815 = vector.shape_cast %806 : vector<8x32xf32> to vector<1x8x32xf32>
    %816 = vector.extract_strided_slice %814 {offsets = [0, 0], sizes = [8, 32], strides = [1, 1]} : vector<8x64xf32> to vector<8x32xf32>
    %817 = vector.shape_cast %816 : vector<8x32xf32> to vector<1x8x32xf32>
    %818 = vector.extract_strided_slice %814 {offsets = [0, 32], sizes = [8, 32], strides = [1, 1]} : vector<8x64xf32> to vector<8x32xf32>
    %819 = vector.shape_cast %818 : vector<8x32xf32> to vector<1x8x32xf32>
    %820 = vector.extract_strided_slice %815 {offsets = [0, 0, 0], sizes = [1, 8, 8], strides = [1, 1, 1]} : vector<1x8x32xf32> to vector<1x8x8xf32>
    %821 = vector.extract_strided_slice %817 {offsets = [0, 0, 0], sizes = [1, 8, 8], strides = [1, 1, 1]} : vector<1x8x32xf32> to vector<1x8x8xf32>
    %822 = vector.extract_strided_slice %819 {offsets = [0, 0, 0], sizes = [1, 8, 8], strides = [1, 1, 1]} : vector<1x8x32xf32> to vector<1x8x8xf32>
    %cst_319 = arith.constant dense<0.000000e+00> : vector<1x8x8xf32>
    %823 = tpu.matmul %820, %821, %cst_319 {dimension_numbers = #tpu.dot_dimension_numbers<[2], [2], [1], [1], [0, 0, 0, 1, 1, 1], [0], [0]>} : vector<1x8x8xf32>, vector<1x8x8xf32>, vector<1x8x8xf32> -> vector<1x8x8xf32>
    %cst_320 = arith.constant 0.353553385 : f32
    %824 = vector.broadcast %cst_320 : f32 to vector<1x8x8xf32>
    %825 = arith.mulf %823, %824 : vector<1x8x8xf32>
    %cst_321 = arith.constant -1.000000e+09 : f32
    %826 = vector.shape_cast %2 : vector<1x1x8xi1> to vector<1x1x8xi1>
    %827 = vector.broadcast %826 : vector<1x1x8xi1> to vector<1x8x8xi1>
    %828 = vector.broadcast %cst_321 : f32 to vector<1x8x8xf32>
    %829 = arith.select %827, %825, %828 : vector<1x8x8xi1>, vector<1x8x8xf32>
    %cst_322 = arith.constant dense<0xFF800000> : vector<1x8xf32>
    %830 = vector.multi_reduction <maximumf>, %829, %cst_322 [2] : vector<1x8x8xf32> to vector<1x8xf32>
    %831 = vector.shape_cast %830 : vector<1x8xf32> to vector<1x8x1xf32>
    %832 = vector.broadcast %831 : vector<1x8x1xf32> to vector<1x8x8xf32>
    %833 = arith.subf %829, %832 : vector<1x8x8xf32>
    %834 = math.exp %833 : vector<1x8x8xf32>
    %cst_323 = arith.constant dense<0.000000e+00> : vector<1x8xf32>
    %835 = vector.multi_reduction <add>, %834, %cst_323 [2] : vector<1x8x8xf32> to vector<1x8xf32>
    %836 = vector.shape_cast %835 : vector<1x8xf32> to vector<1x8x1xf32>
    %837 = tpu.reciprocal %836 {approx = true} : vector<1x8x1xf32> -> vector<1x8x1xf32>
    %838 = vector.broadcast %837 : vector<1x8x1xf32> to vector<1x8x8xf32>
    %839 = arith.mulf %834, %838 : vector<1x8x8xf32>
    %cst_324 = arith.constant dense<0.000000e+00> : vector<1x8x8xf32>
    %840 = tpu.matmul %839, %822, %cst_324 {dimension_numbers = #tpu.dot_dimension_numbers<[2], [1], [1], [2], [0, 0, 0, 1, 1, 2], [0], [0]>} : vector<1x8x8xf32>, vector<1x8x8xf32>, vector<1x8x8xf32> -> vector<1x8x8xf32>
    %841 = vector.extract_strided_slice %815 {offsets = [0, 0, 8], sizes = [1, 8, 8], strides = [1, 1, 1]} : vector<1x8x32xf32> to vector<1x8x8xf32>
    %842 = vector.extract_strided_slice %817 {offsets = [0, 0, 8], sizes = [1, 8, 8], strides = [1, 1, 1]} : vector<1x8x32xf32> to vector<1x8x8xf32>
    %843 = vector.extract_strided_slice %819 {offsets = [0, 0, 8], sizes = [1, 8, 8], strides = [1, 1, 1]} : vector<1x8x32xf32> to vector<1x8x8xf32>
    %cst_325 = arith.constant dense<0.000000e+00> : vector<1x8x8xf32>
    %844 = tpu.matmul %841, %842, %cst_325 {dimension_numbers = #tpu.dot_dimension_numbers<[2], [2], [1], [1], [0, 0, 0, 1, 1, 1], [0], [0]>} : vector<1x8x8xf32>, vector<1x8x8xf32>, vector<1x8x8xf32> -> vector<1x8x8xf32>
    %cst_326 = arith.constant 0.353553385 : f32
    %845 = vector.broadcast %cst_326 : f32 to vector<1x8x8xf32>
    %846 = arith.mulf %844, %845 : vector<1x8x8xf32>
    %cst_327 = arith.constant -1.000000e+09 : f32
    %847 = vector.shape_cast %2 : vector<1x1x8xi1> to vector<1x1x8xi1>
    %848 = vector.broadcast %847 : vector<1x1x8xi1> to vector<1x8x8xi1>
    %849 = vector.broadcast %cst_327 : f32 to vector<1x8x8xf32>
    %850 = arith.select %848, %846, %849 : vector<1x8x8xi1>, vector<1x8x8xf32>
    %cst_328 = arith.constant dense<0xFF800000> : vector<1x8xf32>
    %851 = vector.multi_reduction <maximumf>, %850, %cst_328 [2] : vector<1x8x8xf32> to vector<1x8xf32>
    %852 = vector.shape_cast %851 : vector<1x8xf32> to vector<1x8x1xf32>
    %853 = vector.broadcast %852 : vector<1x8x1xf32> to vector<1x8x8xf32>
    %854 = arith.subf %850, %853 : vector<1x8x8xf32>
    %855 = math.exp %854 : vector<1x8x8xf32>
    %cst_329 = arith.constant dense<0.000000e+00> : vector<1x8xf32>
    %856 = vector.multi_reduction <add>, %855, %cst_329 [2] : vector<1x8x8xf32> to vector<1x8xf32>
    %857 = vector.shape_cast %856 : vector<1x8xf32> to vector<1x8x1xf32>
    %858 = tpu.reciprocal %857 {approx = true} : vector<1x8x1xf32> -> vector<1x8x1xf32>
    %859 = vector.broadcast %858 : vector<1x8x1xf32> to vector<1x8x8xf32>
    %860 = arith.mulf %855, %859 : vector<1x8x8xf32>
    %cst_330 = arith.constant dense<0.000000e+00> : vector<1x8x8xf32>
    %861 = tpu.matmul %860, %843, %cst_330 {dimension_numbers = #tpu.dot_dimension_numbers<[2], [1], [1], [2], [0, 0, 0, 1, 1, 2], [0], [0]>} : vector<1x8x8xf32>, vector<1x8x8xf32>, vector<1x8x8xf32> -> vector<1x8x8xf32>
    %862 = vector.extract_strided_slice %815 {offsets = [0, 0, 16], sizes = [1, 8, 8], strides = [1, 1, 1]} : vector<1x8x32xf32> to vector<1x8x8xf32>
    %863 = vector.extract_strided_slice %817 {offsets = [0, 0, 16], sizes = [1, 8, 8], strides = [1, 1, 1]} : vector<1x8x32xf32> to vector<1x8x8xf32>
    %864 = vector.extract_strided_slice %819 {offsets = [0, 0, 16], sizes = [1, 8, 8], strides = [1, 1, 1]} : vector<1x8x32xf32> to vector<1x8x8xf32>
    %cst_331 = arith.constant dense<0.000000e+00> : vector<1x8x8xf32>
    %865 = tpu.matmul %862, %863, %cst_331 {dimension_numbers = #tpu.dot_dimension_numbers<[2], [2], [1], [1], [0, 0, 0, 1, 1, 1], [0], [0]>} : vector<1x8x8xf32>, vector<1x8x8xf32>, vector<1x8x8xf32> -> vector<1x8x8xf32>
    %cst_332 = arith.constant 0.353553385 : f32
    %866 = vector.broadcast %cst_332 : f32 to vector<1x8x8xf32>
    %867 = arith.mulf %865, %866 : vector<1x8x8xf32>
    %cst_333 = arith.constant -1.000000e+09 : f32
    %868 = vector.shape_cast %2 : vector<1x1x8xi1> to vector<1x1x8xi1>
    %869 = vector.broadcast %868 : vector<1x1x8xi1> to vector<1x8x8xi1>
    %870 = vector.broadcast %cst_333 : f32 to vector<1x8x8xf32>
    %871 = arith.select %869, %867, %870 : vector<1x8x8xi1>, vector<1x8x8xf32>
    %cst_334 = arith.constant dense<0xFF800000> : vector<1x8xf32>
    %872 = vector.multi_reduction <maximumf>, %871, %cst_334 [2] : vector<1x8x8xf32> to vector<1x8xf32>
    %873 = vector.shape_cast %872 : vector<1x8xf32> to vector<1x8x1xf32>
    %874 = vector.broadcast %873 : vector<1x8x1xf32> to vector<1x8x8xf32>
    %875 = arith.subf %871, %874 : vector<1x8x8xf32>
    %876 = math.exp %875 : vector<1x8x8xf32>
    %cst_335 = arith.constant dense<0.000000e+00> : vector<1x8xf32>
    %877 = vector.multi_reduction <add>, %876, %cst_335 [2] : vector<1x8x8xf32> to vector<1x8xf32>
    %878 = vector.shape_cast %877 : vector<1x8xf32> to vector<1x8x1xf32>
    %879 = tpu.reciprocal %878 {approx = true} : vector<1x8x1xf32> -> vector<1x8x1xf32>
    %880 = vector.broadcast %879 : vector<1x8x1xf32> to vector<1x8x8xf32>
    %881 = arith.mulf %876, %880 : vector<1x8x8xf32>
    %cst_336 = arith.constant dense<0.000000e+00> : vector<1x8x8xf32>
    %882 = tpu.matmul %881, %864, %cst_336 {dimension_numbers = #tpu.dot_dimension_numbers<[2], [1], [1], [2], [0, 0, 0, 1, 1, 2], [0], [0]>} : vector<1x8x8xf32>, vector<1x8x8xf32>, vector<1x8x8xf32> -> vector<1x8x8xf32>
    %883 = vector.extract_strided_slice %815 {offsets = [0, 0, 24], sizes = [1, 8, 8], strides = [1, 1, 1]} : vector<1x8x32xf32> to vector<1x8x8xf32>
    %884 = vector.extract_strided_slice %817 {offsets = [0, 0, 24], sizes = [1, 8, 8], strides = [1, 1, 1]} : vector<1x8x32xf32> to vector<1x8x8xf32>
    %885 = vector.extract_strided_slice %819 {offsets = [0, 0, 24], sizes = [1, 8, 8], strides = [1, 1, 1]} : vector<1x8x32xf32> to vector<1x8x8xf32>
    %cst_337 = arith.constant dense<0.000000e+00> : vector<1x8x8xf32>
    %886 = tpu.matmul %883, %884, %cst_337 {dimension_numbers = #tpu.dot_dimension_numbers<[2], [2], [1], [1], [0, 0, 0, 1, 1, 1], [0], [0]>} : vector<1x8x8xf32>, vector<1x8x8xf32>, vector<1x8x8xf32> -> vector<1x8x8xf32>
    %cst_338 = arith.constant 0.353553385 : f32
    %887 = vector.broadcast %cst_338 : f32 to vector<1x8x8xf32>
    %888 = arith.mulf %886, %887 : vector<1x8x8xf32>
    %cst_339 = arith.constant -1.000000e+09 : f32
    %889 = vector.shape_cast %2 : vector<1x1x8xi1> to vector<1x1x8xi1>
    %890 = vector.broadcast %889 : vector<1x1x8xi1> to vector<1x8x8xi1>
    %891 = vector.broadcast %cst_339 : f32 to vector<1x8x8xf32>
    %892 = arith.select %890, %888, %891 : vector<1x8x8xi1>, vector<1x8x8xf32>
    %cst_340 = arith.constant dense<0xFF800000> : vector<1x8xf32>
    %893 = vector.multi_reduction <maximumf>, %892, %cst_340 [2] : vector<1x8x8xf32> to vector<1x8xf32>
    %894 = vector.shape_cast %893 : vector<1x8xf32> to vector<1x8x1xf32>
    %895 = vector.broadcast %894 : vector<1x8x1xf32> to vector<1x8x8xf32>
    %896 = arith.subf %892, %895 : vector<1x8x8xf32>
    %897 = math.exp %896 : vector<1x8x8xf32>
    %cst_341 = arith.constant dense<0.000000e+00> : vector<1x8xf32>
    %898 = vector.multi_reduction <add>, %897, %cst_341 [2] : vector<1x8x8xf32> to vector<1x8xf32>
    %899 = vector.shape_cast %898 : vector<1x8xf32> to vector<1x8x1xf32>
    %900 = tpu.reciprocal %899 {approx = true} : vector<1x8x1xf32> -> vector<1x8x1xf32>
    %901 = vector.broadcast %900 : vector<1x8x1xf32> to vector<1x8x8xf32>
    %902 = arith.mulf %897, %901 : vector<1x8x8xf32>
    %cst_342 = arith.constant dense<0.000000e+00> : vector<1x8x8xf32>
    %903 = tpu.matmul %902, %885, %cst_342 {dimension_numbers = #tpu.dot_dimension_numbers<[2], [1], [1], [2], [0, 0, 0, 1, 1, 2], [0], [0]>} : vector<1x8x8xf32>, vector<1x8x8xf32>, vector<1x8x8xf32> -> vector<1x8x8xf32>
    %904 = tpu.concatenate %840, %861, %882, %903 in 2 : vector<1x8x8xf32>, vector<1x8x8xf32>, vector<1x8x8xf32>, vector<1x8x8xf32> -> vector<1x8x32xf32>
    %905 = vector.shape_cast %904 : vector<1x8x32xf32> to vector<8x32xf32>
    %c1_343 = arith.constant 1 : index
    %c0_344 = arith.constant 0 : index
    %c0_345 = arith.constant 0 : index
    %906 = vector.load %arg22[%c1_343, %c0_344, %c0_345] : memref<2x32x32xf32, #tpu.memory_space<vmem>>, vector<1x32x32xf32>
    %907 = vector.shape_cast %906 : vector<1x32x32xf32> to vector<32x32xf32>
    %c1_346 = arith.constant 1 : index
    %c0_347 = arith.constant 0 : index
    %c0_348 = arith.constant 0 : index
    %908 = vector.load %arg23[%c1_346, %c0_347, %c0_348] : memref<2x1x32xf32, #tpu.memory_space<vmem>>, vector<1x1x32xf32>
    %909 = vector.shape_cast %908 : vector<1x1x32xf32> to vector<1x32xf32>
    %cst_349 = arith.constant dense<0.000000e+00> : vector<8x32xf32>
    %910 = tpu.matmul %905, %907, %cst_349 {dimension_numbers = #tpu.dot_dimension_numbers<[1], [0], [0], [1], [0, 0, 1, 1], [], []>} : vector<8x32xf32>, vector<32x32xf32>, vector<8x32xf32> -> vector<8x32xf32>
    %911 = vector.broadcast %909 : vector<1x32xf32> to vector<8x32xf32>
    %912 = arith.addf %910, %911 : vector<8x32xf32>
    %913 = arith.addf %799, %912 : vector<8x32xf32>
    %914 = vector.extract_strided_slice %666 {offsets = [2, 0], sizes = [1, 32], strides = [1, 1]} : vector<6x32xf32> to vector<1x32xf32>
    %915 = vector.extract_strided_slice %666 {offsets = [3, 0], sizes = [1, 32], strides = [1, 1]} : vector<6x32xf32> to vector<1x32xf32>
    %cst_350 = arith.constant dense<0.000000e+00> : vector<8xf32>
    %916 = vector.multi_reduction <add>, %913, %cst_350 [1] : vector<8x32xf32> to vector<8xf32>
    %917 = vector.shape_cast %916 : vector<8xf32> to vector<8x1xf32>
    %cst_351 = arith.constant 3.200000e+01 : f32
    %918 = vector.broadcast %cst_351 : f32 to vector<8x1xf32>
    %919 = arith.divf %917, %918 : vector<8x1xf32>
    %920 = vector.broadcast %919 : vector<8x1xf32> to vector<8x32xf32>
    %921 = arith.subf %913, %920 : vector<8x32xf32>
    %922 = arith.mulf %921, %921 : vector<8x32xf32>
    %cst_352 = arith.constant dense<0.000000e+00> : vector<8xf32>
    %923 = vector.multi_reduction <add>, %922, %cst_352 [1] : vector<8x32xf32> to vector<8xf32>
    %924 = vector.shape_cast %923 : vector<8xf32> to vector<8x1xf32>
    %cst_353 = arith.constant 3.200000e+01 : f32
    %925 = vector.broadcast %cst_353 : f32 to vector<8x1xf32>
    %926 = arith.divf %924, %925 : vector<8x1xf32>
    %cst_354 = arith.constant 9.99999974E-6 : f32
    %927 = vector.broadcast %cst_354 : f32 to vector<8x1xf32>
    %928 = arith.addf %926, %927 : vector<8x1xf32>
    %929 = math.rsqrt %928 : vector<8x1xf32>
    %930 = vector.broadcast %929 : vector<8x1xf32> to vector<8x32xf32>
    %931 = arith.mulf %921, %930 : vector<8x32xf32>
    %932 = vector.broadcast %914 : vector<1x32xf32> to vector<8x32xf32>
    %933 = arith.mulf %931, %932 : vector<8x32xf32>
    %934 = vector.broadcast %915 : vector<1x32xf32> to vector<8x32xf32>
    %935 = arith.addf %933, %934 : vector<8x32xf32>
    %c1_355 = arith.constant 1 : index
    %c0_356 = arith.constant 0 : index
    %c0_357 = arith.constant 0 : index
    %936 = vector.load %arg24[%c1_355, %c0_356, %c0_357] : memref<2x32x64xf32, #tpu.memory_space<vmem>>, vector<1x32x64xf32>
    %937 = vector.shape_cast %936 : vector<1x32x64xf32> to vector<32x64xf32>
    %c1_358 = arith.constant 1 : index
    %c0_359 = arith.constant 0 : index
    %c0_360 = arith.constant 0 : index
    %938 = vector.load %arg25[%c1_358, %c0_359, %c0_360] : memref<2x1x64xf32, #tpu.memory_space<vmem>>, vector<1x1x64xf32>
    %939 = vector.shape_cast %938 : vector<1x1x64xf32> to vector<1x64xf32>
    %cst_361 = arith.constant dense<0.000000e+00> : vector<8x64xf32>
    %940 = tpu.matmul %935, %937, %cst_361 {dimension_numbers = #tpu.dot_dimension_numbers<[1], [0], [0], [1], [0, 0, 1, 1], [], []>} : vector<8x32xf32>, vector<32x64xf32>, vector<8x64xf32> -> vector<8x64xf32>
    %941 = vector.broadcast %939 : vector<1x64xf32> to vector<8x64xf32>
    %942 = arith.addf %940, %941 : vector<8x64xf32>
    %cst_362 = arith.constant 0.000000e+00 : f32
    %943 = vector.broadcast %cst_362 : f32 to vector<8x64xf32>
    %944 = arith.maximumf %942, %943 : vector<8x64xf32>
    %c1_363 = arith.constant 1 : index
    %c0_364 = arith.constant 0 : index
    %c0_365 = arith.constant 0 : index
    %945 = vector.load %arg26[%c1_363, %c0_364, %c0_365] : memref<2x64x32xf32, #tpu.memory_space<vmem>>, vector<1x64x32xf32>
    %946 = vector.shape_cast %945 : vector<1x64x32xf32> to vector<64x32xf32>
    %c1_366 = arith.constant 1 : index
    %c0_367 = arith.constant 0 : index
    %c0_368 = arith.constant 0 : index
    %947 = vector.load %arg27[%c1_366, %c0_367, %c0_368] : memref<2x1x32xf32, #tpu.memory_space<vmem>>, vector<1x1x32xf32>
    %948 = vector.shape_cast %947 : vector<1x1x32xf32> to vector<1x32xf32>
    %cst_369 = arith.constant dense<0.000000e+00> : vector<8x32xf32>
    %949 = tpu.matmul %944, %946, %cst_369 {dimension_numbers = #tpu.dot_dimension_numbers<[1], [0], [0], [1], [0, 0, 1, 1], [], []>} : vector<8x64xf32>, vector<64x32xf32>, vector<8x32xf32> -> vector<8x32xf32>
    %950 = vector.broadcast %948 : vector<1x32xf32> to vector<8x32xf32>
    %951 = arith.addf %949, %950 : vector<8x32xf32>
    %952 = arith.addf %935, %951 : vector<8x32xf32>
    %953 = vector.extract_strided_slice %666 {offsets = [4, 0], sizes = [1, 32], strides = [1, 1]} : vector<6x32xf32> to vector<1x32xf32>
    %954 = vector.extract_strided_slice %666 {offsets = [5, 0], sizes = [1, 32], strides = [1, 1]} : vector<6x32xf32> to vector<1x32xf32>
    %cst_370 = arith.constant dense<0.000000e+00> : vector<8xf32>
    %955 = vector.multi_reduction <add>, %952, %cst_370 [1] : vector<8x32xf32> to vector<8xf32>
    %956 = vector.shape_cast %955 : vector<8xf32> to vector<8x1xf32>
    %cst_371 = arith.constant 3.200000e+01 : f32
    %957 = vector.broadcast %cst_371 : f32 to vector<8x1xf32>
    %958 = arith.divf %956, %957 : vector<8x1xf32>
    %959 = vector.broadcast %958 : vector<8x1xf32> to vector<8x32xf32>
    %960 = arith.subf %952, %959 : vector<8x32xf32>
    %961 = arith.mulf %960, %960 : vector<8x32xf32>
    %cst_372 = arith.constant dense<0.000000e+00> : vector<8xf32>
    %962 = vector.multi_reduction <add>, %961, %cst_372 [1] : vector<8x32xf32> to vector<8xf32>
    %963 = vector.shape_cast %962 : vector<8xf32> to vector<8x1xf32>
    %cst_373 = arith.constant 3.200000e+01 : f32
    %964 = vector.broadcast %cst_373 : f32 to vector<8x1xf32>
    %965 = arith.divf %963, %964 : vector<8x1xf32>
    %cst_374 = arith.constant 9.99999974E-6 : f32
    %966 = vector.broadcast %cst_374 : f32 to vector<8x1xf32>
    %967 = arith.addf %965, %966 : vector<8x1xf32>
    %968 = math.rsqrt %967 : vector<8x1xf32>
    %969 = vector.broadcast %968 : vector<8x1xf32> to vector<8x32xf32>
    %970 = arith.mulf %960, %969 : vector<8x32xf32>
    %971 = vector.broadcast %953 : vector<1x32xf32> to vector<8x32xf32>
    %972 = arith.mulf %970, %971 : vector<8x32xf32>
    %973 = vector.broadcast %954 : vector<1x32xf32> to vector<8x32xf32>
    %974 = arith.addf %972, %973 : vector<8x32xf32>
    %975 = vector.shape_cast %974 : vector<8x32xf32> to vector<1x8x32xf32>
    %976 = vector.shape_cast %975 : vector<1x8x32xf32> to vector<8x32xf32>
    %c0_375 = arith.constant 0 : index
    %c0_376 = arith.constant 0 : index
    %977 = vector.load %arg29[%c0_375, %c0_376] : memref<32x128xf32, #tpu.memory_space<vmem>>, vector<32x128xf32>
    %c0_377 = arith.constant 0 : index
    %c0_378 = arith.constant 0 : index
    %978 = vector.load %arg30[%c0_377, %c0_378] : memref<1x128xf32, #tpu.memory_space<vmem>>, vector<1x128xf32>
    %cst_379 = arith.constant dense<0.000000e+00> : vector<8x128xf32>
    %979 = tpu.matmul %976, %977, %cst_379 {dimension_numbers = #tpu.dot_dimension_numbers<[1], [0], [0], [1], [0, 0, 1, 1], [], []>} : vector<8x32xf32>, vector<32x128xf32>, vector<8x128xf32> -> vector<8x128xf32>
    %980 = vector.broadcast %978 : vector<1x128xf32> to vector<8x128xf32>
    %981 = arith.addf %979, %980 : vector<8x128xf32>
    %982 = vector.shape_cast %981 : vector<8x128xf32> to vector<1x8x128xf32>
    %c0_380 = arith.constant 0 : index
    %c0_381 = arith.constant 0 : index
    %c0_382 = arith.constant 0 : index
    %983 = vector.load %arg31[%c0_380, %c0_381, %c0_382] : memref<1x8x128xf32, #tpu.memory_space<vmem>>, vector<1x8x128xf32>
    tpu.vector_store %arg31[%c0_380, %c0_381, %c0_382], %982 {strides = array<i32>} : memref<1x8x128xf32, #tpu.memory_space<vmem>>, vector<1x8x128xf32>,
    return
  }
  func.func @transform_0(%arg0: i32) -> (i32, i32, i32) {
    %c0_i32 = arith.constant 0 : i32
    %c0_i32_0 = arith.constant 0 : i32
    %c0_i32_1 = arith.constant 0 : i32
    return %arg0, %c0_i32, %c0_i32_0 : i32, i32, i32
  }
  func.func @transform_1(%arg0: i32) -> (i32, i32, i32) {
    %c0_i32 = arith.constant 0 : i32
    %c0_i32_0 = arith.constant 0 : i32
    %c0_i32_1 = arith.constant 0 : i32
    return %arg0, %c0_i32, %c0_i32_0 : i32, i32, i32
  }
  func.func @transform_2(%arg0: i32) -> (i32, i32, i32) {
    %c0_i32 = arith.constant 0 : i32
    %c0_i32_0 = arith.constant 0 : i32
    %c0_i32_1 = arith.constant 0 : i32
    return %arg0, %c0_i32, %c0_i32_0 : i32, i32, i32
  }
  func.func @transform_3(%arg0: i32) -> (i32, i32, i32) {
    %c0_i32 = arith.constant 0 : i32
    %c0_i32_0 = arith.constant 0 : i32
    %c0_i32_1 = arith.constant 0 : i32
    return %arg0, %c0_i32, %c0_i32_0 : i32, i32, i32
  }
  func.func @transform_4(%arg0: i32) -> (i32, i32, i32) {
    %c0_i32 = arith.constant 0 : i32
    %c0_i32_0 = arith.constant 0 : i32
    %c0_i32_1 = arith.constant 0 : i32
    %c0_i32_2 = arith.constant 0 : i32
    return %c0_i32, %c0_i32_0, %c0_i32_1 : i32, i32, i32
  }
  func.func @transform_5(%arg0: i32) -> (i32, i32, i32) {
    %c0_i32 = arith.constant 0 : i32
    %c0_i32_0 = arith.constant 0 : i32
    %c0_i32_1 = arith.constant 0 : i32
    %c0_i32_2 = arith.constant 0 : i32
    return %c0_i32, %c0_i32_0, %c0_i32_1 : i32, i32, i32
  }
  func.func @transform_6(%arg0: i32) -> (i32, i32, i32) {
    %c0_i32 = arith.constant 0 : i32
    %c0_i32_0 = arith.constant 0 : i32
    %c0_i32_1 = arith.constant 0 : i32
    %c0_i32_2 = arith.constant 0 : i32
    return %c0_i32, %c0_i32_0, %c0_i32_1 : i32, i32, i32
  }
  func.func @transform_7(%arg0: i32) -> (i32, i32, i32) {
    %c0_i32 = arith.constant 0 : i32
    %c0_i32_0 = arith.constant 0 : i32
    %c0_i32_1 = arith.constant 0 : i32
    %c0_i32_2 = arith.constant 0 : i32
    return %c0_i32, %c0_i32_0, %c0_i32_1 : i32, i32, i32
  }
  func.func @transform_8(%arg0: i32) -> (i32, i32, i32) {
    %c0_i32 = arith.constant 0 : i32
    %c0_i32_0 = arith.constant 0 : i32
    %c0_i32_1 = arith.constant 0 : i32
    %c0_i32_2 = arith.constant 0 : i32
    return %c0_i32, %c0_i32_0, %c0_i32_1 : i32, i32, i32
  }
  func.func @transform_9(%arg0: i32) -> (i32, i32, i32) {
    %c0_i32 = arith.constant 0 : i32
    %c0_i32_0 = arith.constant 0 : i32
    %c0_i32_1 = arith.constant 0 : i32
    %c0_i32_2 = arith.constant 0 : i32
    return %c0_i32, %c0_i32_0, %c0_i32_1 : i32, i32, i32
  }
  func.func @transform_10(%arg0: i32) -> (i32, i32, i32) {
    %c0_i32 = arith.constant 0 : i32
    %c0_i32_0 = arith.constant 0 : i32
    %c0_i32_1 = arith.constant 0 : i32
    %c0_i32_2 = arith.constant 0 : i32
    return %c0_i32, %c0_i32_0, %c0_i32_1 : i32, i32, i32
  }
  func.func @transform_11(%arg0: i32) -> (i32, i32, i32) {
    %c0_i32 = arith.constant 0 : i32
    %c0_i32_0 = arith.constant 0 : i32
    %c0_i32_1 = arith.constant 0 : i32
    %c0_i32_2 = arith.constant 0 : i32
    return %c0_i32, %c0_i32_0, %c0_i32_1 : i32, i32, i32
  }
  func.func @transform_12(%arg0: i32) -> (i32, i32, i32) {
    %c0_i32 = arith.constant 0 : i32
    %c0_i32_0 = arith.constant 0 : i32
    %c0_i32_1 = arith.constant 0 : i32
    %c0_i32_2 = arith.constant 0 : i32
    return %c0_i32, %c0_i32_0, %c0_i32_1 : i32, i32, i32
  }
  func.func @transform_13(%arg0: i32) -> (i32, i32, i32) {
    %c0_i32 = arith.constant 0 : i32
    %c0_i32_0 = arith.constant 0 : i32
    %c0_i32_1 = arith.constant 0 : i32
    %c0_i32_2 = arith.constant 0 : i32
    return %c0_i32, %c0_i32_0, %c0_i32_1 : i32, i32, i32
  }
  func.func @transform_14(%arg0: i32) -> (i32, i32, i32) {
    %c0_i32 = arith.constant 0 : i32
    %c0_i32_0 = arith.constant 0 : i32
    %c0_i32_1 = arith.constant 0 : i32
    %c0_i32_2 = arith.constant 0 : i32
    return %c0_i32, %c0_i32_0, %c0_i32_1 : i32, i32, i32
  }
  func.func @transform_15(%arg0: i32) -> (i32, i32, i32) {
    %c0_i32 = arith.constant 0 : i32
    %c0_i32_0 = arith.constant 0 : i32
    %c0_i32_1 = arith.constant 0 : i32
    %c0_i32_2 = arith.constant 0 : i32
    return %c0_i32, %c0_i32_0, %c0_i32_1 : i32, i32, i32
  }
  func.func @transform_16(%arg0: i32) -> (i32, i32, i32) {
    %c0_i32 = arith.constant 0 : i32
    %c0_i32_0 = arith.constant 0 : i32
    %c0_i32_1 = arith.constant 0 : i32
    %c0_i32_2 = arith.constant 0 : i32
    return %c0_i32, %c0_i32_0, %c0_i32_1 : i32, i32, i32
  }
  func.func @transform_17(%arg0: i32) -> (i32, i32, i32) {
    %c0_i32 = arith.constant 0 : i32
    %c0_i32_0 = arith.constant 0 : i32
    %c0_i32_1 = arith.constant 0 : i32
    %c0_i32_2 = arith.constant 0 : i32
    return %c0_i32, %c0_i32_0, %c0_i32_1 : i32, i32, i32
  }
  func.func @transform_18(%arg0: i32) -> (i32, i32, i32) {
    %c0_i32 = arith.constant 0 : i32
    %c0_i32_0 = arith.constant 0 : i32
    %c0_i32_1 = arith.constant 0 : i32
    %c0_i32_2 = arith.constant 0 : i32
    return %c0_i32, %c0_i32_0, %c0_i32_1 : i32, i32, i32
  }
  func.func @transform_19(%arg0: i32) -> (i32, i32, i32) {
    %c0_i32 = arith.constant 0 : i32
    %c0_i32_0 = arith.constant 0 : i32
    %c0_i32_1 = arith.constant 0 : i32
    %c0_i32_2 = arith.constant 0 : i32
    return %c0_i32, %c0_i32_0, %c0_i32_1 : i32, i32, i32
  }
  func.func @transform_20(%arg0: i32) -> (i32, i32, i32) {
    %c0_i32 = arith.constant 0 : i32
    %c0_i32_0 = arith.constant 0 : i32
    %c0_i32_1 = arith.constant 0 : i32
    %c0_i32_2 = arith.constant 0 : i32
    return %c0_i32, %c0_i32_0, %c0_i32_1 : i32, i32, i32
  }
  func.func @transform_21(%arg0: i32) -> (i32, i32, i32) {
    %c0_i32 = arith.constant 0 : i32
    %c0_i32_0 = arith.constant 0 : i32
    %c0_i32_1 = arith.constant 0 : i32
    %c0_i32_2 = arith.constant 0 : i32
    return %c0_i32, %c0_i32_0, %c0_i32_1 : i32, i32, i32
  }
  func.func @transform_22(%arg0: i32) -> (i32, i32, i32) {
    %c0_i32 = arith.constant 0 : i32
    %c0_i32_0 = arith.constant 0 : i32
    %c0_i32_1 = arith.constant 0 : i32
    %c0_i32_2 = arith.constant 0 : i32
    return %c0_i32, %c0_i32_0, %c0_i32_1 : i32, i32, i32
  }
  func.func @transform_23(%arg0: i32) -> (i32, i32, i32) {
    %c0_i32 = arith.constant 0 : i32
    %c0_i32_0 = arith.constant 0 : i32
    %c0_i32_1 = arith.constant 0 : i32
    %c0_i32_2 = arith.constant 0 : i32
    return %c0_i32, %c0_i32_0, %c0_i32_1 : i32, i32, i32
  }
  func.func @transform_24(%arg0: i32) -> (i32, i32, i32) {
    %c0_i32 = arith.constant 0 : i32
    %c0_i32_0 = arith.constant 0 : i32
    %c0_i32_1 = arith.constant 0 : i32
    %c0_i32_2 = arith.constant 0 : i32
    return %c0_i32, %c0_i32_0, %c0_i32_1 : i32, i32, i32
  }
  func.func @transform_25(%arg0: i32) -> (i32, i32, i32) {
    %c0_i32 = arith.constant 0 : i32
    %c0_i32_0 = arith.constant 0 : i32
    %c0_i32_1 = arith.constant 0 : i32
    %c0_i32_2 = arith.constant 0 : i32
    return %c0_i32, %c0_i32_0, %c0_i32_1 : i32, i32, i32
  }
  func.func @transform_26(%arg0: i32) -> (i32, i32, i32) {
    %c0_i32 = arith.constant 0 : i32
    %c0_i32_0 = arith.constant 0 : i32
    %c0_i32_1 = arith.constant 0 : i32
    %c0_i32_2 = arith.constant 0 : i32
    return %c0_i32, %c0_i32_0, %c0_i32_1 : i32, i32, i32
  }
  func.func @transform_27(%arg0: i32) -> (i32, i32, i32) {
    %c0_i32 = arith.constant 0 : i32
    %c0_i32_0 = arith.constant 0 : i32
    %c0_i32_1 = arith.constant 0 : i32
    %c0_i32_2 = arith.constant 0 : i32
    return %c0_i32, %c0_i32_0, %c0_i32_1 : i32, i32, i32
  }
  func.func @transform_28(%arg0: i32) -> (i32, i32) {
    %c0_i32 = arith.constant 0 : i32
    %c0_i32_0 = arith.constant 0 : i32
    %c0_i32_1 = arith.constant 0 : i32
    return %c0_i32, %c0_i32_0 : i32, i32
  }
  func.func @transform_29(%arg0: i32) -> (i32, i32) {
    %c0_i32 = arith.constant 0 : i32
    %c0_i32_0 = arith.constant 0 : i32
    %c0_i32_1 = arith.constant 0 : i32
    return %c0_i32, %c0_i32_0 : i32, i32
  }
  func.func @transform_30(%arg0: i32) -> (i32, i32, i32) {
    %c0_i32 = arith.constant 0 : i32
    %c0_i32_0 = arith.constant 0 : i32
    %c0_i32_1 = arith.constant 0 : i32
    return %arg0, %c0_i32, %c0_i32_0 : i32, i32, i32
  }
}

</mosaic_0001>

<bundles_post_ra>
// kernel: transformer_forward.1
= control target key start
LH: loop header
LB: loop body
LE: loop exit
PB: predicated region body
PF: predicated region fallthrough
CT: control target
= control target key end

     0   :  { %s8817_s6 = smov 1   ;;  %s8818_s10 = smov 2   ;;  %s10012_s0 = inlined_call_operand.smem [shape: u32[31], index: -1, kind: input, shape index: {}] }
   0x1   :  { %s8874_s5 = sld [smem:[%s10012_s0]]   ;;  %s8819_s14 = smov 3  }
   0x2   :  { %s8879_s9 = sld [smem:[%s10012_s0 + %s8817_s6]]   ;;  %s8820_s18 = smov 4  }
   0x3   :  { %s8884_s13 = sld [smem:[%s10012_s0 + %s8818_s10]]   ;;  %s8821_s22 = smov 5  }
   0x4   :  { %s8889_s17 = sld [smem:[%s10012_s0 + %s8819_s14]]   ;;  %s8822_s26 = smov 6  }
   0x5   :  { %s8894_s21 = sld [smem:[%s10012_s0 + %s8820_s18]]   ;;  %s8823_s30 = smov 7  }
   0x6   :  { %s8899_s25 = sld [smem:[%s10012_s0 + %s8821_s22]]   ;;  %s8824_s4 = smov 8  }
   0x7   :  { %10076 = sst [smem:[#allocation5_spill]] %s8874_s5  ;;  %s8825_s10 = smov 9  }
   0x8   :  { %10077 = sst [smem:[#allocation6_spill]] %s8879_s9  ;;  %s8826_s15 = smov 10  }
   0x9   :  { %10078 = sst [smem:[#allocation7_spill]] %s8884_s13  ;;  %s8827_s20 = smov 11  }
   0xa   :  { %10079 = sst [smem:[#allocation8_spill]] %s8889_s17  ;;  %s8829_s1 = smov 13  }
   0xb   :  { %10080 = sst [smem:[#allocation9_spill]] %s8894_s21  ;;  %s8830_s7 = smov 14  }
   0xc   :  { %10081 = sst [smem:[#allocation10_spill]] %s8899_s25  ;;  %s8832_s22 = smov 16  }
   0xd   :  { %s8904_s29 = sld [smem:[%s10012_s0 + %s8822_s26]]   ;;  %s8828_s26 = smov 12  }
   0xe   :  { %s8909_s3 = sld [smem:[%s10012_s0 + %s8823_s30]]   ;;  %s8833_s28 = smov 17  }
   0xf   :  { %s8914_s8 = sld [smem:[%s10012_s0 + %s8824_s4]]  }
  0x10   :  { %s8919_s14 = sld [smem:[%s10012_s0 + %s8825_s10]]  }
  0x11   :  { %s8924_s19 = sld [smem:[%s10012_s0 + %s8826_s15]]   ;;  %s8831_s15 = smov 15  }
  0x12   :  { %s8929_s24 = sld [smem:[%s10012_s0 + %s8827_s20]]  }
  0x13   :  { %10082 = sst [smem:[#allocation11_spill]] %s8904_s29 }
  0x14   :  { %10083 = sst [smem:[#allocation12_spill]] %s8909_s3 }
  0x15   :  { %10084 = sst [smem:[#allocation13_spill]] %s8914_s8 }
  0x16   :  { %10085 = sst [smem:[#allocation14_spill]] %s8919_s14 }
  0x17   :  { %10086 = sst [smem:[#allocation15_spill]] %s8924_s19 }
  0x18   :  { %10087 = sst [smem:[#allocation16_spill]] %s8929_s24 }
  0x19   :  { %s8934_s30 = sld [smem:[%s10012_s0 + %s8828_s26]]  }
  0x1a   :  { %s8939_s6 = sld [smem:[%s10012_s0 + %s8829_s1]]  }
  0x1b   :  { %s8944_s12 = sld [smem:[%s10012_s0 + %s8830_s7]]   ;;  %s8834_s7 = smov 18  }
  0x1c   :  { %s8949_s20 = sld [smem:[%s10012_s0 + %s8831_s15]]   ;;  %s8835_s15 = smov 19  }
  0x1d   :  { %s8954_s27 = sld [smem:[%s10012_s0 + %s8832_s22]]   ;;  %s8836_s22 = smov 20  }
  0x1e   :  { %s8959_s4 = sld [smem:[%s10012_s0 + %s8833_s28]]   ;;  %s8837_s28 = smov 21  }
  0x1f   :  { %10088 = sst [smem:[#allocation17_spill]] %s8934_s30 }
  0x21   :  { %10089 = sst [smem:[#allocation18_spill]] %s8944_s12 }
  0x22   :  { %10090 = sst [smem:[#allocation19_spill]] %s8949_s20 }
  0x23   :  { %10091 = sst [smem:[#allocation20_spill]] %s8954_s27 }
  0x24   :  { %10092 = sst [smem:[#allocation21_spill]] %s8959_s4 }
  0x25   :  { %s8964_s12 = sld [smem:[%s10012_s0 + %s8834_s7]]   ;;  %s8838_s7 = smov 22  }
  0x26   :  { %s8969_s20 = sld [smem:[%s10012_s0 + %s8835_s15]]   ;;  %s8839_s15 = smov 23  }
  0x27   :  { %s8974_s27 = sld [smem:[%s10012_s0 + %s8836_s22]]   ;;  %s8840_s22 = smov 24  }
  0x28   :  { %s8979_s4 = sld [smem:[%s10012_s0 + %s8837_s28]]   ;;  %s8841_s28 = smov 25  }
  0x2b   :  { %10093 = sst [smem:[#allocation22_spill]] %s8964_s12 }
  0x2c   :  { %10094 = sst [smem:[#allocation23_spill]] %s8969_s20 }
  0x2d   :  { %10095 = sst [smem:[#allocation24_spill]] %s8974_s27 }
  0x2e   :  { %10096 = sst [smem:[#allocation25_spill]] %s8979_s4 }
  0x2f   :  { %s8984_s12 = sld [smem:[%s10012_s0 + %s8838_s7]]   ;;  %s8842_s7 = smov 26  }
  0x30   :  { %s8989_s20 = sld [smem:[%s10012_s0 + %s8839_s15]]   ;;  %s8843_s15 = smov 27  }
  0x31   :  { %s8994_s27 = sld [smem:[%s10012_s0 + %s8840_s22]]   ;;  %s8844_s22 = smov 28  }
  0x32   :  { %s8999_s4 = sld [smem:[%s10012_s0 + %s8841_s28]]   ;;  %s8845_s28 = smov 29  }
  0x35   :  { %10097 = sst [smem:[#allocation26_spill]] %s8984_s12 }
  0x36   :  { %10098 = sst [smem:[#allocation27_spill]] %s8989_s20 }
  0x37   :  { %10099 = sst [smem:[#allocation28_spill]] %s8994_s27 }
  0x38   :  { %10100 = sst [smem:[#allocation29_spill]] %s8999_s4 }
  0x39   :  { %s9004_s12 = sld [smem:[%s10012_s0 + %s8842_s7]]   ;;  %s8846_s7 = smov 30  }
  0x3a   :  { %s9009_s20 = sld [smem:[%s10012_s0 + %s8843_s15]]  }
  0x3b   :  { %s9014_s27 = sld [smem:[%s10012_s0 + %s8844_s22]]  }
  0x3c   :  { %s9019_s4 = sld [smem:[%s10012_s0 + %s8845_s28]]  }
  0x3f   :  { %10101 = sst [smem:[#allocation30_spill]] %s9004_s12 }
  0x40   :  { %s9024_s12 = sld [smem:[%s10012_s0 + %s8846_s7]]  }
  0x41   :  { %10102 = sst [smem:[#allocation31_spill]] %s9014_s27 }
  0x42   :  { %10103 = sst [smem:[#allocation32_spill]] %s9019_s4 }
  0x46   :  { %10104 = sst [smem:[#allocation33_spill]] %s9024_s12 }
  0x47   :  { %66 = vsyncpa [#allocation3], 0 }
  0x48   :  { %68 = vsyncpa [#allocation3 + $0x1], 0  ;;  %s9026_s15 = smov 0   ;;  %s9028_s16 = smov 0  }
  0x49   :  { %s9030_s18 = smov 0   ;;  %s9032_s22 = smov 0  }
  0x4a LB: > { %s10105_s30 = sld [smem:[#allocation17_spill]]  ;;  %s10106_s24 = sld [smem:[#allocation16_spill]]  ;;  %s8803_s15 = sphi %s9026_s15, %s10177_s15   ;;  %s8815_s22 = sphi %s9032_s22, %s10174_s22   ;;  %s8811_s18 = sphi %s9030_s18, %s10176_s18   ;;  %s8807_s16 = sphi %s9028_s16, %s10178_s16  }
  0x4b   : > { %s10107_s19 = sld [smem:[#allocation15_spill]]  ;;  %s10108_s14 = sld [smem:[#allocation14_spill]] }
  0x4c   : > { %s10109_s29 = sld [smem:[#allocation11_spill]]  ;;  %s10110_s8 = sld [smem:[#allocation13_spill]] }
  0x4d   : > { %s10111_s3 = sld [smem:[#allocation12_spill]]  ;;  %s10112_s25 = sld [smem:[#allocation10_spill]] }
  0x4e   : > { %s10113_s21 = sld [smem:[#allocation9_spill]]  ;;  %10114 = sst [smem:[#allocation34_spill]] %s8803_s15 }
  0x4f   : > { %10115 = sst [smem:[#allocation35_spill]] %s8811_s18  ;;  %s9047_s0 = sadd.s32 4294967295, %s8815_s22  }
  0x50   : > { %10116 = sst [smem:[#allocation36_spill]] %s8815_s22  ;;  %s7442_s23 = sadd.s32 4294967294, %s8815_s22  }
  0x51   : > { %10117 = sst [smem:[#allocation37_spill]] %s9047_s0  ;;  %s9051_s26 = sadd.s32 1, %s8815_s22  }
  0x52   : > { %10118 = sst [smem:[#allocation38_spill]] %s9051_s26  ;;  %s731_s28 = sadd.s32 1, %s8811_s18 }
  0x53   : > { %s728_s1 = ssub.s32 %s8815_s22, %s9051_s26  ;;  %p741_p0 = scmp.ne.s32.totalorder %s8811_s18, %s8807_s16 }
  0x54   : > { %p729_p1 = scmp.eq.s32.totalorder %s728_s1, 0  ;;  %p742_p2 = scmp.eq.s32.totalorder %s9047_s0, 1 }
  0x55   : > { %p747_p3 = scmp.ne.s32.totalorder %s8807_s16, %s8803_s15  ;;  %p748_p4 = scmp.eq.s32.totalorder %s7442_s23, 1 }
  0x56   : > { %s9062_s2 = scalar_select %p729_p1, %s8811_s18, %s731_s28  }
  0x57   : > { %p9064_p5 = por %p742_p2, %p741_p0  ;;  %p9068_p6 = por %p748_p4, %p747_p3 }
  0x58   : > { %10119 = sst [smem:[#allocation39_spill]] %s9062_s2  ;;  %p7445_p7 = scmp.ge.s32.totalorder %s8815_s22, 1 }
  0x59   : > { %s10120_s7 = scalar_select %p9064_p5, 1, 0 }
  0x5a   : > { %s10122_s10 = scalar_select %p9068_p6, 1, 0 }
  0x5b   : > { %10121 = sst [smem:[#allocation40_spill]] %s10120_s7  ;;  %p870_p8 = scmp.lt.s32.totalorder %s8815_s22, 3 }
  0x5c   : > { %10123 = sst [smem:[#allocation41_spill]] %s10122_s10 }
  0x5d   : > { %p871_p9 = pnand %p7445_p7, %p870_p8 }
  0x5e   : > { %v977_v0 = vld [vmem:[%s10113_s21] sm:$0xff] (!%p871_p9)  ;;  %v978_v1 = vld [vmem:[%s10113_s21 + $0x8] sm:$0xff] (!%p871_p9)  ;;  %v979_v2 = vld [vmem:[%s10113_s21 + $0x10] sm:$0xff] (!%p871_p9)  ;;  %s10124_s5 = sld [smem:[#allocation5_spill]] (!%p871_p9)  ;;  %v8847_v3 = vmov (!%p871_p9), 0.0|0.0   ;;  %s10125_s17 = sld [smem:[#allocation8_spill]] (!%p871_p9)  ;;  %v1142_v21 = vlaneseq (!%p871_p9) }
  0x5f   : > { %874 = sbr.rel (%p871_p9) target bundleno = 13606 (0x3526), region = 140  ;;  %8388 = vmatprep.subr.bf16.mxu0 (!%p871_p9), %v8847_v3  ;;  %v8389_v4 = vpack.c.bf16 (!%p871_p9), %v978_v1, %v977_v0  ;;  %v980_v5 = vld [vmem:[%s10113_s21 + $0x18] sm:$0xff] (!%p871_p9)  ;;  %vm8848_vm0 = vmmov (!%p871_p9), 0   ;;  %v8849_v6 = vmov (!%p871_p9), 0.0   ;;  %p957_p10 = scmp.lt.s32.totalorder (!%p871_p9), %s9047_s0, 1  ;;  %vm988_vm1 = vcmask (!%p871_p9), 261120  }
  0x60   : > { %7871 = vmatprep.mubr.msk.f32.mxu0 (!%p871_p9), %vm8848_vm0, %v8849_v6  ;;  %7874 = vmatprep.subr.mxu1 (!%p871_p9), %v8849_v6  ;;  %v8392_v7 = vpack.c.bf16 (!%p871_p9), %v980_v5, %v979_v2  ;;  %v8850_v10 = vmov (!%p871_p9), 0   ;;  %v7449_v12 = vld [vmem:[%s10112_s25] ss:$0 sm:$0xff] (!%p871_p9)  ;;  %s10126_s13 = sld [smem:[#allocation7_spill]] (!%p871_p9)  ;;  %vm1065_vm3 = vcmask (!%p871_p9), 64512   ;;  %v9129_v23 = vshrl.u32 (!%p871_p9), %v1142_v21, 7 }
  0x61   : > { %7876 = vmatprep.mubr.msk.f32.mxu1 (!%p871_p9), %vm8848_vm0, %v8849_v6  ;;  %8390 = vmatpush3.bf16.msra.mxu0 (!%p871_p9), %v8389_v4  ;;  %vm1749_vm6 = vcmask (!%p871_p9), 130048   ;;  %vm1751_vm7 = vcmask (!%p871_p9), 195584   ;;  %vm1962_vm8 = vcmask (!%p871_p9), 523264   ;;  %s10137_s2 = smov (!%p871_p9), 40   ;;  %s10138_s18 = smov (!%p871_p9), 8  }
  0x62   : > { %8391 = vmatprep.subr.bf16.mxu0 (!%p871_p9), %v8847_v3  ;;  %v9132_v24 = vsub.s32 (!%p871_p9), 0, %v9129_v23  ;;  %s10139_s26 = smov (!%p871_p9), 16   ;;  %s10140_s10 = smov (!%p871_p9), 24  }
  0x63   : > { %s10141_s9 = sld [smem:[#allocation6_spill]] (!%p871_p9)  ;;  %s10154_s15 = sld [smem:[#allocation25_spill]] (!%p871_p9) }
  0x64   : > { %s10156_s22 = sld [smem:[#allocation26_spill]] (!%p871_p9)  ;;  %s10160_s4 = sld [smem:[#allocation29_spill]] (!%p871_p9) }
  0x65   : > { %8393 = vmatpush3.bf16.msra.mxu0 (!%p871_p9), %v8392_v7 }
  0x66   : > { %s9086_s11 = scalar_select %p957_p10, %s9047_s0, 1  ;;  %7894 = vmatprep.subr.mxu0 %v8849_v6 }
  0x68   : > { %s10026_s23 = sshll.u32 %s9086_s11, 3  ;;  %s970_s1 = scalar_lea.vmem %s10125_s17, %s9086_s11 }
  0x69   : > { %s960_s28 = scalar_lea.vmem %s10124_s5, %s10026_s23  ;;  %v973_v9 = vld [vmem:[%s970_s1] sm:$0x1]  ;;  %s10052_s1 = smov 96  }
  0x6a   : > { %v9095_v8 = vld [vmem:[%s960_s28] sm:$0xff]  ;;  %vm974_vm2 = vcmp.gt.f32.partialorder %v973_v9, 0.5  ;;  %s10027_s28 = smov 64   ;;  %s10054_s23 = smov 88  }
  0x6b   : > { %7872 = vmatmul.mubr.msk.f32.vlgmr.msra.gmra.mrb[0].mxu0 %vm988_vm1, %v9095_v8  ;;  %v9100_v11 = vsel %vm974_vm2, 1, %v8850_v10  ;;  %s10031_s5 = smov 120   ;;  %s10029_s17 = smov 80  }
  0x6c   : > { %7896 = vmatprep.mubr.msk.f32.mxu0 %vm8848_vm0, %v8849_v6  ;;  %s10155_s7 = smov %s10154_s15  ;;  %s10157_s12 = smov %s10156_s22 }
 0x13e   : > { %v1058_v13 = vpop.f32.mrb[0].mxu0 }
 0x13f   : > { %v9105_v14 = vadd.f32 %v7449_v12, %v1058_v13  ;;  %v7873_v15 = vpop.f32.mrb[1].mxu0 }
 0x141   : > { %1159 = vrot.lane.b32.xlu1 %v9105_v14, %s10027_s28  ;;  %1063 = vrot.lane.b32.xlu0 %v9105_v14, %s10052_s1  ;;  %s967_s28 = scalar_lea.vmem %s10126_s13, %s9086_s11  ;;  %s10132_s13 = smov 80  }
 0x142   : > { %v971_v22 = vld [vmem:[%s967_s28] sm:$0x1]  ;;  %s10033_s28 = smov 72  }
 0x143   : > { %vm972_vm4 = vcmp.gt.f32.partialorder %v971_v22, 0.5 }
 0x144   : > { %v1141_v25 = vsel %vm972_vm4, 1, %v8850_v10 }
 0x145   : > { %1237 = vrot.lane.b32.xlu1 %v9105_v14, %s10054_s23  ;;  %v1145_v26 = vrot.slane %v1141_v25, %v9132_v24 }
 0x147   : > { %vm9135_vm5 = vcmp.eq.s32.totalorder %v1145_v26, 1 }
 0x149   : > { %1235 = vrot.lane.b32.xlu1 %v9105_v14, %s10031_s5  ;;  %s10035_s5 = smov 104  }
 0x14d   : > { %1404 = vrot.lane.b32.xlu1 %v9105_v14, %s10029_s17  ;;  %s10037_s17 = smov 112  }
 0x1b3   : > { %v1160_v16 = vpop.permute.xlu1 %1159  ;;  %v1064_v17 = vpop.permute.xlu0 %1063 }
 0x1b4   : > { %7875 = vmatpush3.xpose.msk.msra.mxu1 %vm1065_vm3, %v1064_v17 }
 0x1b5   : > { %7879 = vmatprep.subr.mxu1 %v8849_v6 }
 0x1b7   : > { %v1238_v18 = vpop.permute.xlu1 %1237  ;;  %7877 = vmatmul.mubr.msk.f32.vlgmr.msra.gmra.mrb[0].mxu1 %vm1065_vm3, %v9105_v14 }
 0x1b8   : > { %7880 = vmatpush3.msra.mxu1 %v1160_v16  ;;  %7881 = vmatprep.mubr.msk.f32.mxu1 %vm8848_vm0, %v8849_v6 }
 0x1b9   : > { %7884 = vmatprep.subr.mxu1 %v8849_v6 }
 0x1bb   : > { %v1236_v19 = vpop.permute.xlu1 %1235 }
 0x1bf   : > { %v1405_v20 = vpop.permute.xlu1 %1404 }
 0x1c0   : > { %7895 = vmatpush3.xpose.msk.msra.mxu0 %vm1065_vm3, %v1405_v20 }
 0x1c1   : > { %7904 = vmatprep.subr.mxu0 %v8849_v6 }
 0x28a   : > { %v1136_v28 = vpop.f32.mrb[0].mxu1 }
 0x28b   : > { %v1140_v29 = vmul.f32 0.35355338, %v1136_v28  ;;  %v7878_v30 = vpop.f32.mrb[1].mxu1 }
 0x28d   : > { %v1147_v31 = vsel %vm9135_vm5, %v1140_v29, -1e+09 }
 0x28e   : > { %v1148_v32 = vsel %vm1065_vm3, %v1147_v31, -inf }
 0x28f   : > { %1149 = vmax.xlane.f32.xlu0 %v1148_v32  ;;  %v1753_v32 = vld [vmem:[%s10109_s29] sm:$0xff] }
 0x2a5   : > { %1571 = vrot.lane.b32.xlu0 %v9105_v14, %s10033_s28  ;;  %s10043_s28 = smov 56  }
 0x31c   : > { %v1150_v33 = vpop.xlane.xlu0 %1149 }
 0x31d   : > { %v1151_v34 = vsub.f32 %v1147_v31, %v1150_v33  ;;  %v1754_v33 = vld [vmem:[%s10109_s29 + $0x8] sm:$0xff] }
 0x31f   : > { %v1152_v35 = vmul.f32 1.442695, %v1151_v34  ;;  %v8395_v34 = vpack.c.bf16 %v1754_v33, %v1753_v32  ;;  %v7465_v33 = vld [vmem:[%s10108_s14] ss:$0 sm:$0xff] }
 0x320   : > { %v1572_v40 = vpop.permute.xlu0 %1571 }
 0x321   : > { %8637 = vpow2.f32 %v1152_v35  ;;  %v1755_v35 = vld [vmem:[%s10109_s29 + $0x10] sm:$0xff] }
 0x32b   : > { %v8638_v36 = vpop.eup %8637 }
 0x32c   : > { %v1154_v37 = vsel %vm1065_vm3, %v8638_v36, 0.0 }
 0x32d   : > { %1155 = vadd.xlane.f32.xlu1 %v1154_v37 }
 0x33e   : > { %1402 = vrot.lane.b32.xlu1 %v9105_v14, %s10037_s17  ;;  %s10039_s17 = smov 40  }
 0x342   : > { %1569 = vrot.lane.b32.xlu1 %v9105_v14, %s10035_s5  ;;  %s10041_s5 = smov 48  }
 0x3ba   : > { %v1156_v38 = vpop.xlane.xlu1 %1155 }
 0x3bb   : > { %8639 = vrcp.f32 %v1156_v38 }
 0x3be   : > { %v1403_v39 = vpop.permute.xlu1 %1402 }
 0x3bf   : > { %7897 = vmatmul.mubr.msk.f32.vlgmr.msra.gmra.mrb[2].mxu0 %vm1065_vm3, %v1403_v39 }
 0x3c0   : > { %7905 = vmatpush3.xpose.msk.msra.mxu0 %vm1065_vm3, %v1572_v40  ;;  %7906 = vmatprep.mubr.msk.f32.mxu0 %vm8848_vm0, %v8849_v6 }
 0x3c1   : > { %8394 = vmatprep.subr.bf16.mxu0 %v8847_v3 }
 0x3c2   : > { %v1570_v41 = vpop.permute.xlu1 %1569 }
 0x3c3   : > { %7907 = vmatmul.mubr.msk.f32.vlgmr.msra.gmra.mrb[4].mxu0 %vm1065_vm3, %v1570_v41 }
 0x3c4   : > { %7922 = vmatprep.mubr.msk.f32.mxu0 %vm8848_vm0, %v8849_v6  ;;  %8396 = vmatpush3.bf16.msra.mxu0 %v8395_v34 }
 0x3c5   : > { %v8640_v42 = vpop.eup %8639  ;;  %8397 = vmatprep.subr.bf16.mxu0 %v8847_v3 }
 0x3c6   : > { %v1158_v43 = vmul.f32 %v8640_v42, %v8638_v36  ;;  %v1756_v36 = vld [vmem:[%s10109_s29 + $0x18] sm:$0xff] }
 0x3c7   : > { %v8398_v37 = vpack.c.bf16 %v1756_v36, %v1755_v35 }
 0x3c8   : > { %7882 = vmatmul.mubr.msk.f32.vlgmr.msra.gmra.mrb[2].mxu1 %vm1065_vm3, %v1158_v43 }
 0x3c9   : > { %7885 = vmatpush3.xpose.msk.msra.mxu1 %vm1065_vm3, %v1238_v18  ;;  %7886 = vmatprep.mubr.msk.f32.mxu1 %vm8848_vm0, %v8849_v6 }
 0x3ca   : > { %7889 = vmatprep.subr.mxu1 %v8849_v6  ;;  %8399 = vmatpush3.bf16.msra.mxu0 %v8398_v37 }
 0x3cb   : > { %8406 = vmatprep.subr.bf16.mxu0 %v8847_v3 }
 0x3cc   : > { %7887 = vmatmul.mubr.msk.f32.vlgmr.msra.gmra.mrb[4].mxu1 %vm1065_vm3, %v1236_v19 }
 0x3cd   : > { %7891 = vmatprep.mubr.msk.f32.mxu1 %vm8848_vm0, %v8849_v6 }
 0x492   : > { %v1476_v44 = vpop.f32.mrb[2].mxu0 }
 0x493   : > { %v1480_v45 = vmul.f32 0.35355338, %v1476_v44  ;;  %v7898_v46 = vpop.f32.mrb[3].mxu0 }
 0x495   : > { %v1481_v47 = vsel %vm9135_vm5, %v1480_v45, -1e+09 }
 0x496   : > { %v1643_v48 = vpop.f32.mrb[4].mxu0  ;;  %v1482_v49 = vsel %vm1065_vm3, %v1481_v47, -inf }
 0x497   : > { %1483 = vmax.xlane.f32.xlu0 %v1482_v49  ;;  %v7908_v50 = vpop.f32.mrb[5].mxu0  ;;  %v1647_v54 = vmul.f32 0.35355338, %v1643_v48 }
 0x498   : > { %v7463_v50 = vld [vmem:[%s10111_s3] ss:$0 sm:$0xff] }
 0x499   : > { %v1648_v59 = vsel %vm9135_vm5, %v1647_v54, -1e+09 }
 0x49a   : > { %v1649_v60 = vsel %vm1065_vm3, %v1648_v59, -inf }
 0x49b   : > { %v9168_v51 = vpop.f32.mrb[2].mxu1 }
 0x49c   : > { %v7883_v52 = vpop.f32.mrb[3].mxu1 }
 0x49f   : > { %v1309_v53 = vpop.f32.mrb[4].mxu1 }
 0x4a0   : > { %v1313_v55 = vmul.f32 0.35355338, %v1309_v53  ;;  %v7888_v56 = vpop.f32.mrb[5].mxu1 }
 0x4a2   : > { %v1314_v57 = vsel %vm9135_vm5, %v1313_v55, -1e+09 }
 0x4a3   : > { %v1315_v58 = vsel %vm1065_vm3, %v1314_v57, -inf }
 0x4a4   : > { %1316 = vmax.xlane.f32.xlu1 %v1315_v58 }
 0x4a8   : > { %1650 = vmax.xlane.f32.xlu1 %v1649_v60 }
 0x524   : > { %v1484_v61 = vpop.xlane.xlu0 %1483 }
 0x525   : > { %v1485_v62 = vsub.f32 %v1481_v47, %v1484_v61  ;;  %v1862_v61 = vld [vmem:[%s10110_s8] sm:$0xff] }
 0x527   : > { %v1486_v63 = vmul.f32 1.442695, %v1485_v62  ;;  %v1863_v62 = vld [vmem:[%s10110_s8 + $0x8] sm:$0xff] }
 0x529   : > { %8641 = vpow2.f32 %v1486_v63  ;;  %v8401_v63 = vpack.c.bf16 %v1863_v62, %v1862_v61 }
 0x531   : > { %v1317_v0 = vpop.xlane.xlu1 %1316 }
 0x532   : > { %v1318_v12 = vsub.f32 %v1314_v57, %v1317_v0  ;;  %v1865_v0 = vld [vmem:[%s10110_s8 + $0x18] sm:$0xff] }
 0x533   : > { %v8642_v1 = vpop.eup %8641 }
 0x534   : > { %v1488_v2 = vsel %vm1065_vm3, %v8642_v1, 0.0  ;;  %v1319_v13 = vmul.f32 1.442695, %v1318_v12  ;;  %v1951_v12 = vld [vmem:[%s10107_s19 + $0x20] sm:$0xff] }
 0x535   : > { %1489 = vadd.xlane.f32.xlu1 %v1488_v2  ;;  %v1651_v4 = vpop.xlane.xlu1 %1650  ;;  %v1947_v2 = vld [vmem:[%s10107_s19] sm:$0xff] }
 0x536   : > { %v1652_v5 = vsub.f32 %v1648_v59, %v1651_v4  ;;  %v1948_v4 = vld [vmem:[%s10107_s19 + $0x8] sm:$0xff] }
 0x538   : > { %v1653_v7 = vmul.f32 1.442695, %v1652_v5  ;;  %v1949_v5 = vld [vmem:[%s10107_s19 + $0x10] sm:$0xff] }
 0x53a   : > { %8643 = vpow2.f32 %v1653_v7  ;;  %v8407_v7 = vpack.c.bf16 %v1948_v4, %v1947_v2 }
 0x53b   : > { %8645 = vpow2.f32 %v1319_v13  ;;  %v1952_v13 = vld [vmem:[%s10107_s19 + $0x28] sm:$0xff] }
 0x544   : > { %v8644_v9 = vpop.eup %8643 }
 0x545   : > { %v1655_v10 = vsel %vm1065_vm3, %v8644_v9, 0.0  ;;  %v8646_v15 = vpop.eup %8645 }
 0x546   : > { %1326 = vrot.lane.b32.xlu1 %v9105_v14, %s10043_s28  ;;  %1656 = vadd.xlane.f32.xlu0 %v1655_v10  ;;  %v1321_v16 = vsel %vm1065_vm3, %v8646_v15, 0.0  ;;  %s10045_s28 = smov 24  }
 0x55c   : > { %1493 = vrot.lane.b32.xlu0 %v9105_v14, %s10041_s5  ;;  %s10047_s5 = smov 16  }
 0x56a   : > { %1322 = vadd.xlane.f32.xlu1 %v1321_v16 }
 0x57b   : > { %1660 = vrot.lane.b32.xlu1 %v9105_v14, %s10039_s17  ;;  %s10049_s17 = smov 8  }
 0x5c2   : > { %v1490_v17 = vpop.xlane.xlu1 %1489 }
 0x5c6   : > { %v1327_v18 = vpop.permute.xlu1 %1326 }
 0x5c7   : > { %7890 = vmatpush3.msra.mxu1 %v1327_v18 }
 0x5c8   : > { %7899 = vmatprep.subr.mxu1 %v8849_v6 }
 0x5d3   : > { %v1657_v20 = vpop.xlane.xlu0 %1656 }
 0x5d7   : > { %v1494_v28 = vpop.permute.xlu0 %1493 }
 0x5f7   : > { %v1323_v19 = vpop.xlane.xlu1 %1322 }
 0x5f8   : > { %8647 = vrcp.f32 %v1323_v19  ;;  %v976_v19 = vld [vmem:[%s10105_s30] sm:$0xf] }
 0x5f9   : > { %8649 = vrcp.f32 %v1490_v17 }
 0x5fa   : > { %8651 = vrcp.f32 %v1657_v20  ;;  %v9234_v20 = vsub.s32 1, %v9129_v23 }
 0x5fb   : > { %v1661_v30 = vpop.permute.xlu1 %1660 }
 0x602   : > { %v8648_v22 = vpop.eup %8647 }
 0x603   : > { %v1325_v25 = vmul.f32 %v8648_v22, %v8646_v15  ;;  %v8650_v26 = vpop.eup %8649  ;;  %v8413_v15 = vpack.c.bf16 %v1952_v13, %v1951_v12  ;;  %v1855_v22 = vrot.slane %v976_v19, %v9132_v24 }
 0x604   : > { %v1492_v14 = vmul.f32 %v8650_v26, %v8642_v1  ;;  %v8652_v29 = vpop.eup %8651 }
 0x605   : > { %7892 = vmatmul.mubr.msk.f32.vlgmr.msra.gmra.mrb[6].mxu1 %vm1065_vm3, %v1325_v25  ;;  %v1659_v31 = vmul.f32 %v8652_v29, %v8644_v9  ;;  %v1950_v9 = vld [vmem:[%s10107_s19 + $0x18] sm:$0xff] }
 0x606   : > { %7900 = vmatpush3.msra.mxu1 %v1494_v28  ;;  %7901 = vmatprep.mubr.msk.f32.mxu1 %vm8848_vm0, %v8849_v6  ;;  %v8410_v10 = vpack.c.bf16 %v1950_v9, %v1949_v5  ;;  %v1860_v28 = vrot.slane %v976_v19, %v9234_v20 }
 0x607   : > { %7909 = vmatprep.subr.mxu1 %v8849_v6 }
 0x609   : > { %7902 = vmatmul.mubr.msk.f32.vlgmr.msra.gmra.mrb[8].mxu1 %vm1065_vm3, %v1492_v14 }
 0x60a   : > { %7910 = vmatpush3.msra.mxu1 %v1661_v30  ;;  %7911 = vmatprep.mubr.msk.f32.mxu1 %vm8848_vm0, %v8849_v6  ;;  %v1953_v30 = vld [vmem:[%s10107_s19 + $0x30] sm:$0xff] }
 0x60b   : > { %8400 = vmatprep.subr.bf16.mxu1 %v8847_v3 }
 0x60d   : > { %7912 = vmatmul.mubr.msk.f32.vlgmr.msra.gmra.mrb[10].mxu1 %vm1065_vm3, %v1659_v31  ;;  %v1954_v31 = vld [vmem:[%s10107_s19 + $0x38] sm:$0xff] }
 0x60e   : > { %7933 = vmatprep.mubr.msk.f32.mxu1 %vm8848_vm0, %v8849_v6  ;;  %8402 = vmatpush3.bf16.msra.mxu1 %v8401_v63  ;;  %v8416_v32 = vpack.c.bf16 %v1954_v31, %v1953_v30 }
 0x60f   : > { %8403 = vmatprep.subr.bf16.mxu1 %v8847_v3 }
 0x6d8   : > { %v1398_v38 = vpop.f32.mrb[6].mxu1 }
 0x6d9   : > { %1737 = vrot.lane.b32.xlu1 %v1398_v38, %s10049_s17  ;;  %v7893_v39 = vpop.f32.mrb[7].mxu1  ;;  %v7467_v38 = vld [vmem:[%s10106_s24] ss:$0 sm:$0xff]  ;;  %s10131_s17 = smov 104  }
 0x6dc   : > { %v1565_v40 = vpop.f32.mrb[8].mxu1 }
 0x6dd   : > { %1741 = vrot.lane.b32.xlu0 %v1565_v40, %s10047_s5  ;;  %v7903_v41 = vpop.f32.mrb[9].mxu1  ;;  %s10130_s5 = smov 120  }
 0x6e0   : > { %v1732_v42 = vpop.f32.mrb[10].mxu1 }
 0x6e1   : > { %1745 = vrot.lane.b32.xlu1 %v1732_v42, %s10045_s28  ;;  %v7913_v43 = vpop.f32.mrb[11].mxu1  ;;  %s10129_s28 = smov 112  }
 0x74b   : > { %v1738_v44 = vpop.permute.xlu1 %1737 }
 0x74c   : > { %v1748_v46 = vsel %vm1065_vm3, %v9168_v51, %v1738_v44 }
 0x74f   : > { %v1742_v45 = vpop.permute.xlu0 %1741 }
 0x750   : > { %v1750_v47 = vsel %vm1749_vm6, %v1748_v46, %v1742_v45 }
 0x753   : > { %v1746_v48 = vpop.permute.xlu1 %1745 }
 0x754   : > { %v1752_v49 = vsel %vm1751_vm7, %v1750_v47, %v1746_v48 }
 0x755   : > { %7923 = vmatmul.mubr.msk.f32.vlgmr.msra.gmra.mrb[6].mxu0 %vm988_vm1, %v1752_v49  ;;  %v7470_v49 = vld [vmem:[%s10113_s21 + $0x20] sm:$0xff] }
 0x756   : > { %7952 = vmatprep.mubr.msk.f32.mxu0 %vm8848_vm0, %v8849_v6  ;;  %8408 = vmatpush3.bf16.msra.mxu0 %v8407_v7 }
 0x757   : > { %8409 = vmatprep.subr.bf16.mxu0 %v8847_v3 }
 0x75a   : > { %8411 = vmatpush3.bf16.msra.mxu0 %v8410_v10 }
 0x75b   : > { %8412 = vmatprep.subr.bf16.mxu0 %v8847_v3 }
 0x75e   : > { %8414 = vmatpush3.bf16.msra.mxu0 %v8413_v15 }
 0x75f   : > { %8415 = vmatprep.subr.bf16.mxu0 %v8847_v3 }
 0x762   : > { %8417 = vmatpush3.bf16.msra.mxu0 %v8416_v32 }
 0x763   : > { %7976 = vmatprep.subr.mxu0 %v8849_v6 }
 0x828   : > { %v1833_v52 = vpop.f32.mrb[6].mxu0 }
 0x829   : > { %v1834_v53 = vadd.f32 %v7463_v50, %v1833_v52  ;;  %v7924_v54 = vpop.f32.mrb[7].mxu0  ;;  %v7471_v50 = vld [vmem:[%s10113_s21 + $0x28] sm:$0xff] }
 0x82a   : > { %v8419_v52 = vpack.c.bf16 %v7471_v50, %v7470_v49  ;;  %v7473_v54 = vld [vmem:[%s10113_s21 + $0x38] sm:$0xff] }
 0x82b   : > { %v1837_v51 = vadd.f32 %v1834_v53, %v9095_v8  ;;  %v1864_v8 = vld [vmem:[%s10110_s8 + $0x10] sm:$0xff] }
 0x82c   : > { %v8404_v1 = vpack.c.bf16 %v1865_v0, %v1864_v8  ;;  %v7472_v53 = vld [vmem:[%s10113_s21 + $0x30] sm:$0xff]  ;;  %s10133_s21 = smov 72  }
 0x82d   : > { %v1838_v55 = vsel %vm988_vm1, %v1837_v51, 0.0 }
 0x82e   : > { %1839 = vadd.xlane.f32.xlu0 %v1838_v55  ;;  %8405 = vmatpush3.bf16.msra.mxu1 %v8404_v1  ;;  %v7475_v1 = vld [vmem:[%s10112_s25 + $0x1] ss:$0 sm:$0xff]  ;;  %s10136_s25 = smov 48  }
 0x82f   : > { %8418 = vmatprep.subr.bf16.mxu1 %v8847_v3 }
 0x8bb   : > { %v1840_v56 = vpop.xlane.xlu0 %1839 }
 0x8bc   : > { %v1842_v57 = vmul.f32 0.03125, %v1840_v56 }
 0x8be   : > { %v1843_v58 = vsub.f32 %v1837_v51, %v1842_v57  ;;  %v8422_v51 = vpack.c.bf16 %v7473_v54, %v7472_v53 }
 0x8c0   : > { %v1844_v59 = vmul.f32 %v1843_v58, %v1843_v58 }
 0x8c2   : > { %v1845_v60 = vsel %vm988_vm1, %v1844_v59, 0.0  ;;  %v9261_v59 = vsub.s32 3, %v9129_v23 }
 0x8c3   : > { %1846 = vadd.xlane.f32.xlu1 %v1845_v60 }
 0x8c4   : > { %v2058_v63 = vrot.slane %v976_v19, %v9261_v59 }
 0x950   : > { %v1847_v16 = vpop.xlane.xlu1 %1846 }
 0x951   : > { %v1848_v17 = vmul.f32 0.03125, %v1847_v16 }
 0x953   : > { %v1849_v18 = vadd.f32 1e-05, %v1848_v17 }
 0x955   : > { %8653 = vrsqrt.f32 %v1849_v18 }
 0x95f   : > { %v8654_v25 = vpop.eup %8653 }
 0x960   : > { %v1851_v26 = vmul.f32 %v8654_v25, %v1843_v58  ;;  %v9258_v58 = vsub.s32 2, %v9129_v23 }
 0x962   : > { %v1856_v14 = vmul.f32 %v1855_v22, %v1851_v26  ;;  %v2053_v60 = vrot.slane %v976_v19, %v9258_v58 }
 0x964   : > { %v1861_v29 = vadd.f32 %v1860_v28, %v1856_v14 }
 0x966   : > { %7934 = vmatmul.mubr.msk.f32.vlgmr.msra.gmra.mrb[12].mxu1 %vm988_vm1, %v1861_v29 }
 0x967   : > { %7963 = vmatprep.mubr.msk.f32.mxu1 %vm8848_vm0, %v8849_v6  ;;  %8420 = vmatpush3.bf16.msra.mxu1 %v8419_v52 }
 0x968   : > { %8421 = vmatprep.subr.bf16.mxu1 %v8847_v3 }
 0x96b   : > { %8423 = vmatpush3.bf16.msra.mxu1 %v8422_v51 }
 0x96c   : > { %7966 = vmatprep.subr.mxu1 %v8849_v6 }
 0xa39   : > { %v1942_v34 = vpop.f32.mrb[12].mxu1 }
 0xa3a   : > { %v1943_v35 = vadd.f32 %v7465_v33, %v1942_v34  ;;  %v7935_v36 = vpop.f32.mrb[13].mxu1 }
 0xa3c   : > { %v1946_v37 = vmax.f32 %v1943_v35, 0.0 }
 0xa3e   : > { %7953 = vmatmul.mubr.msk.f32.vlgmr.msra.gmra.mrb[8].mxu0 %vm1962_vm8, %v1946_v37 }
 0xa3f   : > { %7978 = vmatprep.mubr.msk.f32.mxu0 %vm8848_vm0, %v8849_v6 }
 0xb11   : > { %v2032_v39 = vpop.f32.mrb[8].mxu0 }
 0xb12   : > { %v2033_v40 = vadd.f32 %v7467_v38, %v2032_v39  ;;  %v7954_v41 = vpop.f32.mrb[9].mxu0 }
 0xb14   : > { %v2036_v42 = vadd.f32 %v2033_v40, %v1861_v29 }
 0xb16   : > { %v2037_v43 = vsel %vm988_vm1, %v2036_v42, 0.0 }
 0xb17   : > { %2038 = vadd.xlane.f32.xlu0 %v2037_v43 }
 0xba4   : > { %v2039_v44 = vpop.xlane.xlu0 %2038 }
 0xba5   : > { %v2040_v45 = vmul.f32 0.03125, %v2039_v44 }
 0xba7   : > { %v2041_v46 = vsub.f32 %v2036_v42, %v2040_v45 }
 0xba9   : > { %v2042_v47 = vmul.f32 %v2041_v46, %v2041_v46 }
 0xbab   : > { %v2043_v48 = vsel %vm988_vm1, %v2042_v47, 0.0 }
 0xbac   : > { %2044 = vadd.xlane.f32.xlu0 %v2043_v48 }
 0xc39   : > { %v2045_v55 = vpop.xlane.xlu0 %2044 }
 0xc3a   : > { %v2046_v56 = vmul.f32 0.03125, %v2045_v55 }
 0xc3c   : > { %v2047_v57 = vadd.f32 1e-05, %v2046_v56 }
 0xc3e   : > { %8655 = vrsqrt.f32 %v2047_v57 }
 0xc48   : > { %v8656_v61 = vpop.eup %8655 }
 0xc49   : > { %v2049_v62 = vmul.f32 %v8656_v61, %v2041_v46 }
 0xc4b   : > { %v2054_v8 = vmul.f32 %v2053_v60, %v2049_v62 }
 0xc4d   : > { %v9265_v0 = vadd.f32 %v2058_v63, %v2054_v8 }
 0xc4f   : > { %7964 = vmatmul.mubr.msk.f32.vlgmr.msra.gmra.mrb[14].mxu1 %vm988_vm1, %v9265_v0 }
 0xc50   : > { %7968 = vmatprep.mubr.msk.f32.mxu1 %vm8848_vm0, %v8849_v6 }
 0xd22   : > { %v2144_v2 = vpop.f32.mrb[14].mxu1 }
 0xd23   : > { %v9272_v4 = vadd.f32 %v7475_v1, %v2144_v2  ;;  %v7965_v5 = vpop.f32.mrb[15].mxu1 }
 0xd25   : > { %2316 = vrot.lane.b32.xlu0 %v9272_v4, %s10054_s23  ;;  %2149 = vrot.lane.b32.xlu1 %v9272_v4, %s10052_s1  ;;  %s10134_s1 = smov 56   ;;  %s10135_s23 = smov 64  }
 0xd29   : > { %2481 = vrot.lane.b32.xlu0 %v9272_v4, %s10129_s28  ;;  %2314 = vrot.lane.b32.xlu1 %v9272_v4, %s10130_s5 }
 0xd2d   : > { %2648 = vrot.lane.b32.xlu0 %v9272_v4, %s10131_s17  ;;  %2483 = vrot.lane.b32.xlu1 %v9272_v4, %s10132_s13 }
 0xd31   : > { %2650 = vrot.lane.b32.xlu1 %v9272_v4, %s10133_s21 }
 0xd97   : > { %v2317_v7 = vpop.permute.xlu0 %2316  ;;  %v2150_v9 = vpop.permute.xlu1 %2149 }
 0xd98   : > { %7967 = vmatpush3.xpose.msk.msra.mxu1 %vm1065_vm3, %v2150_v9  ;;  %7977 = vmatpush3.xpose.msk.msra.mxu0 %vm1065_vm3, %v2317_v7 }
 0xd99   : > { %7986 = vmatprep.subr.mxu0 %v8849_v6  ;;  %7971 = vmatprep.subr.mxu1 %v8849_v6 }
 0xd9b   : > { %7969 = vmatmul.mubr.msk.f32.vlgmr.msra.gmra.mrb[16].mxu1 %vm1065_vm3, %v9272_v4  ;;  %v2315_v10 = vpop.permute.xlu1 %2314  ;;  %v2482_v13 = vpop.permute.xlu0 %2481 }
 0xd9c   : > { %7979 = vmatmul.mubr.msk.f32.vlgmr.msra.gmra.mrb[10].mxu0 %vm1065_vm3, %v2315_v10  ;;  %7973 = vmatprep.mubr.msk.f32.mxu1 %vm8848_vm0, %v8849_v6 }
 0xd9d   : > { %7988 = vmatprep.mubr.msk.f32.mxu0 %vm8848_vm0, %v8849_v6 }
 0xd9f   : > { %v2484_v12 = vpop.permute.xlu1 %2483  ;;  %v2649_v16 = vpop.permute.xlu0 %2648 }
 0xda0   : > { %7987 = vmatpush3.xpose.msk.msra.mxu0 %vm1065_vm3, %v2484_v12 }
 0xda1   : > { %7996 = vmatprep.subr.mxu0 %v8849_v6 }
 0xda3   : > { %7989 = vmatmul.mubr.msk.f32.vlgmr.msra.gmra.mrb[12].mxu0 %vm1065_vm3, %v2482_v13  ;;  %v2651_v15 = vpop.permute.xlu1 %2650 }
 0xda4   : > { %7997 = vmatpush3.xpose.msk.msra.mxu0 %vm1065_vm3, %v2651_v15  ;;  %7998 = vmatprep.mubr.msk.f32.mxu0 %vm8848_vm0, %v8849_v6 }
 0xda5   : > { %8424 = vmatprep.subr.bf16.mxu0 %v8847_v3 }
 0xda7   : > { %7999 = vmatmul.mubr.msk.f32.vlgmr.msra.gmra.mrb[14].mxu0 %vm1065_vm3, %v2649_v16 }
 0xda8   : > { %8014 = vmatprep.mubr.msk.f32.mxu0 %vm8848_vm0, %v8849_v6 }
 0xe6e   : > { %v2221_v17 = vpop.f32.mrb[16].mxu1 }
 0xe6f   : > { %v2225_v18 = vmul.f32 0.35355338, %v2221_v17  ;;  %v7970_v19 = vpop.f32.mrb[17].mxu1  ;;  %v2388_v22 = vpop.f32.mrb[10].mxu0 }
 0xe70   : > { %v2392_v25 = vmul.f32 0.35355338, %v2388_v22  ;;  %v7980_v26 = vpop.f32.mrb[11].mxu0  ;;  %v7489_v22 = vld [vmem:[%s10109_s29 + $0x20] sm:$0xff] }
 0xe71   : > { %v2226_v28 = vsel %vm9135_vm5, %v2225_v18, -1e+09 }
 0xe72   : > { %v2227_v14 = vsel %vm1065_vm3, %v2226_v28, -inf  ;;  %v2393_v29 = vsel %vm9135_vm5, %v2392_v25, -1e+09  ;;  %v7490_v25 = vld [vmem:[%s10109_s29 + $0x28] sm:$0xff] }
 0xe73   : > { %2228 = vmax.xlane.f32.xlu1 %v2227_v14  ;;  %v2394_v30 = vsel %vm1065_vm3, %v2393_v29, -inf  ;;  %v8425_v26 = vpack.c.bf16 %v7490_v25, %v7489_v22  ;;  %v3143_v22 = vld [vmem:[%s8939_s6] sm:$0xff]  ;;  %v3144_v25 = vld [vmem:[%s8939_s6 + $0x8] sm:$0xff] }
 0xe74   : > { %2395 = vmax.xlane.f32.xlu0 %v2394_v30 }
 0xe75   : > { %8426 = vmatpush3.bf16.msra.mxu0 %v8425_v26 }
 0xe76   : > { %v2555_v31 = vpop.f32.mrb[12].mxu0  ;;  %8427 = vmatprep.subr.bf16.mxu0 %v8847_v3 }
 0xe77   : > { %v2559_v32 = vmul.f32 0.35355338, %v2555_v31  ;;  %v7990_v33 = vpop.f32.mrb[13].mxu0  ;;  %v7491_v31 = vld [vmem:[%s10109_s29 + $0x30] sm:$0xff] }
 0xe79   : > { %v2560_v34 = vsel %vm9135_vm5, %v2559_v32, -1e+09  ;;  %v7492_v32 = vld [vmem:[%s10109_s29 + $0x38] sm:$0xff]  ;;  %s10143_s29 = sld [smem:[#allocation18_spill]] }
 0xe7a   : > { %v2722_v35 = vpop.f32.mrb[14].mxu0  ;;  %v2561_v36 = vsel %vm1065_vm3, %v2560_v34, -inf  ;;  %v8428_v33 = vpack.c.bf16 %v7492_v32, %v7491_v31 }
 0xe7b   : > { %v2726_v37 = vmul.f32 0.35355338, %v2722_v35  ;;  %2562 = vmax.xlane.f32.xlu0 %v2561_v36  ;;  %v8000_v38 = vpop.f32.mrb[15].mxu0 }
 0xe7c   : > { %8429 = vmatpush3.bf16.msra.mxu0 %v8428_v33  ;;  %v7509_v33 = vld [vmem:[%s10107_s19 + $0x70] sm:$0xff] }
 0xe7d   : > { %v2727_v39 = vsel %vm9135_vm5, %v2726_v37, -1e+09  ;;  %8436 = vmatprep.subr.bf16.mxu0 %v8847_v3 }
 0xe7e   : > { %v2728_v40 = vsel %vm1065_vm3, %v2727_v39, -inf }
 0xe7f   : > { %2729 = vmax.xlane.f32.xlu1 %v2728_v40 }
 0xe90   : > { %2405 = vrot.lane.b32.xlu1 %v9272_v4, %s10134_s1 }
 0xf00   : > { %v2229_v41 = vpop.xlane.xlu1 %2228 }
 0xf01   : > { %v2230_v42 = vsub.f32 %v2226_v28, %v2229_v41  ;;  %v2396_v43 = vpop.xlane.xlu0 %2395 }
 0xf02   : > { %v2397_v44 = vsub.f32 %v2393_v29, %v2396_v43 }
 0xf03   : > { %v2231_v45 = vmul.f32 1.442695, %v2230_v42 }
 0xf04   : > { %v2398_v46 = vmul.f32 1.442695, %v2397_v44  ;;  %v7494_v44 = vld [vmem:[%s10111_s3 + $0x1] ss:$0 sm:$0xff]  ;;  %s10142_s3 = sshll.u32 %s9086_s11, 3  ;;  %s10148_s11 = sld [smem:[#allocation19_spill]] }
 0xf05   : > { %8657 = vpow2.f32 %v2231_v45 }
 0xf06   : > { %8659 = vpow2.f32 %v2398_v46 }
 0xf08   : > { %v2563_v56 = vpop.xlane.xlu0 %2562 }
 0xf09   : > { %v2564_v57 = vsub.f32 %v2560_v34, %v2563_v56  ;;  %v7497_v56 = vld [vmem:[%s10110_s8 + $0x28] sm:$0xff] }
 0xf0b   : > { %v2565_v60 = vmul.f32 1.442695, %v2564_v57 }
 0xf0c   : > { %v2730_v47 = vpop.xlane.xlu1 %2729 }
 0xf0d   : > { %v2731_v48 = vsub.f32 %v2727_v39, %v2730_v47 }
 0xf0f   : > { %v8658_v49 = vpop.eup %8657  ;;  %v2732_v50 = vmul.f32 1.442695, %v2731_v48 }
 0xf10   : > { %v8660_v52 = vpop.eup %8659  ;;  %v2233_v53 = vsel %vm1065_vm3, %v8658_v49, 0.0  ;;  %v2406_v63 = vpop.permute.xlu1 %2405 }
 0xf11   : > { %8661 = vpow2.f32 %v2732_v50  ;;  %2234 = vadd.xlane.f32.xlu0 %v2233_v53  ;;  %v2400_v54 = vsel %vm1065_vm3, %v8660_v52, 0.0 }
 0xf12   : > { %2401 = vadd.xlane.f32.xlu1 %v2400_v54  ;;  %8663 = vpow2.f32 %v2565_v60  ;;  %v7499_v60 = vld [vmem:[%s10110_s8 + $0x38] sm:$0xff] }
 0xf1b   : > { %v8662_v51 = vpop.eup %8661 }
 0xf1c   : > { %v2734_v55 = vsel %vm1065_vm3, %v8662_v51, 0.0  ;;  %v8664_v61 = vpop.eup %8663 }
 0xf1d   : > { %2735 = vadd.xlane.f32.xlu1 %v2734_v55  ;;  %v2567_v62 = vsel %vm1065_vm3, %v8664_v61, 0.0  ;;  %v7496_v55 = vld [vmem:[%s10110_s8 + $0x20] sm:$0xff] }
 0xf1e   : > { %v8431_v57 = vpack.c.bf16 %v7497_v56, %v7496_v55  ;;  %v3230_v55 = vand.u32 127, %v1142_v21 }
 0xf20   : > { %vm3231_vm10 = vcmp.le.s32.totalorder %v3230_v55, %v9129_v23 }
 0xf27   : > { %2238 = vrot.lane.b32.xlu0 %v9272_v4, %s10135_s23 }
 0xf2e   : > { %2572 = vrot.lane.b32.xlu1 %v9272_v4, %s10136_s25 }
 0xf46   : > { %2568 = vadd.xlane.f32.xlu0 %v2567_v62  ;;  %v7503_v62 = vld [vmem:[%s10107_s19 + $0x40] sm:$0xff] }
 0xf5c   : > { %2739 = vrot.lane.b32.xlu0 %v9272_v4, %s10137_s2 }
 0xf9e   : > { %v2235_v8 = vpop.xlane.xlu0 %2234 }
 0xf9f   : > { %8665 = vrcp.f32 %v2235_v8  ;;  %v2402_v1 = vpop.xlane.xlu1 %2401  ;;  %v7505_v8 = vld [vmem:[%s10107_s19 + $0x50] sm:$0xff] }
 0xfa0   : > { %8667 = vrcp.f32 %v2402_v1 }
 0xfa2   : > { %v2239_v2 = vpop.permute.xlu0 %2238 }
 0xfa3   : > { %7972 = vmatpush3.msra.mxu1 %v2239_v2  ;;  %v7506_v2 = vld [vmem:[%s10107_s19 + $0x58] sm:$0xff] }
 0xfa4   : > { %7981 = vmatprep.subr.mxu1 %v8849_v6 }
 0xfa9   : > { %v8666_v5 = vpop.eup %8665 }
 0xfaa   : > { %v2736_v7 = vpop.xlane.xlu1 %2735  ;;  %v2237_v9 = vmul.f32 %v8666_v5, %v8658_v49  ;;  %v8668_v10 = vpop.eup %8667  ;;  %v8440_v5 = vpack.c.bf16 %v7506_v2, %v7505_v8 }
 0xfab   : > { %v2404_v12 = vmul.f32 %v8668_v10, %v8660_v52 }
 0xfac   : > { %7974 = vmatmul.mubr.msk.f32.vlgmr.msra.gmra.mrb[18].mxu1 %vm1065_vm3, %v2237_v9  ;;  %v7508_v9 = vld [vmem:[%s10107_s19 + $0x68] sm:$0xff] }
 0xfad   : > { %7982 = vmatpush3.msra.mxu1 %v2406_v63  ;;  %7983 = vmatprep.mubr.msk.f32.mxu1 %vm8848_vm0, %v8849_v6  ;;  %v7504_v63 = vld [vmem:[%s10107_s19 + $0x48] sm:$0xff] }
 0xfae   : > { %v2573_v4 = vpop.permute.xlu1 %2572  ;;  %7991 = vmatprep.subr.mxu1 %v8849_v6  ;;  %v8437_v1 = vpack.c.bf16 %v7504_v63, %v7503_v62 }
 0xfb0   : > { %7984 = vmatmul.mubr.msk.f32.vlgmr.msra.gmra.mrb[20].mxu1 %vm1065_vm3, %v2404_v12 }
 0xfb1   : > { %7992 = vmatpush3.msra.mxu1 %v2573_v4  ;;  %7993 = vmatprep.mubr.msk.f32.mxu1 %vm8848_vm0, %v8849_v6 }
 0xfb2   : > { %8001 = vmatprep.subr.mxu1 %v8849_v6 }
 0xfd3   : > { %v2569_v13 = vpop.xlane.xlu0 %2568 }
 0xfd4   : > { %8669 = vrcp.f32 %v2569_v13 }
 0xfd5   : > { %8671 = vrcp.f32 %v2736_v7  ;;  %v7507_v7 = vld [vmem:[%s10107_s19 + $0x60] sm:$0xff] }
 0xfd6   : > { %v8443_v10 = vpack.c.bf16 %v7508_v9, %v7507_v7 }
 0xfd7   : > { %v2740_v18 = vpop.permute.xlu0 %2739 }
 0xfde   : > { %v8670_v15 = vpop.eup %8669 }
 0xfdf   : > { %v2571_v16 = vmul.f32 %v8670_v15, %v8664_v61  ;;  %v8672_v17 = vpop.eup %8671  ;;  %v9384_v15 = vld [vmem:[%s10105_s30 + $0x4] sm:$0xf]  ;;  %s10153_s30 = sld [smem:[#allocation22_spill]] }
 0xfe0   : > { %v2738_v19 = vmul.f32 %v8672_v17, %v8662_v51 }
 0xfe1   : > { %7994 = vmatmul.mubr.msk.f32.vlgmr.msra.gmra.mrb[22].mxu1 %vm1065_vm3, %v2571_v16  ;;  %v2933_v16 = vrot.slane %v9384_v15, %v9132_v24 }
 0xfe2   : > { %8002 = vmatpush3.msra.mxu1 %v2740_v18  ;;  %8003 = vmatprep.mubr.msk.f32.mxu1 %vm8848_vm0, %v8849_v6 }
 0xfe3   : > { %8430 = vmatprep.subr.bf16.mxu1 %v8847_v3 }
 0xfe5   : > { %8004 = vmatmul.mubr.msk.f32.vlgmr.msra.gmra.mrb[24].mxu1 %vm1065_vm3, %v2738_v19  ;;  %v2938_v19 = vrot.slane %v9384_v15, %v9234_v20 }
 0xfe6   : > { %8025 = vmatprep.mubr.msk.f32.mxu1 %vm8848_vm0, %v8849_v6  ;;  %8432 = vmatpush3.bf16.msra.mxu1 %v8431_v57 }
 0xfe7   : > { %8433 = vmatprep.subr.bf16.mxu1 %v8847_v3 }
0x107f   : > { %v2310_v28 = vpop.f32.mrb[18].mxu1 }
0x1080   : > { %v7975_v14 = vpop.f32.mrb[19].mxu1 }
0x1083   : > { %v2477_v29 = vpop.f32.mrb[20].mxu1 }
0x1084   : > { %2816 = vrot.lane.b32.xlu1 %v2477_v29, %s10138_s18  ;;  %v7985_v30 = vpop.f32.mrb[21].mxu1  ;;  %v3145_v29 = vld [vmem:[%s8939_s6 + $0x10] sm:$0xff] }
0x1085   : > { %v3146_v30 = vld [vmem:[%s8939_s6 + $0x18] sm:$0xff] }
0x1086   : > { %v8452_v31 = vpack.c.bf16 %v3146_v30, %v3145_v29 }
0x10b4   : > { %v2644_v34 = vpop.f32.mrb[22].mxu1 }
0x10b5   : > { %2820 = vrot.lane.b32.xlu0 %v2644_v34, %s10139_s26  ;;  %v7995_v35 = vpop.f32.mrb[23].mxu1  ;;  %v7510_v34 = vld [vmem:[%s10107_s19 + $0x78] sm:$0xff]  ;;  %s10151_s19 = sld [smem:[#allocation21_spill]] }
0x10b6   : > { %v8446_v35 = vpack.c.bf16 %v7510_v34, %v7509_v33 }
0x10b8   : > { %v2811_v36 = vpop.f32.mrb[24].mxu1 }
0x10b9   : > { %2824 = vrot.lane.b32.xlu1 %v2811_v36, %s10140_s10  ;;  %v8005_v37 = vpop.f32.mrb[25].mxu1  ;;  %v7501_v36 = vld [vmem:[%s10108_s14 + $0x1] ss:$0 sm:$0xff]  ;;  %s10150_s14 = sld [smem:[#allocation20_spill]] }
0x10f6   : > { %v2817_v38 = vpop.permute.xlu1 %2816 }
0x10f7   : > { %v2827_v40 = vsel %vm1065_vm3, %v2310_v28, %v2817_v38  ;;  %v8449_v28 = vpack.c.bf16 %v3144_v25, %v3143_v22 }
0x1127   : > { %v2821_v39 = vpop.permute.xlu0 %2820 }
0x1128   : > { %v2828_v41 = vsel %vm1749_vm6, %v2827_v40, %v2821_v39 }
0x112b   : > { %v2825_v42 = vpop.permute.xlu1 %2824 }
0x112c   : > { %v2829_v43 = vsel %vm1751_vm7, %v2828_v41, %v2825_v42  ;;  %v7514_v41 = vld [vmem:[%s10143_s29] ss:$0 sm:$0xff] }
0x112d   : > { %8015 = vmatmul.mubr.msk.f32.vlgmr.msra.gmra.mrb[16].mxu0 %vm988_vm1, %v2829_v43 }
0x112e   : > { %8044 = vmatprep.mubr.msk.f32.mxu0 %vm8848_vm0, %v8849_v6  ;;  %8438 = vmatpush3.bf16.msra.mxu0 %v8437_v1 }
0x112f   : > { %8439 = vmatprep.subr.bf16.mxu0 %v8847_v3 }
0x1132   : > { %8441 = vmatpush3.bf16.msra.mxu0 %v8440_v5 }
0x1133   : > { %8442 = vmatprep.subr.bf16.mxu0 %v8847_v3 }
0x1136   : > { %8444 = vmatpush3.bf16.msra.mxu0 %v8443_v10 }
0x1137   : > { %8445 = vmatprep.subr.bf16.mxu0 %v8847_v3 }
0x113a   : > { %8447 = vmatpush3.bf16.msra.mxu0 %v8446_v35 }
0x113b   : > { %8068 = vmatprep.subr.mxu0 %v8849_v6 }
0x1200   : > { %v2912_v45 = vpop.f32.mrb[16].mxu0 }
0x1201   : > { %v2913_v46 = vadd.f32 %v7494_v44, %v2912_v45  ;;  %v8016_v47 = vpop.f32.mrb[17].mxu0 }
0x1203   : > { %v2916_v48 = vadd.f32 %v2913_v46, %v9265_v0  ;;  %v7498_v0 = vld [vmem:[%s10110_s8 + $0x30] sm:$0xff]  ;;  %s964_s8 = scalar_lea.vmem %s10141_s9, %s10142_s3  ;;  %s10144_s3 = smov 88  }
0x1204   : > { %v8434_v61 = vpack.c.bf16 %v7499_v60, %v7498_v0  ;;  %v9404_v32 = vld [vmem:[%s964_s8] sm:$0xff]  ;;  %s10145_s8 = smov 96   ;;  %s10149_s9 = sld [smem:[#allocation23_spill]] }
0x1205   : > { %v2917_v49 = vsel %vm988_vm1, %v2916_v48, 0.0 }
0x1206   : > { %2918 = vadd.xlane.f32.xlu0 %v2917_v49  ;;  %8435 = vmatpush3.bf16.msra.mxu1 %v8434_v61 }
0x1207   : > { %8448 = vmatprep.subr.bf16.mxu1 %v8847_v3 }
0x1293   : > { %v2919_v50 = vpop.xlane.xlu0 %2918 }
0x1294   : > { %v2920_v52 = vmul.f32 0.03125, %v2919_v50 }
0x1296   : > { %v2921_v53 = vsub.f32 %v2916_v48, %v2920_v52 }
0x1298   : > { %v2922_v54 = vmul.f32 %v2921_v53, %v2921_v53 }
0x129a   : > { %v2923_v51 = vsel %vm988_vm1, %v2922_v54, 0.0 }
0x129b   : > { %2924 = vadd.xlane.f32.xlu1 %v2923_v51  ;;  %v3314_v51 = vrot.slane %v9100_v11, %v9132_v24 }
0x129d   : > { %vm3315_vm9 = vcmp.eq.s32.totalorder %v3314_v51, 1 }
0x129e   : > { %vm9462_vm11 = vmand %vm3315_vm9, %vm3231_vm10 }
0x1328   : > { %v2925_v4 = vpop.xlane.xlu1 %2924 }
0x1329   : > { %v2926_v12 = vmul.f32 0.03125, %v2925_v4 }
0x132b   : > { %v2927_v13 = vadd.f32 1e-05, %v2926_v12 }
0x132d   : > { %8673 = vrsqrt.f32 %v2927_v13 }
0x1337   : > { %v8674_v17 = vpop.eup %8673 }
0x1338   : > { %v2929_v18 = vmul.f32 %v8674_v17, %v2921_v53 }
0x133a   : > { %v2934_v26 = vmul.f32 %v2933_v16, %v2929_v18 }
0x133c   : > { %v9392_v14 = vadd.f32 %v2938_v19, %v2934_v26 }
0x133e   : > { %8026 = vmatmul.mubr.msk.f32.vlgmr.msra.gmra.mrb[26].mxu1 %vm988_vm1, %v9392_v14 }
0x133f   : > { %8450 = vmatpush3.bf16.msra.mxu1 %v8449_v28  ;;  %8055 = vmatprep.mubr.msk.f32.mxu1 %vm8848_vm0, %v8849_v6 }
0x1340   : > { %8451 = vmatprep.subr.bf16.mxu1 %v8847_v3 }
0x1343   : > { %8453 = vmatpush3.bf16.msra.mxu1 %v8452_v31 }
0x1344   : > { %8058 = vmatprep.subr.mxu1 %v8849_v6 }
0x1346   : > { %8056 = vmatmul.mubr.msk.f32.vlgmr.msra.gmra.mrb[28].mxu1 %vm988_vm1, %v9404_v32 }
0x1347   : > { %8060 = vmatprep.mubr.msk.f32.mxu1 %vm8848_vm0, %v8849_v6 }
0x1411   : > { %v3022_v37 = vpop.f32.mrb[26].mxu1 }
0x1412   : > { %v3023_v38 = vadd.f32 %v7501_v36, %v3022_v37  ;;  %v8027_v39 = vpop.f32.mrb[27].mxu1 }
0x1414   : > { %v3026_v40 = vmax.f32 %v3023_v38, 0.0 }
0x1416   : > { %8045 = vmatmul.mubr.msk.f32.vlgmr.msra.gmra.mrb[18].mxu0 %vm1962_vm8, %v3026_v40 }
0x1417   : > { %8070 = vmatprep.mubr.msk.f32.mxu0 %vm8848_vm0, %v8849_v6 }
0x1419   : > { %v3223_v42 = vpop.f32.mrb[28].mxu1 }
0x141a   : > { %v9419_v43 = vadd.f32 %v7514_v41, %v3223_v42  ;;  %v8057_v44 = vpop.f32.mrb[29].mxu1 }
0x141c   : > { %3407 = vrot.lane.b32.xlu1 %v9419_v43, %s10144_s3  ;;  %3233 = vrot.lane.b32.xlu0 %v9419_v43, %s10145_s8 }
0x1420   : > { %3574 = vrot.lane.b32.xlu1 %v9419_v43, %s10132_s13  ;;  %3405 = vrot.lane.b32.xlu0 %v9419_v43, %s10130_s5 }
0x1424   : > { %3741 = vrot.lane.b32.xlu1 %v9419_v43, %s10133_s21  ;;  %3572 = vrot.lane.b32.xlu0 %v9419_v43, %s10129_s28 }
0x1428   : > { %3739 = vrot.lane.b32.xlu0 %v9419_v43, %s10131_s17 }
0x148e   : > { %v3408_v45 = vpop.permute.xlu1 %3407  ;;  %v3234_v46 = vpop.permute.xlu0 %3233 }
0x148f   : > { %8059 = vmatpush3.xpose.msk.msra.mxu1 %vm1065_vm3, %v3234_v46  ;;  %8069 = vmatpush3.xpose.msk.msra.mxu0 %vm1065_vm3, %v3408_v45 }
0x1490   : > { %8078 = vmatprep.subr.mxu0 %v8849_v6  ;;  %8063 = vmatprep.subr.mxu1 %v8849_v6 }
0x1492   : > { %v3575_v47 = vpop.permute.xlu1 %3574  ;;  %8061 = vmatmul.mubr.msk.f32.vlgmr.msra.gmra.mrb[30].mxu1 %vm1065_vm3, %v9419_v43  ;;  %v3406_v48 = vpop.permute.xlu0 %3405 }
0x1493   : > { %8071 = vmatmul.mubr.msk.f32.vlgmr.msra.gmra.mrb[20].mxu0 %vm1065_vm3, %v3406_v48  ;;  %8065 = vmatprep.mubr.msk.f32.mxu1 %vm8848_vm0, %v8849_v6 }
0x1494   : > { %8079 = vmatpush3.xpose.msk.msra.mxu0 %vm1065_vm3, %v3575_v47  ;;  %8080 = vmatprep.mubr.msk.f32.mxu0 %vm8848_vm0, %v8849_v6 }
0x1495   : > { %8088 = vmatprep.subr.mxu0 %v8849_v6 }
0x1496   : > { %v3742_v49 = vpop.permute.xlu1 %3741  ;;  %v3573_v50 = vpop.permute.xlu0 %3572 }
0x1497   : > { %8081 = vmatmul.mubr.msk.f32.vlgmr.msra.gmra.mrb[22].mxu0 %vm1065_vm3, %v3573_v50 }
0x1498   : > { %8089 = vmatpush3.xpose.msk.msra.mxu0 %vm1065_vm3, %v3742_v49  ;;  %8090 = vmatprep.mubr.msk.f32.mxu0 %vm8848_vm0, %v8849_v6 }
0x1499   : > { %8454 = vmatprep.subr.bf16.mxu0 %v8847_v3 }
0x149a   : > { %v3740_v52 = vpop.permute.xlu0 %3739 }
0x149b   : > { %8091 = vmatmul.mubr.msk.f32.vlgmr.msra.gmra.mrb[24].mxu0 %vm1065_vm3, %v3740_v52 }
0x149c   : > { %8106 = vmatprep.mubr.msk.f32.mxu0 %vm8848_vm0, %v8849_v6 }
0x14e9   : > { %v9456_v53 = vpop.f32.mrb[18].mxu0 }
0x14ea   : > { %v8046_v54 = vpop.f32.mrb[19].mxu0 }
0x1565   : > { %v3305_v56 = vpop.f32.mrb[30].mxu1 }
0x1566   : > { %v3309_v0 = vmul.f32 0.35355338, %v3305_v56  ;;  %v8062_v60 = vpop.f32.mrb[31].mxu1  ;;  %v3479_v61 = vpop.f32.mrb[20].mxu0 }
0x1567   : > { %v3483_v62 = vmul.f32 0.35355338, %v3479_v61  ;;  %v8072_v63 = vpop.f32.mrb[21].mxu0 }
0x1568   : > { %v3317_v8 = vsel %vm9462_vm11, %v3309_v0, -1e+09  ;;  %v3921_v63 = vld [vmem:[%s10148_s11] sm:$0xff] }
0x1569   : > { %v3318_v11 = vsel %vm1065_vm3, %v3317_v8, -inf  ;;  %v3484_v21 = vsel %vm9462_vm11, %v3483_v62, -1e+09 }
0x156a   : > { %3319 = vmax.xlane.f32.xlu1 %v3318_v11  ;;  %v3646_v1 = vpop.f32.mrb[22].mxu0  ;;  %v3485_v2 = vsel %vm1065_vm3, %v3484_v21, -inf }
0x156b   : > { %v3650_v5 = vmul.f32 0.35355338, %v3646_v1  ;;  %3486 = vmax.xlane.f32.xlu0 %v3485_v2  ;;  %v8082_v7 = vpop.f32.mrb[23].mxu0 }
0x156c   : > { %v3923_v7 = vld [vmem:[%s10148_s11 + $0x10] sm:$0xff] }
0x156d   : > { %v3651_v9 = vsel %vm9462_vm11, %v3650_v5, -1e+09 }
0x156e   : > { %v3813_v10 = vpop.f32.mrb[24].mxu0  ;;  %v3652_v4 = vsel %vm1065_vm3, %v3651_v9, -inf }
0x156f   : > { %v3817_v12 = vmul.f32 0.35355338, %v3813_v10  ;;  %3653 = vmax.xlane.f32.xlu0 %v3652_v4  ;;  %v8092_v13 = vpop.f32.mrb[25].mxu0 }
0x1571   : > { %v3818_v16 = vsel %vm9462_vm11, %v3817_v12, -1e+09 }
0x1572   : > { %v3819_v17 = vsel %vm1065_vm3, %v3818_v16, -inf }
0x1573   : > { %3820 = vmax.xlane.f32.xlu1 %v3819_v17  ;;  %v7512_v17 = vld [vmem:[%s10106_s24 + $0x1] ss:$0 sm:$0xff]  ;;  %s10152_s24 = sld [smem:[#allocation24_spill]] }
0x1584   : > { %3496 = vrot.lane.b32.xlu1 %v9419_v43, %s10134_s1 }
0x15f7   : > { %v3320_v18 = vpop.xlane.xlu1 %3319 }
0x15f8   : > { %v3321_v19 = vsub.f32 %v3317_v8, %v3320_v18  ;;  %v3487_v22 = vpop.xlane.xlu0 %3486  ;;  %v3922_v8 = vld [vmem:[%s10148_s11 + $0x8] sm:$0xff]  ;;  %v3114_v18 = vadd.f32 %v7512_v17, %v9456_v53 }
0x15f9   : > { %v3488_v25 = vsub.f32 %v3484_v21, %v3487_v22  ;;  %v8455_v11 = vpack.c.bf16 %v3922_v8, %v3921_v63  ;;  %v4030_v8 = vld [vmem:[%s10151_s19 + $0x8] sm:$0xff] }
0x15fa   : > { %v3322_v26 = vmul.f32 1.442695, %v3321_v19  ;;  %v3117_v19 = vadd.f32 %v3114_v18, %v9392_v14 }
0x15fb   : > { %v3489_v28 = vmul.f32 1.442695, %v3488_v25  ;;  %8456 = vmatpush3.bf16.msra.mxu0 %v8455_v11 }
0x15fc   : > { %8675 = vpow2.f32 %v3322_v26  ;;  %v3654_v39 = vpop.xlane.xlu0 %3653  ;;  %8457 = vmatprep.subr.bf16.mxu0 %v8847_v3  ;;  %v3118_v22 = vsel %vm988_vm1, %v3117_v19, 0.0 }
0x15fd   : > { %8677 = vpow2.f32 %v3489_v28  ;;  %v3655_v40 = vsub.f32 %v3651_v9, %v3654_v39  ;;  %v3924_v9 = vld [vmem:[%s10148_s11 + $0x18] sm:$0xff]  ;;  %v4115_v39 = vld [vmem:[%s10149_s9 + $0x10] sm:$0xff] }
0x15fe   : > { %v8458_v10 = vpack.c.bf16 %v3924_v9, %v3923_v7 }
0x15ff   : > { %v3656_v41 = vmul.f32 1.442695, %v3655_v40  ;;  %v4116_v40 = vld [vmem:[%s10149_s9 + $0x18] sm:$0xff] }
0x1600   : > { %v3821_v29 = vpop.xlane.xlu1 %3820  ;;  %8459 = vmatpush3.bf16.msra.mxu0 %v8458_v10 }
0x1601   : > { %v3822_v30 = vsub.f32 %v3818_v16, %v3821_v29  ;;  %8466 = vmatprep.subr.bf16.mxu0 %v8847_v3 }
0x1603   : > { %v3823_v31 = vmul.f32 1.442695, %v3822_v30 }
0x1604   : > { %v3497_v45 = vpop.permute.xlu1 %3496 }
0x1605   : > { %8679 = vpow2.f32 %v3823_v31 }
0x1606   : > { %v8676_v33 = vpop.eup %8675  ;;  %8681 = vpow2.f32 %v3656_v41  ;;  %v8470_v41 = vpack.c.bf16 %v4116_v40, %v4115_v39 }
0x1607   : > { %v8678_v34 = vpop.eup %8677  ;;  %v3324_v35 = vsel %vm1065_vm3, %v8676_v33, 0.0 }
0x1608   : > { %3325 = vadd.xlane.f32.xlu0 %v3324_v35  ;;  %v3491_v36 = vsel %vm1065_vm3, %v8678_v34, 0.0 }
0x1609   : > { %3492 = vadd.xlane.f32.xlu1 %v3491_v36  ;;  %v4113_v36 = vld [vmem:[%s10149_s9] sm:$0xff] }
0x160f   : > { %v8680_v37 = vpop.eup %8679 }
0x1610   : > { %v3825_v38 = vsel %vm1065_vm3, %v8680_v37, 0.0  ;;  %v8682_v42 = vpop.eup %8681 }
0x1611   : > { %3826 = vadd.xlane.f32.xlu1 %v3825_v38  ;;  %v3658_v44 = vsel %vm1065_vm3, %v8682_v42, 0.0 }
0x161e   : > { %3329 = vrot.lane.b32.xlu0 %v9419_v43, %s10135_s23 }
0x1622   : > { %3663 = vrot.lane.b32.xlu1 %v9419_v43, %s10136_s25 }
0x163d   : > { %3659 = vadd.xlane.f32.xlu0 %v3658_v44 }
0x1653   : > { %3830 = vrot.lane.b32.xlu0 %v9419_v43, %s10137_s2 }
0x1695   : > { %v3326_v46 = vpop.xlane.xlu0 %3325 }
0x1696   : > { %8683 = vrcp.f32 %v3326_v46  ;;  %v3493_v47 = vpop.xlane.xlu1 %3492  ;;  %v7528_v46 = vld [vmem:[%s10150_s14] ss:$0 sm:$0xff] }
0x1697   : > { %8685 = vrcp.f32 %v3493_v47 }
0x1699   : > { %v3330_v48 = vpop.permute.xlu0 %3329 }
0x169a   : > { %8064 = vmatpush3.msra.mxu1 %v3330_v48 }
0x169b   : > { %8073 = vmatprep.subr.mxu1 %v8849_v6 }
0x169e   : > { %v3827_v52 = vpop.xlane.xlu1 %3826 }
0x16a0   : > { %v8684_v49 = vpop.eup %8683 }
0x16a1   : > { %v3328_v50 = vmul.f32 %v8684_v49, %v8676_v33  ;;  %v8686_v54 = vpop.eup %8685 }
0x16a2   : > { %v3495_v43 = vmul.f32 %v8686_v54, %v8678_v34  ;;  %v3664_v51 = vpop.permute.xlu1 %3663 }
0x16a3   : > { %8066 = vmatmul.mubr.msk.f32.vlgmr.msra.gmra.mrb[32].mxu1 %vm1065_vm3, %v3328_v50 }
0x16a4   : > { %8074 = vmatpush3.msra.mxu1 %v3497_v45  ;;  %8075 = vmatprep.mubr.msk.f32.mxu1 %vm8848_vm0, %v8849_v6 }
0x16a5   : > { %8083 = vmatprep.subr.mxu1 %v8849_v6 }
0x16a7   : > { %8076 = vmatmul.mubr.msk.f32.vlgmr.msra.gmra.mrb[34].mxu1 %vm1065_vm3, %v3495_v43 }
0x16a8   : > { %8084 = vmatpush3.msra.mxu1 %v3664_v51  ;;  %8085 = vmatprep.mubr.msk.f32.mxu1 %vm8848_vm0, %v8849_v6 }
0x16a9   : > { %8093 = vmatprep.subr.mxu1 %v8849_v6 }
0x16ca   : > { %v3660_v55 = vpop.xlane.xlu0 %3659 }
0x16cb   : > { %8687 = vrcp.f32 %v3660_v55  ;;  %v3139_v55 = vrot.slane %v9384_v15, %v9261_v59 }
0x16cc   : > { %8689 = vrcp.f32 %v3827_v52  ;;  %v3134_v52 = vrot.slane %v9384_v15, %v9258_v58  ;;  %v4029_v15 = vld [vmem:[%s10151_s19] sm:$0xff] }
0x16cd   : > { %v8461_v11 = vpack.c.bf16 %v4030_v8, %v4029_v15 }
0x16ce   : > { %v3831_v61 = vpop.permute.xlu0 %3830 }
0x16d5   : > { %v8688_v56 = vpop.eup %8687 }
0x16d6   : > { %v3662_v0 = vmul.f32 %v8688_v56, %v8682_v42  ;;  %v8690_v60 = vpop.eup %8689 }
0x16d7   : > { %v3829_v62 = vmul.f32 %v8690_v60, %v8680_v37  ;;  %v4114_v37 = vld [vmem:[%s10149_s9 + $0x8] sm:$0xff] }
0x16d8   : > { %8086 = vmatmul.mubr.msk.f32.vlgmr.msra.gmra.mrb[36].mxu1 %vm1065_vm3, %v3662_v0  ;;  %v8467_v38 = vpack.c.bf16 %v4114_v37, %v4113_v36 }
0x16d9   : > { %8094 = vmatpush3.msra.mxu1 %v3831_v61  ;;  %8095 = vmatprep.mubr.msk.f32.mxu1 %vm8848_vm0, %v8849_v6 }
0x16da   : > { %8460 = vmatprep.subr.bf16.mxu1 %v8847_v3 }
0x16dc   : > { %8096 = vmatmul.mubr.msk.f32.vlgmr.msra.gmra.mrb[38].mxu1 %vm1065_vm3, %v3829_v62 }
0x16dd   : > { %8117 = vmatprep.mubr.msk.f32.mxu1 %vm8848_vm0, %v8849_v6  ;;  %8462 = vmatpush3.bf16.msra.mxu1 %v8461_v11 }
0x16de   : > { %8463 = vmatprep.subr.bf16.mxu1 %v8847_v3 }
0x1776   : > { %v3401_v21 = vpop.f32.mrb[32].mxu1 }
0x1777   : > { %v8067_v1 = vpop.f32.mrb[33].mxu1 }
0x1778   : > { %v4032_v1 = vld [vmem:[%s10151_s19 + $0x18] sm:$0xff] }
0x177a   : > { %v3568_v2 = vpop.f32.mrb[34].mxu1 }
0x177b   : > { %3907 = vrot.lane.b32.xlu1 %v3568_v2, %s10138_s18  ;;  %v8077_v5 = vpop.f32.mrb[35].mxu1 }
0x177c   : > { %v7532_v5 = vld [vmem:[%s10152_s24] ss:$0 sm:$0xff] }
0x17ab   : > { %v3735_v4 = vpop.f32.mrb[36].mxu1 }
0x17ac   : > { %3911 = vrot.lane.b32.xlu0 %v3735_v4, %s10139_s26  ;;  %v8087_v12 = vpop.f32.mrb[37].mxu1 }
0x17af   : > { %v3902_v13 = vpop.f32.mrb[38].mxu1 }
0x17b0   : > { %3915 = vrot.lane.b32.xlu1 %v3902_v13, %s10140_s10  ;;  %v8097_v16 = vpop.f32.mrb[39].mxu1 }
0x17b1   : > { %v9560_v16 = vld [vmem:[%s9009_s20] sm:$0x3f] }
0x17b2   : > { %v4022_v17 = vrot.slane %v9560_v16, %v9132_v24 }
0x17cb   : > { %3119 = vadd.xlane.f32.xlu0 %v3118_v22  ;;  %v4027_v22 = vrot.slane %v9560_v16, %v9234_v20 }
0x17ed   : > { %v3908_v25 = vpop.permute.xlu1 %3907 }
0x17ee   : > { %v3918_v28 = vsel %vm1065_vm3, %v3401_v21, %v3908_v25  ;;  %v4031_v21 = vld [vmem:[%s10151_s19 + $0x10] sm:$0xff] }
0x17ef   : > { %v8464_v2 = vpack.c.bf16 %v4032_v1, %v4031_v21 }
0x17f1   : > { %8465 = vmatpush3.bf16.msra.mxu1 %v8464_v2 }
0x17f2   : > { %8131 = vmatprep.subr.mxu1 %v8849_v6 }
0x181e   : > { %v3912_v26 = vpop.permute.xlu0 %3911 }
0x181f   : > { %v3919_v29 = vsel %vm1749_vm6, %v3918_v28, %v3912_v26 }
0x1822   : > { %v3916_v30 = vpop.permute.xlu1 %3915 }
0x1823   : > { %v3920_v31 = vsel %vm1751_vm7, %v3919_v29, %v3916_v30  ;;  %v7530_v29 = vld [vmem:[%s10153_s30] ss:$0 sm:$0xff] }
0x1824   : > { %8107 = vmatmul.mubr.msk.f32.vlgmr.msra.gmra.mrb[26].mxu0 %vm988_vm1, %v3920_v31 }
0x1825   : > { %8128 = vmatprep.mubr.msk.f32.mxu0 %vm8848_vm0, %v8849_v6  ;;  %8468 = vmatpush3.bf16.msra.mxu0 %v8467_v38 }
0x1826   : > { %8469 = vmatprep.subr.bf16.mxu0 %v8847_v3 }
0x1829   : > { %8471 = vmatpush3.bf16.msra.mxu0 %v8470_v41 }
0x182a   : > { %8141 = vmatprep.subr.mxu0 %v8849_v6 }
0x1858   : > { %v3120_v14 = vpop.xlane.xlu0 %3119 }
0x1859   : > { %v3121_v53 = vmul.f32 0.03125, %v3120_v14 }
0x185b   : > { %v3122_v33 = vsub.f32 %v3117_v19, %v3121_v53 }
0x185d   : > { %v3123_v34 = vmul.f32 %v3122_v33, %v3122_v33 }
0x185f   : > { %v3124_v35 = vsel %vm988_vm1, %v3123_v34, 0.0 }
0x1860   : > { %3125 = vadd.xlane.f32.xlu0 %v3124_v35 }
0x18ed   : > { %v3126_v42 = vpop.xlane.xlu0 %3125 }
0x18ee   : > { %v3127_v44 = vmul.f32 0.03125, %v3126_v42 }
0x18f0   : > { %v3128_v45 = vadd.f32 1e-05, %v3127_v44 }
0x18f2   : > { %8691 = vrsqrt.f32 %v3128_v45 }
0x18f7   : > { %v4001_v47 = vpop.f32.mrb[26].mxu0 }
0x18f8   : > { %v4002_v48 = vadd.f32 %v7528_v46, %v4001_v47  ;;  %v8108_v49 = vpop.f32.mrb[27].mxu0 }
0x18fa   : > { %v4005_v50 = vadd.f32 %v4002_v48, %v9404_v32 }
0x18fc   : > { %v8692_v54 = vpop.eup %8691  ;;  %v4006_v43 = vsel %vm988_vm1, %v4005_v50, 0.0 }
0x18fd   : > { %v3130_v51 = vmul.f32 %v8692_v54, %v3122_v33  ;;  %4007 = vadd.xlane.f32.xlu1 %v4006_v43 }
0x18ff   : > { %v3135_v56 = vmul.f32 %v3134_v52, %v3130_v51 }
0x1901   : > { %v9539_v0 = vadd.f32 %v3139_v55, %v3135_v56 }
0x1903   : > { %8129 = vmatmul.mubr.msk.f32.vlgmr.msra.gmra.mrb[28].mxu0 %vm988_vm1, %v9539_v0 }
0x1904   : > { %8143 = vmatprep.mubr.msk.f32.mxu0 %vm8848_vm0, %v8849_v6 }
0x198a   : > { %v4008_v32 = vpop.xlane.xlu1 %4007 }
0x198b   : > { %v4009_v60 = vmul.f32 0.03125, %v4008_v32 }
0x198d   : > { %v4010_v61 = vsub.f32 %v4005_v50, %v4009_v60 }
0x198f   : > { %v4011_v62 = vmul.f32 %v4010_v61, %v4010_v61 }
0x1991   : > { %v4012_v63 = vsel %vm988_vm1, %v4011_v62, 0.0 }
0x1992   : > { %4013 = vadd.xlane.f32.xlu0 %v4012_v63 }
0x19d6   : > { %v4193_v7 = vpop.f32.mrb[28].mxu0 }
0x19d7   : > { %v9553_v9 = vadd.f32 %v7532_v5, %v4193_v7  ;;  %v8130_v10 = vpop.f32.mrb[29].mxu0 }
0x19d9   : > { %4364 = vrot.lane.b32.xlu1 %v9553_v9, %s10130_s5 }
0x19dd   : > { %4531 = vrot.lane.b32.xlu1 %v9553_v9, %s10129_s28 }
0x1a1f   : > { %v4014_v4 = vpop.xlane.xlu0 %4013 }
0x1a20   : > { %v4015_v12 = vmul.f32 0.03125, %v4014_v4 }
0x1a22   : > { %v4016_v13 = vadd.f32 1e-05, %v4015_v12 }
0x1a24   : > { %8693 = vrsqrt.f32 %v4016_v13 }
0x1a2e   : > { %v8694_v18 = vpop.eup %8693 }
0x1a2f   : > { %v4018_v19 = vmul.f32 %v8694_v18, %v4010_v61 }
0x1a31   : > { %v4023_v25 = vmul.f32 %v4022_v17, %v4018_v19 }
0x1a33   : > { %v9566_v26 = vadd.f32 %v4027_v22, %v4023_v25 }
0x1a35   : > { %8118 = vmatmul.mubr.msk.f32.vlgmr.msra.gmra.mrb[40].mxu1 %vm988_vm1, %v9566_v26 }
0x1a36   : > { %8132 = vmatpush3.xpose.msk.msra.mxu1 %vm1065_vm3, %v9553_v9  ;;  %8133 = vmatprep.mubr.msk.f32.mxu1 %vm8848_vm0, %v8849_v6 }
0x1a37   : > { %8136 = vmatprep.subr.mxu1 %v8849_v6 }
0x1a4b   : > { %v4365_v28 = vpop.permute.xlu1 %4364 }
0x1a4c   : > { %8142 = vmatpush3.xpose.msk.msra.mxu0 %vm1065_vm3, %v4365_v28 }
0x1a4d   : > { %8151 = vmatprep.subr.mxu0 %v8849_v6 }
0x1a4f   : > { %v4532_v53 = vpop.permute.xlu1 %4531 }
0x1b08   : > { %v4109_v30 = vpop.f32.mrb[40].mxu1 }
0x1b09   : > { %v4110_v31 = vadd.f32 %v7530_v29, %v4109_v30  ;;  %v8119_v14 = vpop.f32.mrb[41].mxu1 }
0x1b0b   : > { %4362 = vrot.lane.b32.xlu0 %v4110_v31, %s10130_s5  ;;  %4529 = vrot.lane.b32.xlu1 %v4110_v31, %s10129_s28 }
0x1b0c   : > { %8134 = vmatmul.mubr.msk.f32.vlgmr.msra.gmra.mrb[42].mxu1 %vm1065_vm3, %v4110_v31 }
0x1b0d   : > { %8138 = vmatprep.mubr.msk.f32.mxu1 %vm8848_vm0, %v8849_v6 }
0x1b0f   : > { %4698 = vrot.lane.b32.xlu0 %v9553_v9, %s10131_s17  ;;  %4696 = vrot.lane.b32.xlu1 %v4110_v31, %s10131_s17 }
0x1b7d   : > { %v4363_v33 = vpop.permute.xlu0 %4362  ;;  %v4530_v34 = vpop.permute.xlu1 %4529 }
0x1b7e   : > { %8144 = vmatmul.mubr.msk.f32.vlgmr.msra.gmra.mrb[30].mxu0 %vm1065_vm3, %v4363_v33 }
0x1b7f   : > { %8152 = vmatpush3.xpose.msk.msra.mxu0 %vm1065_vm3, %v4532_v53  ;;  %8153 = vmatprep.mubr.msk.f32.mxu0 %vm8848_vm0, %v8849_v6 }
0x1b80   : > { %8161 = vmatprep.subr.mxu0 %v8849_v6 }
0x1b81   : > { %v4699_v35 = vpop.permute.xlu0 %4698  ;;  %v4697_v36 = vpop.permute.xlu1 %4696 }
0x1b82   : > { %8154 = vmatmul.mubr.msk.f32.vlgmr.msra.gmra.mrb[32].mxu0 %vm1065_vm3, %v4530_v34 }
0x1b83   : > { %8162 = vmatpush3.xpose.msk.msra.mxu0 %vm1065_vm3, %v4699_v35  ;;  %8163 = vmatprep.mubr.msk.f32.mxu0 %vm8848_vm0, %v8849_v6 }
0x1b84   : > { %8472 = vmatprep.subr.bf16.mxu0 %v8847_v3 }
0x1b86   : > { %8164 = vmatmul.mubr.msk.f32.vlgmr.msra.gmra.mrb[34].mxu0 %vm1065_vm3, %v4697_v36 }
0x1b87   : > { %8179 = vmatprep.mubr.msk.f32.mxu0 %vm8848_vm0, %v8849_v6 }
0x1bdf   : > { %v4269_v37 = vpop.f32.mrb[42].mxu1 }
0x1be0   : > { %v4273_v38 = vmul.f32 0.35355338, %v4269_v37  ;;  %v8135_v39 = vpop.f32.mrb[43].mxu1 }
0x1be2   : > { %v4274_v40 = vsel %vm9135_vm5, %v4273_v38, -1e+09 }
0x1be3   : > { %v4275_v41 = vsel %vm1065_vm3, %v4274_v40, -inf }
0x1be4   : > { %4276 = vmax.xlane.f32.xlu0 %v4275_v41 }
0x1c51   : > { %v4436_v42 = vpop.f32.mrb[30].mxu0 }
0x1c52   : > { %v4440_v44 = vmul.f32 0.35355338, %v4436_v42  ;;  %v8145_v45 = vpop.f32.mrb[31].mxu0 }
0x1c53   : > { %v4879_v45 = vld [vmem:[%s10155_s7 + $0x8] sm:$0xff] }
0x1c54   : > { %v4441_v46 = vsel %vm9135_vm5, %v4440_v44, -1e+09  ;;  %v4878_v44 = vld [vmem:[%s10154_s15] sm:$0xff]  ;;  %s10158_s15 = sld [smem:[#allocation27_spill]] }
0x1c55   : > { %v4603_v47 = vpop.f32.mrb[32].mxu0  ;;  %v4442_v48 = vsel %vm1065_vm3, %v4441_v46, -inf }
0x1c56   : > { %v4607_v49 = vmul.f32 0.35355338, %v4603_v47  ;;  %4443 = vmax.xlane.f32.xlu1 %v4442_v48  ;;  %v8155_v50 = vpop.f32.mrb[33].mxu0  ;;  %v4880_v47 = vld [vmem:[%s10155_s7 + $0x10] sm:$0xff]  ;;  %v4881_v48 = vld [vmem:[%s10155_s7 + $0x18] sm:$0xff] }
0x1c58   : > { %v4608_v52 = vsel %vm9135_vm5, %v4607_v49, -1e+09  ;;  %v8476_v49 = vpack.c.bf16 %v4881_v48, %v4880_v47 }
0x1c59   : > { %v4770_v54 = vpop.f32.mrb[34].mxu0  ;;  %v4609_v43 = vsel %vm1065_vm3, %v4608_v52, -inf }
0x1c5a   : > { %v4774_v51 = vmul.f32 0.35355338, %v4770_v54  ;;  %4610 = vmax.xlane.f32.xlu0 %v4609_v43  ;;  %v8165_v55 = vpop.f32.mrb[35].mxu0  ;;  %s10159_s0 = smov %s10158_s15 }
0x1c5c   : > { %v4775_v56 = vsel %vm9135_vm5, %v4774_v51, -1e+09 }
0x1c5d   : > { %v4776_v32 = vsel %vm1065_vm3, %v4775_v56, -inf }
0x1c5e   : > { %4777 = vmax.xlane.f32.xlu0 %v4776_v32 }
0x1c67   : > { %4286 = vrot.lane.b32.xlu1 %v9553_v9, %s10145_s8 }
0x1c71   : > { %v4277_v60 = vpop.xlane.xlu0 %4276 }
0x1c72   : > { %v4278_v61 = vsub.f32 %v4274_v40, %v4277_v60 }
0x1c74   : > { %v4279_v62 = vmul.f32 1.442695, %v4278_v61 }
0x1c76   : > { %8695 = vpow2.f32 %v4279_v62 }
0x1c80   : > { %v8696_v63 = vpop.eup %8695 }
0x1c81   : > { %v4281_v15 = vsel %vm1065_vm3, %v8696_v63, 0.0 }
0x1c8b   : > { %4282 = vadd.xlane.f32.xlu1 %v4281_v15  ;;  %v7546_v15 = vld [vmem:[%s10156_s22] ss:$0 sm:$0xff]  ;;  %s10161_s22 = sld [smem:[#allocation28_spill]] }
0x1c91   : > { %s10162_s27 = smov %s10161_s22  ;;  %v7548_v47 = vld [vmem:[%s10161_s22] ss:$0 sm:$0xff]  ;;  %s8865_s22 = smov [#allocation2]  }
0x1ce3   : > { %v4444_v8 = vpop.xlane.xlu1 %4443 }
0x1ce4   : > { %v4445_v11 = vsub.f32 %v4441_v46, %v4444_v8  ;;  %v8473_v46 = vpack.c.bf16 %v4879_v45, %v4878_v44  ;;  %v5077_v44 = vld [vmem:[%s10160_s4 + $0x30] sm:$0xff]  ;;  %v5078_v45 = vld [vmem:[%s10160_s4 + $0x38] sm:$0xff] }
0x1ce6   : > { %v4446_v21 = vmul.f32 1.442695, %v4445_v11  ;;  %8474 = vmatpush3.bf16.msra.mxu0 %v8473_v46  ;;  %v8494_v46 = vpack.c.bf16 %v5078_v45, %v5077_v44 }
0x1ce7   : > { %v4287_v1 = vpop.permute.xlu1 %4286  ;;  %v4611_v2 = vpop.xlane.xlu0 %4610  ;;  %8475 = vmatprep.subr.bf16.mxu0 %v8847_v3 }
0x1ce8   : > { %8697 = vpow2.f32 %v4446_v21  ;;  %v4612_v5 = vsub.f32 %v4608_v52, %v4611_v2  ;;  %8137 = vmatpush3.msra.mxu1 %v4287_v1 }
0x1ce9   : > { %8146 = vmatprep.subr.mxu1 %v8849_v6 }
0x1cea   : > { %v4613_v7 = vmul.f32 1.442695, %v4612_v5  ;;  %8477 = vmatpush3.bf16.msra.mxu0 %v8476_v49 }
0x1ceb   : > { %v4778_v10 = vpop.xlane.xlu0 %4777  ;;  %8484 = vmatprep.subr.bf16.mxu0 %v8847_v3 }
0x1cec   : > { %8699 = vpow2.f32 %v4613_v7  ;;  %v4779_v4 = vsub.f32 %v4775_v56, %v4778_v10 }
0x1cee   : > { %v4780_v12 = vmul.f32 1.442695, %v4779_v4 }
0x1cf0   : > { %8701 = vpow2.f32 %v4780_v12 }
0x1cf2   : > { %v8698_v13 = vpop.eup %8697 }
0x1cf3   : > { %v4448_v17 = vsel %vm1065_vm3, %v8698_v13, 0.0 }
0x1cf4   : > { %4449 = vadd.xlane.f32.xlu0 %v4448_v17  ;;  %v4987_v17 = vld [vmem:[%s10159_s0 + $0x8] sm:$0xff] }
0x1cf6   : > { %v8700_v18 = vpop.eup %8699 }
0x1cf7   : > { %v4615_v19 = vsel %vm1065_vm3, %v8700_v18, 0.0 }
0x1cf8   : > { %4616 = vadd.xlane.f32.xlu1 %v4615_v19  ;;  %v4989_v19 = vld [vmem:[%s10159_s0 + $0x18] sm:$0xff] }
0x1cfa   : > { %v8702_v22 = vpop.eup %8701 }
0x1cfb   : > { %v4782_v25 = vsel %vm1065_vm3, %v8702_v22, 0.0 }
0x1cfc   : > { %4783 = vadd.xlane.f32.xlu0 %v4782_v25  ;;  %v5071_v25 = vld [vmem:[%s10160_s4] sm:$0xff] }
0x1d09   : > { %4620 = vrot.lane.b32.xlu1 %v9553_v9, %s10132_s13 }
0x1d0d   : > { %4787 = vrot.lane.b32.xlu1 %v9553_v9, %s10133_s21 }
0x1d12   : > { %4453 = vrot.lane.b32.xlu0 %v9553_v9, %s10144_s3 }
0x1d18   : > { %v4283_v28 = vpop.xlane.xlu1 %4282 }
0x1d19   : > { %8703 = vrcp.f32 %v4283_v28  ;;  %v5072_v28 = vld [vmem:[%s10160_s4 + $0x8] sm:$0xff] }
0x1d23   : > { %v8704_v29 = vpop.eup %8703 }
0x1d24   : > { %v4285_v30 = vmul.f32 %v8704_v29, %v8696_v63  ;;  %v5073_v29 = vld [vmem:[%s10160_s4 + $0x10] sm:$0xff] }
0x1d26   : > { %8139 = vmatmul.mubr.msk.f32.vlgmr.msra.gmra.mrb[44].mxu1 %vm1065_vm3, %v4285_v30  ;;  %v8485_v30 = vpack.c.bf16 %v5072_v28, %v5071_v25  ;;  %v7558_v28 = vld [vmem:[%s10143_s29 + $0x1] ss:$0 sm:$0xff] }
0x1d27   : > { %8148 = vmatprep.mubr.msk.f32.mxu1 %vm8848_vm0, %v8849_v6 }
0x1d81   : > { %v4450_v31 = vpop.xlane.xlu0 %4449 }
0x1d82   : > { %8705 = vrcp.f32 %v4450_v31  ;;  %v5074_v31 = vld [vmem:[%s10160_s4 + $0x18] sm:$0xff] }
0x1d85   : > { %v4617_v14 = vpop.xlane.xlu1 %4616 }
0x1d86   : > { %8707 = vrcp.f32 %v4617_v14  ;;  %v8488_v14 = vpack.c.bf16 %v5074_v31, %v5073_v29 }
0x1d89   : > { %v4784_v53 = vpop.xlane.xlu0 %4783  ;;  %v4621_v35 = vpop.permute.xlu1 %4620 }
0x1d8a   : > { %8709 = vrcp.f32 %v4784_v53  ;;  %v5075_v53 = vld [vmem:[%s10160_s4 + $0x20] sm:$0xff] }
0x1d8c   : > { %v8706_v33 = vpop.eup %8705 }
0x1d8d   : > { %v4452_v34 = vmul.f32 %v8706_v33, %v8698_v13  ;;  %v4454_v36 = vpop.permute.xlu0 %4453  ;;  %v4788_v38 = vpop.permute.xlu1 %4787  ;;  %v4986_v13 = vld [vmem:[%s10158_s15] sm:$0xff]  ;;  %v5076_v33 = vld [vmem:[%s10160_s4 + $0x28] sm:$0xff]  ;;  %s10163_s15 = sld [smem:[#allocation30_spill]] }
0x1d8e   : > { %8147 = vmatpush3.msra.mxu1 %v4454_v36 }
0x1d8f   : > { %8149 = vmatmul.mubr.msk.f32.vlgmr.msra.gmra.mrb[46].mxu1 %vm1065_vm3, %v4452_v34  ;;  %8156 = vmatprep.subr.mxu1 %v8849_v6  ;;  %v8491_v34 = vpack.c.bf16 %v5076_v33, %v5075_v53 }
0x1d90   : > { %v8708_v9 = vpop.eup %8707  ;;  %8157 = vmatpush3.msra.mxu1 %v4621_v35  ;;  %8158 = vmatprep.mubr.msk.f32.mxu1 %vm8848_vm0, %v8849_v6 }
0x1d91   : > { %v4619_v37 = vmul.f32 %v8708_v9, %v8700_v18  ;;  %8166 = vmatprep.subr.mxu1 %v8849_v6  ;;  %v8479_v18 = vpack.c.bf16 %v4987_v17, %v4986_v13  ;;  %v5180_v13 = vsub.s32 5, %v9129_v23 }
0x1d93   : > { %8159 = vmatmul.mubr.msk.f32.vlgmr.msra.gmra.mrb[48].mxu1 %vm1065_vm3, %v4619_v37  ;;  %v4979_v37 = vrot.slane %v9560_v16, %v9258_v58 }
0x1d94   : > { %v8710_v39 = vpop.eup %8709  ;;  %8167 = vmatpush3.msra.mxu1 %v4788_v38  ;;  %8168 = vmatprep.mubr.msk.f32.mxu1 %vm8848_vm0, %v8849_v6 }
0x1d95   : > { %v4786_v40 = vmul.f32 %v8710_v39, %v8702_v22  ;;  %8478 = vmatprep.subr.bf16.mxu1 %v8847_v3 }
0x1d97   : > { %8169 = vmatmul.mubr.msk.f32.vlgmr.msra.gmra.mrb[50].mxu1 %vm1065_vm3, %v4786_v40  ;;  %v4984_v40 = vrot.slane %v9560_v16, %v9261_v59 }
0x1d98   : > { %8190 = vmatprep.mubr.msk.f32.mxu1 %vm8848_vm0, %v8849_v6  ;;  %8480 = vmatpush3.bf16.msra.mxu1 %v8479_v18 }
0x1d99   : > { %8481 = vmatprep.subr.bf16.mxu1 %v8847_v3 }
0x1df9   : > { %v4358_v41 = vpop.f32.mrb[44].mxu1 }
0x1dfa   : > { %v8140_v42 = vpop.f32.mrb[45].mxu1 }
0x1e62   : > { %v4525_v50 = vpop.f32.mrb[46].mxu1 }
0x1e63   : > { %4864 = vrot.lane.b32.xlu0 %v4525_v50, %s10138_s18  ;;  %v8150_v52 = vpop.f32.mrb[47].mxu1 }
0x1e66   : > { %v4692_v54 = vpop.f32.mrb[48].mxu1 }
0x1e67   : > { %4868 = vrot.lane.b32.xlu1 %v4692_v54, %s10139_s26  ;;  %v8160_v43 = vpop.f32.mrb[49].mxu1  ;;  %v7550_v54 = vld [vmem:[%s10163_s15] ss:$0 sm:$0xff] }
0x1e6a   : > { %v4859_v51 = vpop.f32.mrb[50].mxu1 }
0x1e6b   : > { %4872 = vrot.lane.b32.xlu0 %v4859_v51, %s10140_s10  ;;  %v8170_v55 = vpop.f32.mrb[51].mxu1 }
0x1ed5   : > { %v4865_v56 = vpop.permute.xlu0 %4864 }
0x1ed6   : > { %v4875_v60 = vsel %vm1065_vm3, %v4358_v41, %v4865_v56 }
0x1ed9   : > { %v4869_v32 = vpop.permute.xlu1 %4868 }
0x1eda   : > { %v4876_v61 = vsel %vm1749_vm6, %v4875_v60, %v4869_v32 }
0x1edd   : > { %v4873_v62 = vpop.permute.xlu0 %4872 }
0x1ede   : > { %v4877_v63 = vsel %vm1751_vm7, %v4876_v61, %v4873_v62 }
0x1edf   : > { %8180 = vmatmul.mubr.msk.f32.vlgmr.msra.gmra.mrb[36].mxu0 %vm988_vm1, %v4877_v63 }
0x1ee0   : > { %8209 = vmatprep.mubr.msk.f32.mxu0 %vm8848_vm0, %v8849_v6  ;;  %8486 = vmatpush3.bf16.msra.mxu0 %v8485_v30 }
0x1ee1   : > { %8487 = vmatprep.subr.bf16.mxu0 %v8847_v3 }
0x1ee4   : > { %8489 = vmatpush3.bf16.msra.mxu0 %v8488_v14 }
0x1ee5   : > { %8490 = vmatprep.subr.bf16.mxu0 %v8847_v3 }
0x1ee8   : > { %8492 = vmatpush3.bf16.msra.mxu0 %v8491_v34 }
0x1ee9   : > { %8493 = vmatprep.subr.bf16.mxu0 %v8847_v3 }
0x1eec   : > { %8495 = vmatpush3.bf16.msra.mxu0 %v8494_v46 }
0x1eed   : > { %8233 = vmatprep.subr.mxu0 %v8849_v6 }
0x1fb2   : > { %v4958_v8 = vpop.f32.mrb[36].mxu0 }
0x1fb3   : > { %v4959_v11 = vadd.f32 %v7546_v15, %v4958_v8  ;;  %v8181_v21 = vpop.f32.mrb[37].mxu0  ;;  %v7553_v8 = vld [vmem:[%s8939_s6 + $0x20] sm:$0xff] }
0x1fb5   : > { %v4962_v1 = vadd.f32 %v4959_v11, %v9566_v26  ;;  %v4988_v26 = vld [vmem:[%s10159_s0 + $0x10] sm:$0xff]  ;;  %s10164_s0 = smov %s10163_s15  ;;  %v7554_v11 = vld [vmem:[%s8939_s6 + $0x28] sm:$0xff]  ;;  %s8757_s15 = sshll.u32 %s8865_s22, 4  ;;  %s8758_s15 = int_to_ptr.vmem [resolvable:$false] %s8757_s15 }
0x1fb6   : > { %v8482_v22 = vpack.c.bf16 %v4989_v19, %v4988_v26  ;;  %v8497_v21 = vpack.c.bf16 %v7554_v11, %v7553_v8  ;;  %v5181_v19 = vrot.slane %v9560_v16, %v5180_v13 }
0x1fb7   : > { %v4963_v2 = vsel %vm988_vm1, %v4962_v1, 0.0 }
0x1fb8   : > { %4964 = vadd.xlane.f32.xlu1 %v4963_v2  ;;  %8483 = vmatpush3.bf16.msra.mxu1 %v8482_v22  ;;  %v7556_v2 = vld [vmem:[%s8939_s6 + $0x38] sm:$0xff] }
0x1fb9   : > { %8496 = vmatprep.subr.bf16.mxu1 %v8847_v3 }
0x2045   : > { %v4965_v5 = vpop.xlane.xlu1 %4964 }
0x2046   : > { %v4966_v7 = vmul.f32 0.03125, %v4965_v5 }
0x2048   : > { %v4967_v10 = vsub.f32 %v4962_v1, %v4966_v7  ;;  %v7555_v1 = vld [vmem:[%s8939_s6 + $0x30] sm:$0xff] }
0x2049   : > { %v8500_v5 = vpack.c.bf16 %v7556_v2, %v7555_v1 }
0x204a   : > { %v4968_v4 = vmul.f32 %v4967_v10, %v4967_v10 }
0x204c   : > { %v4969_v12 = vsel %vm988_vm1, %v4968_v4, 0.0 }
0x204d   : > { %4970 = vadd.xlane.f32.xlu0 %v4969_v12  ;;  %v5175_v12 = vsub.s32 4, %v9129_v23 }
0x204f   : > { %v5176_v17 = vrot.slane %v9560_v16, %v5175_v12 }
0x20da   : > { %v4971_v35 = vpop.xlane.xlu0 %4970 }
0x20db   : > { %v4972_v36 = vmul.f32 0.03125, %v4971_v35 }
0x20dd   : > { %v4973_v9 = vadd.f32 1e-05, %v4972_v36 }
0x20df   : > { %8711 = vrsqrt.f32 %v4973_v9 }
0x20e9   : > { %v8712_v38 = vpop.eup %8711 }
0x20ea   : > { %v4975_v39 = vmul.f32 %v8712_v38, %v4967_v10 }
0x20ec   : > { %v4980_v41 = vmul.f32 %v4979_v37, %v4975_v39 }
0x20ee   : > { %v4985_v42 = vadd.f32 %v4984_v40, %v4980_v41 }
0x20f0   : > { %8191 = vmatmul.mubr.msk.f32.vlgmr.msra.gmra.mrb[52].mxu1 %vm988_vm1, %v4985_v42 }
0x20f1   : > { %8220 = vmatprep.mubr.msk.f32.mxu1 %vm8848_vm0, %v8849_v6  ;;  %8498 = vmatpush3.bf16.msra.mxu1 %v8497_v21 }
0x20f2   : > { %8499 = vmatprep.subr.bf16.mxu1 %v8847_v3 }
0x20f5   : > { %8501 = vmatpush3.bf16.msra.mxu1 %v8500_v5 }
0x20f6   : > { %8223 = vmatprep.subr.mxu1 %v8849_v6 }
0x21c3   : > { %v5066_v48 = vpop.f32.mrb[52].mxu1 }
0x21c4   : > { %v5067_v49 = vadd.f32 %v7548_v47, %v5066_v48  ;;  %v8192_v50 = vpop.f32.mrb[53].mxu1 }
0x21c6   : > { %v5070_v52 = vmax.f32 %v5067_v49, 0.0 }
0x21c8   : > { %8210 = vmatmul.mubr.msk.f32.vlgmr.msra.gmra.mrb[38].mxu0 %vm1962_vm8, %v5070_v52 }
0x21c9   : > { %8235 = vmatprep.mubr.msk.f32.mxu0 %vm8848_vm0, %v8849_v6 }
0x229b   : > { %v5155_v43 = vpop.f32.mrb[38].mxu0 }
0x229c   : > { %v5156_v51 = vadd.f32 %v7550_v54, %v5155_v43  ;;  %v8211_v55 = vpop.f32.mrb[39].mxu0 }
0x229e   : > { %v5159_v56 = vadd.f32 %v5156_v51, %v4985_v42 }
0x22a0   : > { %v5160_v32 = vsel %vm988_vm1, %v5159_v56, 0.0 }
0x22a1   : > { %5161 = vadd.xlane.f32.xlu0 %v5160_v32 }
0x232e   : > { %v5162_v60 = vpop.xlane.xlu0 %5161 }
0x232f   : > { %v5163_v61 = vmul.f32 0.03125, %v5162_v60 }
0x2331   : > { %v5164_v62 = vsub.f32 %v5159_v56, %v5163_v61 }
0x2333   : > { %v5165_v63 = vmul.f32 %v5164_v62, %v5164_v62 }
0x2335   : > { %v5166_v15 = vsel %vm988_vm1, %v5165_v63, 0.0 }
0x2336   : > { %5167 = vadd.xlane.f32.xlu1 %v5166_v15 }
0x23c3   : > { %v5168_v7 = vpop.xlane.xlu1 %5167 }
0x23c4   : > { %v5169_v10 = vmul.f32 0.03125, %v5168_v7 }
0x23c6   : > { %v5170_v4 = vadd.f32 1e-05, %v5169_v10 }
0x23c8   : > { %8713 = vrsqrt.f32 %v5170_v4 }
0x23d2   : > { %v8714_v18 = vpop.eup %8713 }
0x23d3   : > { %v5172_v26 = vmul.f32 %v8714_v18, %v5164_v62 }
0x23d5   : > { %v5177_v22 = vmul.f32 %v5176_v17, %v5172_v26 }
0x23d7   : > { %v9704_v25 = vadd.f32 %v5181_v19, %v5177_v22 }
0x23d9   : > { %8221 = vmatmul.mubr.msk.f32.vlgmr.msra.gmra.mrb[54].mxu1 %vm988_vm1, %v9704_v25 }
0x23da   : > { %8225 = vmatprep.mubr.msk.f32.mxu1 %vm8848_vm0, %v8849_v6 }
0x24ac   : > { %v5267_v29 = vpop.f32.mrb[54].mxu1 }
0x24ad   : > { %v9711_v30 = vadd.f32 %v7558_v28, %v5267_v29  ;;  %v8222_v31 = vpop.f32.mrb[55].mxu1 }
0x24af   : > { %5439 = vrot.lane.b32.xlu1 %v9711_v30, %s10144_s3  ;;  %5272 = vrot.lane.b32.xlu0 %v9711_v30, %s10145_s8 }
0x24b3   : > { %5437 = vrot.lane.b32.xlu1 %v9711_v30, %s10130_s5  ;;  %5606 = vrot.lane.b32.xlu0 %v9711_v30, %s10132_s13 }
0x24b7   : > { %5604 = vrot.lane.b32.xlu1 %v9711_v30, %s10129_s28  ;;  %5773 = vrot.lane.b32.xlu0 %v9711_v30, %s10133_s21 }
0x24bb   : > { %5771 = vrot.lane.b32.xlu1 %v9711_v30, %s10131_s17 }
0x2521   : > { %v5440_v16 = vpop.permute.xlu1 %5439  ;;  %v5273_v14 = vpop.permute.xlu0 %5272 }
0x2522   : > { %8224 = vmatpush3.xpose.msk.msra.mxu1 %vm1065_vm3, %v5273_v14  ;;  %8234 = vmatpush3.xpose.msk.msra.mxu0 %vm1065_vm3, %v5440_v16 }
0x2523   : > { %8243 = vmatprep.subr.mxu0 %v8849_v6  ;;  %8228 = vmatprep.subr.mxu1 %v8849_v6 }
0x2525   : > { %v5438_v53 = vpop.permute.xlu1 %5437  ;;  %8226 = vmatmul.mubr.msk.f32.vlgmr.msra.gmra.mrb[56].mxu1 %vm1065_vm3, %v9711_v30  ;;  %v5607_v33 = vpop.permute.xlu0 %5606 }
0x2526   : > { %8236 = vmatmul.mubr.msk.f32.vlgmr.msra.gmra.mrb[40].mxu0 %vm1065_vm3, %v5438_v53  ;;  %8230 = vmatprep.mubr.msk.f32.mxu1 %vm8848_vm0, %v8849_v6 }
0x2527   : > { %8244 = vmatpush3.xpose.msk.msra.mxu0 %vm1065_vm3, %v5607_v33  ;;  %8245 = vmatprep.mubr.msk.f32.mxu0 %vm8848_vm0, %v8849_v6 }
0x2528   : > { %8253 = vmatprep.subr.mxu0 %v8849_v6 }
0x2529   : > { %v5605_v34 = vpop.permute.xlu1 %5604  ;;  %v5774_v35 = vpop.permute.xlu0 %5773 }
0x252a   : > { %8246 = vmatmul.mubr.msk.f32.vlgmr.msra.gmra.mrb[42].mxu0 %vm1065_vm3, %v5605_v34 }
0x252b   : > { %8254 = vmatpush3.xpose.msk.msra.mxu0 %vm1065_vm3, %v5774_v35  ;;  %8255 = vmatprep.mubr.msk.f32.mxu0 %vm8848_vm0, %v8849_v6 }
0x252c   : > { %8502 = vmatprep.subr.bf16.mxu0 %v8847_v3 }
0x252d   : > { %v5772_v36 = vpop.permute.xlu1 %5771 }
0x252e   : > { %8256 = vmatmul.mubr.msk.f32.vlgmr.msra.gmra.mrb[44].mxu0 %vm1065_vm3, %v5772_v36 }
0x252f   : > { %8271 = vmatprep.mubr.msk.f32.mxu0 %vm8848_vm0, %v8849_v6 }
0x25f8   : > { %v5344_v9 = vpop.f32.mrb[56].mxu1 }
0x25f9   : > { %v5348_v37 = vmul.f32 0.35355338, %v5344_v9  ;;  %v8227_v38 = vpop.f32.mrb[57].mxu1  ;;  %v5511_v39 = vpop.f32.mrb[40].mxu0 }
0x25fa   : > { %v5515_v40 = vmul.f32 0.35355338, %v5511_v39  ;;  %v8237_v41 = vpop.f32.mrb[41].mxu0 }
0x25fb   : > { %v5349_v42 = vsel %vm9462_vm11, %v5348_v37, -1e+09  ;;  %v7573_v41 = vld [vmem:[%s10148_s11 + $0x28] sm:$0xff] }
0x25fc   : > { %v5516_v44 = vsel %vm9462_vm11, %v5515_v40, -1e+09  ;;  %v5350_v45 = vsel %vm1065_vm3, %v5349_v42, -inf  ;;  %v7572_v40 = vld [vmem:[%s10148_s11 + $0x20] sm:$0xff] }
0x25fd   : > { %5351 = vmax.xlane.f32.xlu0 %v5350_v45  ;;  %v5678_v46 = vpop.f32.mrb[42].mxu0  ;;  %v5517_v47 = vsel %vm1065_vm3, %v5516_v44, -inf  ;;  %v7575_v45 = vld [vmem:[%s10148_s11 + $0x38] sm:$0xff] }
0x25fe   : > { %v5682_v48 = vmul.f32 0.35355338, %v5678_v46  ;;  %5518 = vmax.xlane.f32.xlu1 %v5517_v47  ;;  %v8247_v49 = vpop.f32.mrb[43].mxu0 }
0x2600   : > { %v5683_v50 = vsel %vm9462_vm11, %v5682_v48, -1e+09 }
0x2601   : > { %v5845_v52 = vpop.f32.mrb[44].mxu0  ;;  %v5684_v54 = vsel %vm1065_vm3, %v5683_v50, -inf }
0x2602   : > { %v5849_v43 = vmul.f32 0.35355338, %v5845_v52  ;;  %5685 = vmax.xlane.f32.xlu0 %v5684_v54  ;;  %v8257_v51 = vpop.f32.mrb[45].mxu0 }
0x2604   : > { %v5850_v55 = vsel %vm9462_vm11, %v5849_v43, -1e+09 }
0x2605   : > { %v5851_v56 = vsel %vm1065_vm3, %v5850_v55, -inf }
0x2606   : > { %5852 = vmax.xlane.f32.xlu0 %v5851_v56  ;;  %v7586_v56 = vld [vmem:[%s10149_s9 + $0x20] sm:$0xff] }
0x260f   : > { %5361 = vrot.lane.b32.xlu1 %v9711_v30, %s10135_s23 }
0x268a   : > { %v5352_v32 = vpop.xlane.xlu0 %5351 }
0x268b   : > { %v5353_v60 = vsub.f32 %v5349_v42, %v5352_v32  ;;  %v5519_v61 = vpop.xlane.xlu1 %5518  ;;  %v8503_v42 = vpack.c.bf16 %v7573_v41, %v7572_v40  ;;  %v7587_v32 = vld [vmem:[%s10149_s9 + $0x28] sm:$0xff] }
0x268c   : > { %v5520_v62 = vsub.f32 %v5516_v44, %v5519_v61  ;;  %v7574_v44 = vld [vmem:[%s10148_s11 + $0x30] sm:$0xff] }
0x268d   : > { %v5354_v63 = vmul.f32 1.442695, %v5353_v60  ;;  %8504 = vmatpush3.bf16.msra.mxu0 %v8503_v42  ;;  %v8506_v46 = vpack.c.bf16 %v7575_v45, %v7574_v44 }
0x268e   : > { %v5521_v15 = vmul.f32 1.442695, %v5520_v62  ;;  %8505 = vmatprep.subr.bf16.mxu0 %v8847_v3  ;;  %v8515_v62 = vpack.c.bf16 %v7587_v32, %v7586_v56 }
0x268f   : > { %8715 = vpow2.f32 %v5354_v63  ;;  %v5362_v8 = vpop.permute.xlu1 %5361  ;;  %v5686_v11 = vpop.xlane.xlu0 %5685 }
0x2690   : > { %8717 = vpow2.f32 %v5521_v15  ;;  %v5687_v21 = vsub.f32 %v5683_v50, %v5686_v11  ;;  %8229 = vmatpush3.msra.mxu1 %v5362_v8  ;;  %v7588_v8 = vld [vmem:[%s10149_s9 + $0x30] sm:$0xff]  ;;  %v7589_v11 = vld [vmem:[%s10149_s9 + $0x38] sm:$0xff] }
0x2691   : > { %8238 = vmatprep.subr.mxu1 %v8849_v6  ;;  %8507 = vmatpush3.bf16.msra.mxu0 %v8506_v46 }
0x2692   : > { %v5688_v57 = vmul.f32 1.442695, %v5687_v21  ;;  %8514 = vmatprep.subr.bf16.mxu0 %v8847_v3 }
0x2693   : > { %v5853_v1 = vpop.xlane.xlu0 %5852 }
0x2694   : > { %8719 = vpow2.f32 %v5688_v57  ;;  %v5854_v2 = vsub.f32 %v5850_v55, %v5853_v1  ;;  %v8518_v57 = vpack.c.bf16 %v7589_v11, %v7588_v8  ;;  %v7577_v1 = vld [vmem:[%s10150_s14 + $0x1] ss:$0 sm:$0xff] }
0x2696   : > { %v5855_v5 = vmul.f32 1.442695, %v5854_v2 }
0x2698   : > { %8721 = vpow2.f32 %v5855_v5 }
0x2699   : > { %v8716_v7 = vpop.eup %8715 }
0x269a   : > { %v8718_v10 = vpop.eup %8717  ;;  %v5356_v4 = vsel %vm1065_vm3, %v8716_v7, 0.0 }
0x269b   : > { %5357 = vadd.xlane.f32.xlu1 %v5356_v4  ;;  %v5523_v17 = vsel %vm1065_vm3, %v8718_v10, 0.0 }
0x269c   : > { %5524 = vadd.xlane.f32.xlu0 %v5523_v17 }
0x269e   : > { %v8720_v18 = vpop.eup %8719 }
0x269f   : > { %v5690_v26 = vsel %vm1065_vm3, %v8720_v18, 0.0 }
0x26a0   : > { %5691 = vadd.xlane.f32.xlu1 %v5690_v26 }
0x26a2   : > { %v8722_v19 = vpop.eup %8721 }
0x26a3   : > { %v5857_v22 = vsel %vm1065_vm3, %v8722_v19, 0.0 }
0x26a4   : > { %5858 = vadd.xlane.f32.xlu0 %v5857_v22 }
0x26b1   : > { %5695 = vrot.lane.b32.xlu1 %v9711_v30, %s10136_s25  ;;  %s10169_s25 = sld [smem:[#allocation33_spill]] }
0x26b5   : > { %5862 = vrot.lane.b32.xlu1 %v9711_v30, %s10137_s2 }
0x26ba   : > { %5528 = vrot.lane.b32.xlu0 %v9711_v30, %s10134_s1 }
0x2728   : > { %v5358_v28 = vpop.xlane.xlu1 %5357 }
0x2729   : > { %8723 = vrcp.f32 %v5358_v28  ;;  %v5525_v29 = vpop.xlane.xlu0 %5524 }
0x272a   : > { %8725 = vrcp.f32 %v5525_v29  ;;  %v7591_v29 = vld [vmem:[%s10152_s24 + $0x1] ss:$0 sm:$0xff] }
0x272d   : > { %v5692_v31 = vpop.xlane.xlu1 %5691 }
0x272e   : > { %8727 = vrcp.f32 %v5692_v31 }
0x2731   : > { %v5859_v16 = vpop.xlane.xlu0 %5858  ;;  %v5696_v30 = vpop.permute.xlu1 %5695 }
0x2732   : > { %8729 = vrcp.f32 %v5859_v16  ;;  %v7579_v16 = vld [vmem:[%s10151_s19 + $0x20] sm:$0xff] }
0x2733   : > { %v8724_v14 = vpop.eup %8723 }
0x2734   : > { %v5360_v53 = vmul.f32 %v8724_v14, %v8716_v7  ;;  %v8726_v33 = vpop.eup %8725  ;;  %v7580_v14 = vld [vmem:[%s10151_s19 + $0x28] sm:$0xff] }
0x2735   : > { %v5529_v34 = vpop.permute.xlu0 %5528  ;;  %v5527_v35 = vmul.f32 %v8726_v33, %v8718_v10  ;;  %v5863_v38 = vpop.permute.xlu1 %5862  ;;  %v7582_v33 = vld [vmem:[%s10151_s19 + $0x38] sm:$0xff] }
0x2736   : > { %8231 = vmatmul.mubr.msk.f32.vlgmr.msra.gmra.mrb[58].mxu1 %vm1065_vm3, %v5360_v53  ;;  %v7581_v53 = vld [vmem:[%s10151_s19 + $0x30] sm:$0xff] }
0x2737   : > { %8239 = vmatpush3.msra.mxu1 %v5529_v34  ;;  %8240 = vmatprep.mubr.msk.f32.mxu1 %vm8848_vm0, %v8849_v6  ;;  %v8512_v34 = vpack.c.bf16 %v7582_v33, %v7581_v53 }
0x2738   : > { %8248 = vmatprep.subr.mxu1 %v8849_v6  ;;  %v8728_v36 = vpop.eup %8727 }
0x2739   : > { %v5694_v9 = vmul.f32 %v8728_v36, %v8720_v18 }
0x273a   : > { %8241 = vmatmul.mubr.msk.f32.vlgmr.msra.gmra.mrb[60].mxu1 %vm1065_vm3, %v5527_v35 }
0x273b   : > { %8249 = vmatpush3.msra.mxu1 %v5696_v30  ;;  %8250 = vmatprep.mubr.msk.f32.mxu1 %vm8848_vm0, %v8849_v6 }
0x273c   : > { %8258 = vmatprep.subr.mxu1 %v8849_v6  ;;  %v8730_v37 = vpop.eup %8729 }
0x273d   : > { %v5861_v39 = vmul.f32 %v8730_v37, %v8722_v19  ;;  %v9831_v37 = vld [vmem:[%s9009_s20 + $0x8] sm:$0x3f] }
0x273e   : > { %8251 = vmatmul.mubr.msk.f32.vlgmr.msra.gmra.mrb[62].mxu1 %vm1065_vm3, %v5694_v9  ;;  %v6061_v41 = vrot.slane %v9831_v37, %v9234_v20 }
0x273f   : > { %8259 = vmatpush3.msra.mxu1 %v5863_v38  ;;  %8260 = vmatprep.mubr.msk.f32.mxu1 %vm8848_vm0, %v8849_v6  ;;  %v6056_v38 = vrot.slane %v9831_v37, %v9132_v24  ;;  %v7584_v24 = vld [vmem:[%s10153_s30 + $0x1] ss:$0 sm:$0xff] }
0x2740   : > { %8508 = vmatprep.subr.bf16.mxu1 %v8847_v3 }
0x2742   : > { %8261 = vmatmul.mubr.msk.f32.vlgmr.msra.gmra.mrb[64].mxu1 %vm1065_vm3, %v5861_v39 }
0x2743   : > { %8282 = vmatprep.mubr.msk.f32.mxu1 %vm8848_vm0, %v8849_v6 }
0x2809   : > { %v5433_v47 = vpop.f32.mrb[58].mxu1 }
0x280a   : > { %v8232_v48 = vpop.f32.mrb[59].mxu1 }
0x280d   : > { %v5600_v49 = vpop.f32.mrb[60].mxu1 }
0x280e   : > { %5939 = vrot.lane.b32.xlu0 %v5600_v49, %s10138_s18  ;;  %v8242_v50 = vpop.f32.mrb[61].mxu1 }
0x2811   : > { %v5767_v52 = vpop.f32.mrb[62].mxu1 }
0x2812   : > { %5943 = vrot.lane.b32.xlu1 %v5767_v52, %s10139_s26  ;;  %v8252_v54 = vpop.f32.mrb[63].mxu1 }
0x2815   : > { %v5934_v43 = vpop.f32.mrb[64].mxu1 }
0x2816   : > { %5947 = vrot.lane.b32.xlu0 %v5934_v43, %s10140_s10  ;;  %v8262_v51 = vpop.f32.mrb[65].mxu1 }
0x2880   : > { %v5940_v55 = vpop.permute.xlu0 %5939 }
0x2881   : > { %v5950_v61 = vsel %vm1065_vm3, %v5433_v47, %v5940_v55 }
0x2884   : > { %v5944_v60 = vpop.permute.xlu1 %5943 }
0x2885   : > { %v5951_v63 = vsel %vm1749_vm6, %v5950_v61, %v5944_v60 }
0x2888   : > { %v5948_v15 = vpop.permute.xlu0 %5947 }
0x2889   : > { %v5952_v21 = vsel %vm1751_vm7, %v5951_v63, %v5948_v15 }
0x288a   : > { %8272 = vmatmul.mubr.msk.f32.vlgmr.msra.gmra.mrb[46].mxu0 %vm988_vm1, %v5952_v21 }
0x288b   : > { %8516 = vmatpush3.bf16.msra.mxu0 %v8515_v62  ;;  %8293 = vmatprep.mubr.msk.f32.mxu0 %vm8848_vm0, %v8849_v6 }
0x288c   : > { %8517 = vmatprep.subr.bf16.mxu0 %v8847_v3 }
0x288f   : > { %8519 = vmatpush3.bf16.msra.mxu0 %v8518_v57 }
0x2890   : > { %8306 = vmatprep.subr.mxu0 %v8849_v6 }
0x2892   : > { %8294 = vmatmul.mubr.msk.f32.vlgmr.msra.gmra.mrb[48].mxu0 %vm988_vm1, %v9539_v0 }
0x2893   : > { %8308 = vmatprep.mubr.msk.f32.mxu0 %vm8848_vm0, %v8849_v6 }
0x295d   : > { %v6035_v2 = vpop.f32.mrb[46].mxu0 }
0x295e   : > { %v6036_v5 = vadd.f32 %v7577_v1, %v6035_v2  ;;  %v8273_v7 = vpop.f32.mrb[47].mxu0 }
0x2960   : > { %v6039_v10 = vadd.f32 %v6036_v5, %v9704_v25  ;;  %v8509_v25 = vpack.c.bf16 %v7580_v14, %v7579_v16 }
0x2962   : > { %v6040_v4 = vsel %vm988_vm1, %v6039_v10, 0.0  ;;  %8510 = vmatpush3.bf16.msra.mxu1 %v8509_v25 }
0x2963   : > { %6041 = vadd.xlane.f32.xlu1 %v6040_v4  ;;  %8511 = vmatprep.subr.bf16.mxu1 %v8847_v3 }
0x2965   : > { %v6228_v17 = vpop.f32.mrb[48].mxu0 }
0x2966   : > { %v8295_v18 = vpop.f32.mrb[49].mxu0  ;;  %v9818_v31 = vadd.f32 %v7591_v29, %v6228_v17  ;;  %8513 = vmatpush3.bf16.msra.mxu1 %v8512_v34 }
0x2967   : > { %8296 = vmatprep.subr.mxu1 %v8849_v6 }
0x29f0   : > { %v6042_v0 = vpop.xlane.xlu1 %6041 }
0x29f1   : > { %v6043_v26 = vmul.f32 0.03125, %v6042_v0 }
0x29f3   : > { %v6044_v19 = vsub.f32 %v6039_v10, %v6043_v26 }
0x29f5   : > { %v6045_v22 = vmul.f32 %v6044_v19, %v6044_v19 }
0x29f7   : > { %v6046_v28 = vsel %vm988_vm1, %v6045_v22, 0.0 }
0x29f8   : > { %6047 = vadd.xlane.f32.xlu0 %v6046_v28 }
0x2a0e   : > { %6399 = vrot.lane.b32.xlu0 %v9818_v31, %s10130_s5 }
0x2a85   : > { %v6048_v35 = vpop.xlane.xlu0 %6047 }
0x2a86   : > { %v6049_v30 = vmul.f32 0.03125, %v6048_v35 }
0x2a88   : > { %v6050_v36 = vadd.f32 1e-05, %v6049_v30 }
0x2a89   : > { %v6400_v9 = vpop.permute.xlu0 %6399 }
0x2a8a   : > { %8731 = vrsqrt.f32 %v6050_v36  ;;  %8307 = vmatpush3.xpose.msk.msra.mxu0 %vm1065_vm3, %v6400_v9 }
0x2a8b   : > { %8316 = vmatprep.subr.mxu0 %v8849_v6 }
0x2a94   : > { %v8732_v39 = vpop.eup %8731 }
0x2a95   : > { %v6052_v40 = vmul.f32 %v8732_v39, %v6044_v19 }
0x2a97   : > { %v6057_v42 = vmul.f32 %v6056_v38, %v6052_v40 }
0x2a99   : > { %v9837_v44 = vadd.f32 %v6061_v41, %v6057_v42 }
0x2a9b   : > { %8283 = vmatmul.mubr.msk.f32.vlgmr.msra.gmra.mrb[66].mxu1 %vm988_vm1, %v9837_v44 }
0x2a9c   : > { %8297 = vmatpush3.xpose.msk.msra.mxu1 %vm1065_vm3, %v9818_v31  ;;  %8298 = vmatprep.mubr.msk.f32.mxu1 %vm8848_vm0, %v8849_v6 }
0x2a9d   : > { %8301 = vmatprep.subr.mxu1 %v8849_v6 }
0x2b6e   : > { %v6145_v45 = vpop.f32.mrb[66].mxu1 }
0x2b6f   : > { %v6146_v46 = vadd.f32 %v7584_v24, %v6145_v45  ;;  %v8284_v47 = vpop.f32.mrb[67].mxu1 }
0x2b71   : > { %6397 = vrot.lane.b32.xlu1 %v6146_v46, %s10130_s5  ;;  %6564 = vrot.lane.b32.xlu0 %v6146_v46, %s10129_s28  ;;  %s10165_s5 = sld [smem:[#allocation27_spill]] }
0x2b72   : > { %8299 = vmatmul.mubr.msk.f32.vlgmr.msra.gmra.mrb[68].mxu1 %vm1065_vm3, %v6146_v46 }
0x2b73   : > { %8303 = vmatprep.mubr.msk.f32.mxu1 %vm8848_vm0, %v8849_v6 }
0x2b75   : > { %6566 = vrot.lane.b32.xlu1 %v9818_v31, %s10129_s28  ;;  %6731 = vrot.lane.b32.xlu0 %v6146_v46, %s10131_s17 }
0x2b79   : > { %6733 = vrot.lane.b32.xlu1 %v9818_v31, %s10131_s17  ;;  %s10167_s17 = sld [smem:[#allocation32_spill]] }
0x2be3   : > { %v6398_v20 = vpop.permute.xlu1 %6397  ;;  %v6565_v49 = vpop.permute.xlu0 %6564 }
0x2be4   : > { %8309 = vmatmul.mubr.msk.f32.vlgmr.msra.gmra.mrb[50].mxu0 %vm1065_vm3, %v6398_v20 }
0x2be5   : > { %8318 = vmatprep.mubr.msk.f32.mxu0 %vm8848_vm0, %v8849_v6 }
0x2be7   : > { %v6567_v48 = vpop.permute.xlu1 %6566  ;;  %v6732_v52 = vpop.permute.xlu0 %6731 }
0x2be8   : > { %8317 = vmatpush3.xpose.msk.msra.mxu0 %vm1065_vm3, %v6567_v48 }
0x2be9   : > { %8326 = vmatprep.subr.mxu0 %v8849_v6 }
0x2beb   : > { %v6734_v50 = vpop.permute.xlu1 %6733  ;;  %8319 = vmatmul.mubr.msk.f32.vlgmr.msra.gmra.mrb[52].mxu0 %vm1065_vm3, %v6565_v49 }
0x2bec   : > { %8327 = vmatpush3.xpose.msk.msra.mxu0 %vm1065_vm3, %v6734_v50  ;;  %8328 = vmatprep.mubr.msk.f32.mxu0 %vm8848_vm0, %v8849_v6 }
0x2bed   : > { %8520 = vmatprep.subr.bf16.mxu0 %v8847_v3 }
0x2bef   : > { %8329 = vmatmul.mubr.msk.f32.vlgmr.msra.gmra.mrb[54].mxu0 %vm1065_vm3, %v6732_v52 }
0x2bf0   : > { %8344 = vmatprep.mubr.msk.f32.mxu0 %vm8848_vm0, %v8849_v6 }
0x2c45   : > { %v6304_v54 = vpop.f32.mrb[68].mxu1 }
0x2c46   : > { %v6308_v43 = vmul.f32 0.35355338, %v6304_v54  ;;  %v8300_v51 = vpop.f32.mrb[69].mxu1 }
0x2c48   : > { %v6309_v55 = vsel %vm9135_vm5, %v6308_v43, -1e+09 }
0x2c49   : > { %v6310_v56 = vsel %vm1065_vm3, %v6309_v55, -inf }
0x2c4a   : > { %6311 = vmax.xlane.f32.xlu1 %v6310_v56  ;;  %v7606_v56 = vld [vmem:[%s10155_s7 + $0x28] sm:$0xff] }
0x2cb7   : > { %v6471_v32 = vpop.f32.mrb[50].mxu0 }
0x2cb8   : > { %v6475_v60 = vmul.f32 0.35355338, %v6471_v32  ;;  %v8310_v61 = vpop.f32.mrb[51].mxu0 }
0x2cb9   : > { %v7608_v61 = vld [vmem:[%s10155_s7 + $0x38] sm:$0xff] }
0x2cba   : > { %v6476_v62 = vsel %vm9135_vm5, %v6475_v60, -1e+09  ;;  %v7607_v60 = vld [vmem:[%s10155_s7 + $0x30] sm:$0xff] }
0x2cbb   : > { %v6477_v63 = vsel %vm1065_vm3, %v6476_v62, -inf }
0x2cbc   : > { %6478 = vmax.xlane.f32.xlu0 %v6477_v63 }
0x2cbe   : > { %v6638_v15 = vpop.f32.mrb[52].mxu0 }
0x2cbf   : > { %v6642_v8 = vmul.f32 0.35355338, %v6638_v15  ;;  %v8320_v11 = vpop.f32.mrb[53].mxu0 }
0x2cc1   : > { %v6643_v21 = vsel %vm9135_vm5, %v6642_v8, -1e+09 }
0x2cc2   : > { %v6805_v57 = vpop.f32.mrb[54].mxu0  ;;  %v6644_v1 = vsel %vm1065_vm3, %v6643_v21, -inf }
0x2cc3   : > { %v6809_v2 = vmul.f32 0.35355338, %v6805_v57  ;;  %6645 = vmax.xlane.f32.xlu0 %v6644_v1  ;;  %v8330_v5 = vpop.f32.mrb[55].mxu0 }
0x2cc5   : > { %v6810_v7 = vsel %vm9135_vm5, %v6809_v2, -1e+09 }
0x2cc6   : > { %v6811_v10 = vsel %vm1065_vm3, %v6810_v7, -inf }
0x2cc7   : > { %6812 = vmax.xlane.f32.xlu1 %v6811_v10 }
0x2cd7   : > { %v6312_v4 = vpop.xlane.xlu1 %6311 }
0x2cd8   : > { %v6313_v17 = vsub.f32 %v6309_v55, %v6312_v4  ;;  %6488 = vrot.lane.b32.xlu1 %v9818_v31, %s10144_s3  ;;  %v7605_v55 = vld [vmem:[%s10155_s7 + $0x20] sm:$0xff] }
0x2cd9   : > { %v8521_v32 = vpack.c.bf16 %v7606_v56, %v7605_v55  ;;  %v7617_v55 = vld [vmem:[%s10162_s27 + $0x1] ss:$0 sm:$0xff] }
0x2cda   : > { %v6314_v18 = vmul.f32 1.442695, %v6313_v17  ;;  %v7610_v17 = vld [vmem:[%s10157_s12 + $0x1] ss:$0 sm:$0xff] }
0x2cdb   : > { %8522 = vmatpush3.bf16.msra.mxu0 %v8521_v32 }
0x2cdc   : > { %8733 = vpow2.f32 %v6314_v18  ;;  %8523 = vmatprep.subr.bf16.mxu0 %v8847_v3 }
0x2ce6   : > { %v8734_v0 = vpop.eup %8733 }
0x2ce7   : > { %v6316_v26 = vsel %vm1065_vm3, %v8734_v0, 0.0 }
0x2ce8   : > { %6317 = vadd.xlane.f32.xlu0 %v6316_v26 }
0x2cfe   : > { %6321 = vrot.lane.b32.xlu0 %v9818_v31, %s10145_s8 }
0x2d49   : > { %v6479_v19 = vpop.xlane.xlu0 %6478 }
0x2d4a   : > { %v6480_v27 = vsub.f32 %v6476_v62, %v6479_v19  ;;  %v8524_v62 = vpack.c.bf16 %v7608_v61, %v7607_v60 }
0x2d4c   : > { %v6481_v22 = vmul.f32 1.442695, %v6480_v27  ;;  %8525 = vmatpush3.bf16.msra.mxu0 %v8524_v62 }
0x2d4d   : > { %8532 = vmatprep.subr.bf16.mxu0 %v8847_v3 }
0x2d4e   : > { %8735 = vpow2.f32 %v6481_v22 }
0x2d50   : > { %v6646_v28 = vpop.xlane.xlu0 %6645 }
0x2d51   : > { %v6647_v29 = vsub.f32 %v6643_v21, %v6646_v28 }
0x2d53   : > { %v6648_v16 = vmul.f32 1.442695, %v6647_v29 }
0x2d54   : > { %v6813_v14 = vpop.xlane.xlu1 %6812 }
0x2d55   : > { %8737 = vpow2.f32 %v6648_v16  ;;  %v6814_v25 = vsub.f32 %v6810_v7, %v6813_v14 }
0x2d57   : > { %v6815_v53 = vmul.f32 1.442695, %v6814_v25  ;;  %v7612_v25 = vld [vmem:[%s10165_s5 + $0x20] sm:$0xff] }
0x2d58   : > { %v8736_v33 = vpop.eup %8735  ;;  %v6489_v42 = vpop.permute.xlu1 %6488 }
0x2d59   : > { %8739 = vpow2.f32 %v6815_v53  ;;  %v6483_v34 = vsel %vm1065_vm3, %v8736_v33, 0.0  ;;  %v7613_v53 = vld [vmem:[%s10165_s5 + $0x28] sm:$0xff] }
0x2d5a   : > { %6484 = vadd.xlane.f32.xlu1 %v6483_v34  ;;  %v7615_v34 = vld [vmem:[%s10165_s5 + $0x38] sm:$0xff] }
0x2d5f   : > { %v8738_v35 = vpop.eup %8737 }
0x2d60   : > { %v6650_v30 = vsel %vm1065_vm3, %v8738_v35, 0.0 }
0x2d61   : > { %6651 = vadd.xlane.f32.xlu0 %v6650_v30  ;;  %v7619_v30 = vld [vmem:[%s10160_s4 + $0x40] sm:$0xff] }
0x2d63   : > { %v8740_v36 = vpop.eup %8739 }
0x2d64   : > { %v6817_v9 = vsel %vm1065_vm3, %v8740_v36, 0.0 }
0x2d65   : > { %6818 = vadd.xlane.f32.xlu1 %v6817_v9  ;;  %v7621_v9 = vld [vmem:[%s10160_s4 + $0x50] sm:$0xff] }
0x2d75   : > { %v6318_v38 = vpop.xlane.xlu0 %6317 }
0x2d76   : > { %8741 = vrcp.f32 %v6318_v38  ;;  %6655 = vrot.lane.b32.xlu1 %v9818_v31, %s10132_s13  ;;  %s10166_s13 = sld [smem:[#allocation31_spill]] }
0x2d77   : > { %6822 = vrot.lane.b32.xlu0 %v9818_v31, %s10133_s21  ;;  %s10168_s21 = sld [smem:[#allocation37_spill]] }
0x2d79   : > { %v6322_v39 = vpop.permute.xlu0 %6321 }
0x2d7a   : > { %8302 = vmatpush3.msra.mxu1 %v6322_v39  ;;  %v7622_v39 = vld [vmem:[%s10160_s4 + $0x58] sm:$0xff] }
0x2d7b   : > { %8311 = vmatprep.subr.mxu1 %v8849_v6 }
0x2d80   : > { %v8742_v40 = vpop.eup %8741 }
0x2d81   : > { %v6320_v41 = vmul.f32 %v8742_v40, %v8734_v0  ;;  %v8536_v40 = vpack.c.bf16 %v7622_v39, %v7621_v9 }
0x2d83   : > { %8304 = vmatmul.mubr.msk.f32.vlgmr.msra.gmra.mrb[70].mxu1 %vm1065_vm3, %v6320_v41  ;;  %v7623_v41 = vld [vmem:[%s10160_s4 + $0x60] sm:$0xff] }
0x2d84   : > { %8312 = vmatpush3.msra.mxu1 %v6489_v42  ;;  %8313 = vmatprep.mubr.msk.f32.mxu1 %vm8848_vm0, %v8849_v6  ;;  %v7624_v42 = vld [vmem:[%s10160_s4 + $0x68] sm:$0xff] }
0x2d85   : > { %8321 = vmatprep.subr.mxu1 %v8849_v6 }
0x2de7   : > { %v6485_v24 = vpop.xlane.xlu1 %6484 }
0x2de8   : > { %8743 = vrcp.f32 %v6485_v24  ;;  %v8539_v24 = vpack.c.bf16 %v7624_v42, %v7623_v41 }
0x2dee   : > { %v6652_v45 = vpop.xlane.xlu0 %6651 }
0x2def   : > { %8745 = vrcp.f32 %v6652_v45 }
0x2df2   : > { %v8744_v31 = vpop.eup %8743  ;;  %v6819_v46 = vpop.xlane.xlu1 %6818 }
0x2df3   : > { %v6487_v47 = vmul.f32 %v8744_v31, %v8736_v33  ;;  %8747 = vrcp.f32 %v6819_v46  ;;  %v6823_v50 = vpop.permute.xlu0 %6822  ;;  %v8527_v33 = vpack.c.bf16 %v7613_v53, %v7612_v25 }
0x2df5   : > { %8314 = vmatmul.mubr.msk.f32.vlgmr.msra.gmra.mrb[72].mxu1 %vm1065_vm3, %v6487_v47  ;;  %v7016_v47 = vrot.slane %v9831_v37, %v9258_v58 }
0x2df6   : > { %v6656_v20 = vpop.permute.xlu1 %6655  ;;  %8323 = vmatprep.mubr.msk.f32.mxu1 %vm8848_vm0, %v8849_v6 }
0x2df7   : > { %8322 = vmatpush3.msra.mxu1 %v6656_v20 }
0x2df8   : > { %8331 = vmatprep.subr.mxu1 %v8849_v6 }
0x2df9   : > { %v8746_v48 = vpop.eup %8745 }
0x2dfa   : > { %v6654_v49 = vmul.f32 %v8746_v48, %v8738_v35 }
0x2dfc   : > { %8324 = vmatmul.mubr.msk.f32.vlgmr.msra.gmra.mrb[74].mxu1 %vm1065_vm3, %v6654_v49  ;;  %v7021_v49 = vrot.slane %v9831_v37, %v9261_v59  ;;  %v7628_v59 = vld [vmem:[%s10164_s0 + $0x1] ss:$0 sm:$0xff] }
0x2dfd   : > { %v8748_v52 = vpop.eup %8747  ;;  %8332 = vmatpush3.msra.mxu1 %v6823_v50  ;;  %8333 = vmatprep.mubr.msk.f32.mxu1 %vm8848_vm0, %v8849_v6 }
0x2dfe   : > { %v6821_v54 = vmul.f32 %v8748_v52, %v8740_v36  ;;  %8526 = vmatprep.subr.bf16.mxu1 %v8847_v3  ;;  %v7620_v36 = vld [vmem:[%s10160_s4 + $0x48] sm:$0xff] }
0x2dff   : > { %v8533_v38 = vpack.c.bf16 %v7620_v36, %v7619_v30 }
0x2e00   : > { %8334 = vmatmul.mubr.msk.f32.vlgmr.msra.gmra.mrb[76].mxu1 %vm1065_vm3, %v6821_v54  ;;  %v7625_v54 = vld [vmem:[%s10160_s4 + $0x70] sm:$0xff] }
0x2e01   : > { %8355 = vmatprep.mubr.msk.f32.mxu1 %vm8848_vm0, %v8849_v6  ;;  %8528 = vmatpush3.bf16.msra.mxu1 %v8527_v33 }
0x2e02   : > { %8529 = vmatprep.subr.bf16.mxu1 %v8847_v3 }
0x2e56   : > { %v6393_v43 = vpop.f32.mrb[70].mxu1 }
0x2e57   : > { %v8305_v51 = vpop.f32.mrb[71].mxu1 }
0x2ec8   : > { %v6560_v63 = vpop.f32.mrb[72].mxu1 }
0x2ec9   : > { %6899 = vrot.lane.b32.xlu1 %v6560_v63, %s10138_s18  ;;  %v8315_v15 = vpop.f32.mrb[73].mxu1 }
0x2ecf   : > { %v6727_v8 = vpop.f32.mrb[74].mxu1 }
0x2ed0   : > { %6903 = vrot.lane.b32.xlu0 %v6727_v8, %s10139_s26  ;;  %v8325_v11 = vpop.f32.mrb[75].mxu1  ;;  %s954_s26 = sand.u32 1, %s8807_s16  }
0x2ed1   : > { %s7446_s2 = sshll.u32 %s954_s26, 3  ;;  %s7310_s3 = scalar_lea.sflag [#allocation3], %s954_s26 }
0x2ed2   : > { %s956_s23 = scalar_lea.vmem [#allocation2], %s7446_s2 }
0x2ed3   : > { %v6894_v21 = vpop.f32.mrb[76].mxu1  ;;  %s7323_s1 = sshll.u32 %s956_s23, 4  ;;  %s9976_s1 = int_to_ptr.vmem [resolvable:$true] %s7323_s1 }
0x2ed4   : > { %6907 = vrot.lane.b32.xlu1 %v6894_v21, %s10140_s10  ;;  %v8335_v57 = vpop.f32.mrb[77].mxu1  ;;  %s7633_s10 = sshll.u32 %s10168_s21, 7  ;;  %s8753_s8 = scalar_lea.vmem %s9976_s1, 128 }
0x2ed5   : > { %s9974_s28 = scalar_lea.hbm %s10169_s25, %s7633_s10  ;;  %p8754_p11 = scmp.ne.s32.totalorder %s9976_s1, %s8753_s8 }
0x2ed6   : > { %p8760_p0 = scmp.lt.s32.totalorder %s9976_s1, %s8758_s15 }
0x2ed7   : > { %p8755_p12 = pnand %p8754_p11, %p9064_p5 }
0x2ed9   : > { %p8756_p13 = pneg %p8755_p12 }
0x2f3b   : > { %v6900_v1 = vpop.permute.xlu1 %6899 }
0x2f3c   : > { %v6910_v5 = vsel %vm1065_vm3, %v6393_v43, %v6900_v1  ;;  %v7626_v43 = vld [vmem:[%s10160_s4 + $0x78] sm:$0xff] }
0x2f3d   : > { %v8542_v51 = vpack.c.bf16 %v7626_v43, %v7625_v54 }
0x2f42   : > { %v6904_v2 = vpop.permute.xlu0 %6903 }
0x2f43   : > { %v6911_v7 = vsel %vm1749_vm6, %v6910_v5, %v6904_v2  ;;  %v7224_v2 = vld [vmem:[%s10166_s13] sm:$0xff]  ;;  %v7225_v5 = vld [vmem:[%s10166_s13 + $0x8] sm:$0xff] }
0x2f46   : > { %v6908_v10 = vpop.permute.xlu1 %6907 }
0x2f47   : > { %v6912_v4 = vsel %vm1751_vm7, %v6911_v7, %v6908_v10  ;;  %v8545_v7 = vpack.c.bf16 %v7225_v5, %v7224_v2  ;;  %v7226_v10 = vld [vmem:[%s10166_s13 + $0x10] sm:$0xff] }
0x2f48   : > { %8345 = vmatmul.mubr.msk.f32.vlgmr.msra.gmra.mrb[56].mxu0 %vm988_vm1, %v6912_v4  ;;  %v7227_v4 = vld [vmem:[%s10166_s13 + $0x18] sm:$0xff] }
0x2f49   : > { %8374 = vmatprep.mubr.msk.f32.mxu0 %vm8848_vm0, %v8849_v6  ;;  %8534 = vmatpush3.bf16.msra.mxu0 %v8533_v38 }
0x2f4a   : > { %8535 = vmatprep.subr.bf16.mxu0 %v8847_v3 }
0x2f4d   : > { %8537 = vmatpush3.bf16.msra.mxu0 %v8536_v40 }
0x2f4e   : > { %8538 = vmatprep.subr.bf16.mxu0 %v8847_v3 }
0x2f51   : > { %8540 = vmatpush3.bf16.msra.mxu0 %v8539_v24 }
0x2f52   : > { %8541 = vmatprep.subr.bf16.mxu0 %v8847_v3 }
0x2f55   : > { %8543 = vmatpush3.bf16.msra.mxu0 %v8542_v51 }
0x301b   : > { %v6995_v18 = vpop.f32.mrb[56].mxu0 }
0x301c   : > { %v6996_v0 = vadd.f32 %v7610_v17, %v6995_v18  ;;  %v8346_v26 = vpop.f32.mrb[57].mxu0  ;;  %v8548_v17 = vpack.c.bf16 %v7227_v4, %v7226_v10 }
0x301e   : > { %v6999_v19 = vadd.f32 %v6996_v0, %v9837_v44  ;;  %v7614_v44 = vld [vmem:[%s10165_s5 + $0x30] sm:$0xff] }
0x301f   : > { %v8530_v35 = vpack.c.bf16 %v7615_v34, %v7614_v44 }
0x3020   : > { %v7000_v27 = vsel %vm988_vm1, %v6999_v19, 0.0 }
0x3021   : > { %7001 = vadd.xlane.f32.xlu0 %v7000_v27  ;;  %8531 = vmatpush3.bf16.msra.mxu1 %v8530_v35 }
0x3022   : > { %8544 = vmatprep.subr.bf16.mxu1 %v8847_v3 }
0x30ae   : > { %v7002_v22 = vpop.xlane.xlu0 %7001 }
0x30af   : > { %v7003_v28 = vmul.f32 0.03125, %v7002_v22 }
0x30b1   : > { %v7004_v29 = vsub.f32 %v6999_v19, %v7003_v28  ;;  %v7217_v19 = vrot.slane %v9831_v37, %v5175_v12 }
0x30b3   : > { %v7005_v16 = vmul.f32 %v7004_v29, %v7004_v29 }
0x30b5   : > { %v7006_v14 = vsel %vm988_vm1, %v7005_v16, 0.0  ;;  %v7630_v16 = vld [vmem:[%s10167_s17] ss:$0 sm:$0xff]  ;;  %s8759_s17 = scalar_lea.vmem %s8758_s15, 256 }
0x30b6   : > { %7007 = vadd.xlane.f32.xlu1 %v7006_v14  ;;  %p8761_p1 = scmp.lt.s32.totalorder %s8759_s17, %s8753_s8 }
0x30b8   : > { %p8762_p2 = por %p8761_p1, %p8760_p0 }
0x30ba   : > { %p8763_p3 = pnand %p8762_p2, %p8756_p13 }
0x3143   : > { %v7008_v45 = vpop.xlane.xlu1 %7007 }
0x3144   : > { %v7009_v31 = vmul.f32 0.03125, %v7008_v45 }
0x3146   : > { %v7010_v46 = vadd.f32 1e-05, %v7009_v31 }
0x3148   : > { %8749 = vrsqrt.f32 %v7010_v46 }
0x3152   : > { %v8750_v20 = vpop.eup %8749 }
0x3153   : > { %v7012_v48 = vmul.f32 %v8750_v20, %v7004_v29 }
0x3155   : > { %v7017_v50 = vmul.f32 %v7016_v47, %v7012_v48 }
0x3157   : > { %v7022_v52 = vadd.f32 %v7021_v49, %v7017_v50 }
0x3159   : > { %8356 = vmatmul.mubr.msk.f32.vlgmr.msra.gmra.mrb[78].mxu1 %vm988_vm1, %v7022_v52 }
0x315a   : > { %8385 = vmatprep.mubr.msk.f32.mxu1 %vm8848_vm0, %v8849_v6  ;;  %8546 = vmatpush3.bf16.msra.mxu1 %v8545_v7 }
0x315b   : > { %8547 = vmatprep.subr.bf16.mxu1 %v8847_v3  ;;  %v7222_v3 = vrot.slane %v9831_v37, %v5180_v13 }
0x315e   : > { %8549 = vmatpush3.bf16.msra.mxu1 %v8548_v17 }
0x322c   : > { %v7105_v56 = vpop.f32.mrb[78].mxu1 }
0x322d   : > { %v7106_v58 = vadd.f32 %v7617_v55, %v7105_v56  ;;  %v8357_v32 = vpop.f32.mrb[79].mxu1 }
0x322f   : > { %v7109_v60 = vmax.f32 %v7106_v58, 0.0 }
0x3231   : > { %8375 = vmatmul.mubr.msk.f32.vlgmr.msra.gmra.mrb[58].mxu0 %vm1962_vm8, %v7109_v60 }
0x3304   : > { %v7196_v61 = vpop.f32.mrb[58].mxu0 }
0x3305   : > { %v7197_v62 = vadd.f32 %v7628_v59, %v7196_v61  ;;  %v8376_v63 = vpop.f32.mrb[59].mxu0 }
0x3307   : > { %v7200_v6 = vadd.f32 %v7197_v62, %v7022_v52 }
0x3309   : > { %v7201_v15 = vsel %vm988_vm1, %v7200_v6, 0.0 }
0x330a   : > { %7202 = vadd.xlane.f32.xlu0 %v7201_v15 }
0x3397   : > { %v7203_v8 = vpop.xlane.xlu0 %7202 }
0x3398   : > { %v7204_v11 = vmul.f32 0.03125, %v7203_v8 }
0x339a   : > { %v7205_v21 = vsub.f32 %v7200_v6, %v7204_v11 }
0x339c   : > { %v7206_v57 = vmul.f32 %v7205_v21, %v7205_v21 }
0x339e   : > { %v7207_v1 = vsel %vm988_vm1, %v7206_v57, 0.0 }
0x339f   : > { %7208 = vadd.xlane.f32.xlu0 %v7207_v1 }
0x342c   : > { %v7209_v18 = vpop.xlane.xlu0 %7208 }
0x342d   : > { %v7210_v0 = vmul.f32 0.03125, %v7209_v18 }
0x342f   : > { %v7211_v26 = vadd.f32 1e-05, %v7210_v0 }
0x3431   : > { %8751 = vrsqrt.f32 %v7211_v26 }
0x343b   : > { %v8752_v27 = vpop.eup %8751 }
0x343c   : > { %v7213_v22 = vmul.f32 %v8752_v27, %v7205_v21 }
0x343e   : > { %v7218_v28 = vmul.f32 %v7217_v19, %v7213_v22 }
0x3440   : > { %v7223_v29 = vadd.f32 %v7222_v3, %v7218_v28 }
0x3442   : > { %8386 = vmatmul.mubr.msk.f32.vlgmr.msra.gmra.mrb[80].mxu1 %vm988_vm1, %v7223_v29 }
0x3515   : > { %v7304_v14 = vpop.f32.mrb[80].mxu1 }
0x3516   : > { %v7305_v12 = vadd.f32 %v7630_v16, %v7304_v14  ;;  %v8387_v25 = vpop.f32.mrb[81].mxu1 }
0x3518   : > { %7308 = vst [vmem:[%s956_s23] sm:$0xff] %v7305_v12 }
0x3519   : > { %8766 = shalt.err (!%p8763_p3)
}
0x351a   : > { %s8767_s21 = scalar_lea.hbm %s9974_s28, 128  ;;  %s8771_s26 = scalar_lea.hbm %s10169_s25, 256 }
0x351b   : > { %p8768_p4 = scmp.ne.s32.totalorder %s9974_s28, %s8767_s21  ;;  %p8772_p9 = scmp.lt.u32.totalorder %s9974_s28, %s10169_s25 }
0x351c   : > { %p8773_p10 = scmp.lt.u32.totalorder %s8771_s26, %s8767_s21  ;;  %p8775_p12 = scmp.lt.u32.totalorder %s8767_s21, %s9974_s28 }
0x351d   : > { %p8769_p7 = pnand %p8768_p4, %p9064_p5 }
0x351e   : > { %p8774_p11 = por %p8773_p10, %p8772_p9 }
0x351f   : > { %p8770_p8 = pneg %p8769_p7 }
0x3520   : > { %p8776_p0 = por %p8775_p12, %p8774_p11 }
0x3522   : > { %p8777_p13 = pnand %p8776_p0, %p8770_p8 }
0x3524   : > { %8780 = shalt.err (!%p8777_p13)
}
0x3525   : > { %8550 = dma.vmem_to_hbm [thread:$0]  (%p9064_p5), %s9976_s1, 128, %s9974_s28, %s7310_s3  }
0x3526 PF: > { %s10171_s2 = sld [smem:[#allocation36_spill]]  ;;  %s10172_s10 = sld [smem:[#allocation34_spill]] }
0x352c   : > { %p8556_p1 = scmp.ge.s32.totalorder %s10171_s2, 2  ;;  %s7335_s8 = sand.u32 1, %s10172_s10  }
0x352d   : > { %s7336_s22 = scalar_lea.sflag [#allocation3], %s7335_s8 }
0x352e   : > { %p8553_p2 = pnand %p8556_p1, %p9068_p6 }
0x3530   : > { %8798 = dma.done.wait (!%p8553_p2), %s7336_s22, 128  }
0x3531   : > { %8800 = vsyncadd (!%p8553_p2), %s7336_s22, 4294967168  ;;  %s10174_s22 = sld [smem:[#allocation38_spill]]  ;;  %s10175_s17 = sld [smem:[#allocation35_spill]] }
0x3532   : > { %s10176_s18 = sld [smem:[#allocation39_spill]]  ;;  %s10177_s15 = smov %s8807_s16 }
0x3537   : > { %p71_p3 = scmp.ge.s32.totalorder %s10174_s22, 4   ;;  %s10178_s16 = smov %s10175_s17 }
0x3539   :  { %73 = sbr.rel (!%p71_p3) target bundleno = 74 (0x4a), region = 238 }
0x3540   :  { %7341 = vsyncpa [#allocation3], 1 }
0x3541   :  { %7343 = vsyncpa [#allocation3 + $0x1], 1 }

</bundles_post_ra>
